<compile_context>
chip_gen: v5e
topology: v5e:2x2
jax: 0.10.0
libtpu: 0.0.40
codegen_flags: <defaults>
</compile_context>

<pallas_src>
import functools
import math

import jax
import jax.numpy as jnp
from jax import lax
from jax.experimental import pallas as pl
from jax.experimental.pallas import tpu as pltpu


# ----------------------------------------------------------------------------
# Pallas kernels
# ----------------------------------------------------------------------------

def _style_kernel(w0_ref, w1_ref, w2_ref, A0_ref, b0_ref, A1_ref, b1_ref,
                  A2_ref, b2_ref, W0sq_ref, W1sq_ref,
                  s0_ref, d0_ref, s1_ref, d1_ref, s2_ref, *, rgb_gain):
    """All three affine layers + hoisted demodulation coefficients in one call."""
    s0 = jnp.dot(w0_ref[...], A0_ref[...], preferred_element_type=jnp.float32) + b0_ref[...]
    s0_ref[...] = s0
    d0_ref[...] = lax.rsqrt(
        jnp.dot(s0 * s0, W0sq_ref[...], preferred_element_type=jnp.float32) + 1e-8)
    s1 = jnp.dot(w1_ref[...], A1_ref[...], preferred_element_type=jnp.float32) + b1_ref[...]
    s1_ref[...] = s1
    d1_ref[...] = lax.rsqrt(
        jnp.dot(s1 * s1, W1sq_ref[...], preferred_element_type=jnp.float32) + 1e-8)
    s2_ref[...] = (jnp.dot(w2_ref[...], A2_ref[...], preferred_element_type=jnp.float32)
                   + b2_ref[...]) * rgb_gain


def _mod_conv3x3(x, s_row, d_col, w_ref, mask_ref, xp_ref, H, W):
    """Modulated+demodulated 3x3 conv as 9 accumulating matmuls.

    x: (Cin, HW) flattened activation; s_row: (1, Cin) styles; d_col: (O, 1) demod;
    w_ref: (9, O, Cin) taps ordered t = ky*3 + kx; mask_ref: (9, HW) zero-pad masks;
    xp_ref: (Cin, HW + 2*(W+1)) VMEM scratch (in-kernel zero padding).
    """
    HW = H * W
    PAD = W + 1
    Cin = x.shape[0]
    zpad = jnp.zeros((Cin, PAD), jnp.float32)
    xp_ref[:, 0:PAD] = zpad
    xp_ref[:, PAD + HW:PAD + HW + PAD] = zpad
    xp_ref[:, PAD:PAD + HW] = x

    acc = None
    t = 0
    for dy in (-1, 0, 1):
        for dx in (-1, 0, 1):
            off = dy * W + dx
            xt = xp_ref[:, PAD + off:PAD + off + HW] * mask_ref[t:t + 1, :]   # (Cin, HW)
            w_eff = w_ref[t] * s_row * d_col                                   # (O, Cin)
            part = jnp.dot(w_eff, xt, preferred_element_type=jnp.float32)      # (O, HW)
            acc = part if acc is None else acc + part
            t += 1
    return acc


def _modconv3_kernel(x_ref, s_ref, d_ref, w_ref, mask_ref, o_ref, xp_ref, *, H, W):
    # conv0: modulated conv only (epilogue is fused into the upsample kernel downstream).
    o_ref[0] = _mod_conv3x3(x_ref[0], s_ref[0], d_ref[0], w_ref, mask_ref, xp_ref, H, W)


def _upblur(v, mh_ref, mv_ref, C, H, W):
    """Polyphase SmoothUpsample (nearest-2x + edge-pad + 4x4 binomial blur) of a
    low-res (C, H, W) value, via two small batched MXU matmuls -> (C, 2H, 2W)."""
    mhb = jnp.broadcast_to(mh_ref[...], (C, W, 2 * W))
    t = jnp.einsum('chw,cwx->chx', v, mhb, preferred_element_type=jnp.float32)   # cols
    mvb = jnp.broadcast_to(mv_ref[...], (C, 2 * H, H))
    return jnp.einsum('crh,chx->crx', mvb, t, preferred_element_type=jnp.float32)  # rows


def _upblur_pair_kernel(h_ref, img_ref, mh_ref, mv_ref, noise_ref, bias_ref,
                        hact_ref, imgup_ref, *, Ch, Ci, H, W, act_gain, clamp):
    # SmoothUpsample of conv0 output (+ fused noise/bias/lrelu/clamp) and of img.
    hu = _upblur(h_ref[0], mh_ref, mv_ref, Ch, H, W)                 # (Ch, 2H, 2W)
    r = hu + noise_ref[...] + bias_ref[...]                          # +(1,2H,2W) +(Ch,1,1)
    r = jnp.where(r >= 0.0, r, 0.2 * r) * act_gain
    hact_ref[0] = jnp.clip(r, -clamp, clamp)
    imgup_ref[0] = _upblur(img_ref[0], mh_ref, mv_ref, Ci, H, W)     # (Ci, 2H, 2W)


def _conv1_torgb_kernel(x_ref, s1_ref, d1_ref, w1_ref, mask_ref, noise_ref, b1_ref,
                        s2_ref, wrgb_ref, brgb_ref, imgup_ref,
                        xout_ref, imgout_ref, xp_ref, *, H, W, act_gain, clamp):
    # conv1 modulated conv + fused noise/bias/lrelu/clamp epilogue.
    acc = _mod_conv3x3(x_ref[0], s1_ref[0], d1_ref[0], w1_ref, mask_ref, xp_ref, H, W)
    v = acc + noise_ref[...] + b1_ref[...]            # (Cout,HW) + (1,HW) + (Cout,1)
    v = jnp.where(v >= 0.0, v, 0.2 * v) * act_gain
    v = jnp.clip(v, -clamp, clamp)
    xout_ref[0] = v
    # ToRGB: 1x1 modulated conv (demodulate=False) + bias + clamp + upsampled-img add,
    # fused so x_out never makes an extra HBM round trip.
    y = jnp.dot(wrgb_ref[...] * s2_ref[0], v, preferred_element_type=jnp.float32)  # (3, HW)
    imgout_ref[0] = imgup_ref[0] + jnp.clip(y + brgb_ref[...], -256.0, 256.0)


# ----------------------------------------------------------------------------
# Wrapper glue
# ----------------------------------------------------------------------------

def _tap_masks(H, W):
    """(9, H*W) f32 validity masks reproducing zero padding for each 3x3 tap."""
    pidx = jnp.arange(H * W, dtype=jnp.int32)
    hh = pidx // W
    ww = pidx % W
    rows = []
    for dy in (-1, 0, 1):
        for dx in (-1, 0, 1):
            ok = (hh + dy >= 0) & (hh + dy < H) & (ww + dx >= 0) & (ww + dx < W)
            rows.append(ok.astype(jnp.float32))
    return jnp.stack(rows, axis=0)


def _polyphase_matrices(n):
    """Per-axis polyphase weights of: nearest-2x upsample, edge pad (2,1), [1,3,3,1]/8 blur.

    Returns mh (n, 2n) for right-multiplication along the minor axis and
    mv (2n, n) = mh.T for left-multiplication along the row axis."""
    g = (1.0, 3.0, 3.0, 1.0)
    mh = [[0.0] * (2 * n) for _ in range(n)]
    for o in range(2 * n):
        for k in range(4):
            u = min(max(o + k - 2, 0), 2 * n - 1)
            mh[u // 2][o] += g[k] / 8.0
    mv = [[mh[h][r] for h in range(n)] for r in range(2 * n)]
    return jnp.array(mh, jnp.float32), jnp.array(mv, jnp.float32)


def synthesis_block_forward(x, img, ws, p, noise_mode="const", gain=1.0):
    """x: (B, Cin, H, W), img: (B, img_ch, H, W), ws: (B, 3, w_dim) -> (x_out, img_out)."""
    assert noise_mode == "const"
    B, Cin, H, W = x.shape
    assert H == W, "module is defined for square resolutions"
    Cout = p["conv0_w"].shape[0]
    img_ch = p["rgb_w"].shape[0]
    res = 2 * H
    HWi, HWo = H * W, res * res
    w_dim = p["aff0_w"].shape[1]
    act_gain = math.sqrt(2.0) * gain            # lrelu def_gain * gain
    clamp = 256.0 * gain
    f32 = jnp.float32

    # ---- one-time parameter prep (tiny plain-JAX glue) ----
    aff_gain = 1.0 / math.sqrt(w_dim)
    A0 = (p["aff0_w"] * aff_gain).T.astype(f32)                 # (w_dim, Cin)
    A1 = (p["aff1_w"] * aff_gain).T.astype(f32)                 # (w_dim, Cout)
    A2 = (p["affrgb_w"] * aff_gain).T.astype(f32)               # (w_dim, Cout)
    b0 = p["aff0_b"].reshape(1, Cin).astype(f32)
    b1 = p["aff1_b"].reshape(1, Cout).astype(f32)
    b2 = p["affrgb_b"].reshape(1, Cout).astype(f32)
    W0sq = jnp.sum(p["conv0_w"].astype(f32) ** 2, axis=(2, 3)).T    # (Cin, Cout)
    W1sq = jnp.sum(p["conv1_w"].astype(f32) ** 2, axis=(2, 3)).T    # (Cout, Cout)
    w0taps = jnp.transpose(p["conv0_w"].astype(f32), (2, 3, 0, 1)).reshape(9, Cout, Cin)
    w1taps = jnp.transpose(p["conv1_w"].astype(f32), (2, 3, 0, 1)).reshape(9, Cout, Cout)
    wrgb = p["rgb_w"].reshape(img_ch, Cout).astype(f32)
    brgb = p["rgb_b"].reshape(img_ch, 1).astype(f32)
    bias1 = p["conv1_b"].reshape(Cout, 1).astype(f32)
    bias0 = p["conv0_b"].reshape(Cout, 1, 1).astype(f32)
    noise0 = (p["noise_const0"] * p["noise_str0"]).reshape(1, res, res).astype(f32)
    noise1 = (p["noise_const1"] * p["noise_str1"]).reshape(1, HWo).astype(f32)
    masks_lo = _tap_masks(H, W)
    masks_hi = _tap_masks(res, res)
    mh = _polyphase_matrices(W)[0]                              # (W, 2W)
    mv = _polyphase_matrices(H)[1]                              # (2H, H)

    # ---- styles + demodulation coefficients (single tiny Pallas call) ----
    s0, d0, s1, d1, s2 = pl.pallas_call(
        functools.partial(_style_kernel, rgb_gain=1.0 / math.sqrt(Cout)),
        out_shape=(jax.ShapeDtypeStruct((B, Cin), f32),
                   jax.ShapeDtypeStruct((B, Cout), f32),
                   jax.ShapeDtypeStruct((B, Cout), f32),
                   jax.ShapeDtypeStruct((B, Cout), f32),
                   jax.ShapeDtypeStruct((B, Cout), f32)),
    )(ws[:, 0, :].astype(f32), ws[:, 1, :].astype(f32), ws[:, 2, :].astype(f32),
      A0, b0, A1, b1, A2, b2, W0sq, W1sq)
    s0r = s0.reshape(B, 1, Cin)
    s1r = s1.reshape(B, 1, Cout)
    s2r = s2.reshape(B, 1, Cout)
    d0r = d0.reshape(B, Cout, 1)
    d1r = d1.reshape(B, Cout, 1)

    # ---- conv0: modulated 3x3 conv at low resolution ----
    h_lo = pl.pallas_call(
        functools.partial(_modconv3_kernel, H=H, W=W),
        out_shape=jax.ShapeDtypeStruct((B, Cout, HWi), f32),
        grid_spec=pltpu.PrefetchScalarGridSpec(
            num_scalar_prefetch=0,
            grid=(B,),
            in_specs=[
                pl.BlockSpec((1, Cin, HWi), lambda b: (b, 0, 0)),
                pl.BlockSpec((1, 1, Cin), lambda b: (b, 0, 0)),
                pl.BlockSpec((1, Cout, 1), lambda b: (b, 0, 0)),
                pl.BlockSpec((9, Cout, Cin), lambda b: (0, 0, 0)),
                pl.BlockSpec((9, HWi), lambda b: (0, 0)),
            ],
            out_specs=pl.BlockSpec((1, Cout, HWi), lambda b: (b, 0, 0)),
            scratch_shapes=[pltpu.VMEM((Cin, HWi + 2 * (W + 1)), f32)],
        ),
        compiler_params=pltpu.CompilerParams(dimension_semantics=("parallel",)),
    )(x.reshape(B, Cin, HWi).astype(f32), s0r, d0r, w0taps, masks_lo)

    # ---- polyphase SmoothUpsample of conv0 output (+ fused epilogue) and of img ----
    h_act4, img_up4 = pl.pallas_call(
        functools.partial(_upblur_pair_kernel, Ch=Cout, Ci=img_ch, H=H, W=W,
                          act_gain=act_gain, clamp=clamp),
        out_shape=(jax.ShapeDtypeStruct((B, Cout, res, res), f32),
                   jax.ShapeDtypeStruct((B, img_ch, res, res), f32)),
        grid_spec=pltpu.PrefetchScalarGridSpec(
            num_scalar_prefetch=0,
            grid=(B,),
            in_specs=[
                pl.BlockSpec((1, Cout, H, W), lambda b: (b, 0, 0, 0)),     # conv0 out (lo res)
                pl.BlockSpec((1, img_ch, H, W), lambda b: (b, 0, 0, 0)),   # img (lo res)
                pl.BlockSpec((W, 2 * W), lambda b: (0, 0)),                # polyphase cols
                pl.BlockSpec((res, H), lambda b: (0, 0)),                  # polyphase rows
                pl.BlockSpec((1, res, res), lambda b: (0, 0, 0)),          # noise0
                pl.BlockSpec((Cout, 1, 1), lambda b: (0, 0, 0)),           # bias0
            ],
            out_specs=(pl.BlockSpec((1, Cout, res, res), lambda b: (b, 0, 0, 0)),
                       pl.BlockSpec((1, img_ch, res, res), lambda b: (b, 0, 0, 0))),
        ),
        compiler_params=pltpu.CompilerParams(dimension_semantics=("parallel",)),
    )(h_lo.reshape(B, Cout, H, W), img.astype(f32), mh, mv, noise0, bias0)
    h_act = h_act4.reshape(B, Cout, HWo)
    img_up = img_up4.reshape(B, img_ch, HWo)

    # ---- conv1 (fused epilogue) + ToRGB + img add, one kernel ----
    x_out_flat, img_out_flat = pl.pallas_call(
        functools.partial(_conv1_torgb_kernel, H=res, W=res, act_gain=act_gain, clamp=clamp),
        out_shape=(jax.ShapeDtypeStruct((B, Cout, HWo), f32),
                   jax.ShapeDtypeStruct((B, img_ch, HWo), f32)),
        grid_spec=pltpu.PrefetchScalarGridSpec(
            num_scalar_prefetch=0,
            grid=(B,),
            in_specs=[
                pl.BlockSpec((1, Cout, HWo), lambda b: (b, 0, 0)),      # activation
                pl.BlockSpec((1, 1, Cout), lambda b: (b, 0, 0)),        # s1
                pl.BlockSpec((1, Cout, 1), lambda b: (b, 0, 0)),        # d1
                pl.BlockSpec((9, Cout, Cout), lambda b: (0, 0, 0)),     # conv1 taps
                pl.BlockSpec((9, HWo), lambda b: (0, 0)),               # masks
                pl.BlockSpec((1, HWo), lambda b: (0, 0)),               # noise row
                pl.BlockSpec((Cout, 1), lambda b: (0, 0)),              # bias column
                pl.BlockSpec((1, 1, Cout), lambda b: (b, 0, 0)),        # s2
                pl.BlockSpec((img_ch, Cout), lambda b: (0, 0)),         # rgb weight
                pl.BlockSpec((img_ch, 1), lambda b: (0, 0)),            # rgb bias
                pl.BlockSpec((1, img_ch, HWo), lambda b: (b, 0, 0)),    # upsampled img
            ],
            out_specs=(pl.BlockSpec((1, Cout, HWo), lambda b: (b, 0, 0)),
                       pl.BlockSpec((1, img_ch, HWo), lambda b: (b, 0, 0))),
            scratch_shapes=[pltpu.VMEM((Cout, HWo + 2 * (res + 1)), f32)],
        ),
        compiler_params=pltpu.CompilerParams(dimension_semantics=("parallel",)),
    )(h_act, s1r, d1r, w1taps, masks_hi, noise1, bias1, s2r, wrgb, brgb, img_up)

    return (x_out_flat.reshape(B, Cout, res, res),
            img_out_flat.reshape(B, img_ch, res, res))


# ----------------------------------------------------------------------------
# Pure-JAX reference (NCHW) for correctness check
# ----------------------------------------------------------------------------

def _ref_fc(x, weight, bias, weight_gain):
    return x @ (weight * weight_gain).T + bias


def _ref_modconv(x, weight, styles, padding, demodulate):
    B = x.shape[0]
    w = weight[None] * styles[:, None, :, None, None]
    if demodulate:
        d = lax.rsqrt(jnp.sum(w * w, axis=(2, 3, 4)) + 1e-8)
        w = w * d[:, :, None, None, None]
    outs = []
    for b in range(B):
        outs.append(lax.conv_general_dilated(
            x[b:b + 1], w[b], (1, 1), [(padding, padding), (padding, padding)],
            dimension_numbers=("NCHW", "OIHW", "NCHW")))
    return jnp.concatenate(outs, axis=0)


def _ref_upsample(x):
    C = x.shape[1]
    xu = jnp.repeat(jnp.repeat(x, 2, axis=2), 2, axis=3)
    xp = jnp.pad(xu, ((0, 0), (0, 0), (2, 1), (2, 1)), mode="edge")
    k1 = jnp.array([1.0, 3.0, 3.0, 1.0], jnp.float32)
    k = jnp.outer(k1, k1) / 64.0
    wk = jnp.tile(k[None, None], (C, 1, 1, 1))
    return lax.conv_general_dilated(
        xp, wk, (1, 1), [(0, 0), (0, 0)],
        dimension_numbers=("NCHW", "OIHW", "NCHW"), feature_group_count=C)


def _ref_lrelu_post(x, noise, bias, act_gain, clamp):
    v = x + noise[None, None, :, :] + bias[None, :, None, None]
    v = jnp.where(v >= 0.0, v, 0.2 * v) * act_gain
    return jnp.clip(v, -clamp, clamp)


def reference_forward(x, img, ws, p):
    w_dim = p["aff0_w"].shape[1]
    Cout = p["conv0_w"].shape[0]
    act_gain = math.sqrt(2.0)
    w0, w1, w2 = ws[:, 0, :], ws[:, 1, :], ws[:, 2, :]
    s0 = _ref_fc(w0, p["aff0_w"], p["aff0_b"], 1.0 / math.sqrt(w_dim))
    h = _ref_modconv(x, p["conv0_w"], s0, 1, True)
    h = _ref_upsample(h)
    h = _ref_lrelu_post(h, p["noise_const0"] * p["noise_str0"], p["conv0_b"], act_gain, 256.0)
    s1 = _ref_fc(w1, p["aff1_w"], p["aff1_b"], 1.0 / math.sqrt(w_dim))
    h2 = _ref_modconv(h, p["conv1_w"], s1, 1, True)
    x_out = _ref_lrelu_post(h2, p["noise_const1"] * p["noise_str1"], p["conv1_b"], act_gain, 256.0)
    s2 = _ref_fc(w2, p["affrgb_w"], p["affrgb_b"], 1.0 / math.sqrt(w_dim)) / math.sqrt(Cout)
    y = _ref_modconv(x_out, p["rgb_w"], s2, 0, False)
    img_out = _ref_upsample(img) + jnp.clip(y + p["rgb_b"][None, :, None, None], -256.0, 256.0)
    return x_out, img_out


# ----------------------------------------------------------------------------
# Main
# ----------------------------------------------------------------------------

if __name__ == "__main__":
    B, Cin, Cout, w_dim, res, img_ch = 2, 4, 8, 32, 32, 3
    H_in = res // 2                                   # 16

    key = jax.random.PRNGKey(0)
    ks = jax.random.split(key, 16)

    # forward inputs (NCHW like the module): x [2,4,16,16], img [2,3,16,16], ws [2,3,32]
    x = jax.random.normal(ks[0], (B, Cin, H_in, H_in), jnp.float32)
    img = jax.random.normal(ks[1], (B, img_ch, H_in, H_in), jnp.float32)
    ws = jax.random.normal(ks[2], (B, 3, w_dim), jnp.float32)

    # deterministic parameters (shapes per module __init__; values synthetic)
    params = dict(
        aff0_w=jax.random.normal(ks[3], (Cin, w_dim), jnp.float32),
        aff0_b=jnp.ones((Cin,), jnp.float32),                      # bias_init=1
        conv0_w=jax.random.normal(ks[4], (Cout, Cin, 3, 3), jnp.float32),
        conv0_b=0.1 * jax.random.normal(ks[5], (Cout,), jnp.float32),
        noise_const0=jax.random.normal(ks[6], (res, res), jnp.float32),
        noise_str0=jnp.float32(0.1),
        aff1_w=jax.random.normal(ks[7], (Cout, w_dim), jnp.float32),
        aff1_b=jnp.ones((Cout,), jnp.float32),
        conv1_w=jax.random.normal(ks[8], (Cout, Cout, 3, 3), jnp.float32),
        conv1_b=0.1 * jax.random.normal(ks[9], (Cout,), jnp.float32),
        noise_const1=jax.random.normal(ks[10], (res, res), jnp.float32),
        noise_str1=jnp.float32(0.15),
        affrgb_w=jax.random.normal(ks[11], (Cout, w_dim), jnp.float32),
        affrgb_b=jnp.ones((Cout,), jnp.float32),
        rgb_w=jax.random.normal(ks[12], (img_ch, Cout, 1, 1), jnp.float32),
        rgb_b=0.1 * jax.random.normal(ks[13], (img_ch,), jnp.float32),
    )

    fwd = jax.jit(synthesis_block_forward)
    x_out, img_out = fwd(x, img, ws, params)
    jax.block_until_ready((x_out, img_out))

    x_ref, img_ref = reference_forward(x, img, ws, params)
    dx = float(jnp.max(jnp.abs(x_out - x_ref)))
    di = float(jnp.max(jnp.abs(img_out - img_ref)))
    assert dx < 2e-3 and di < 2e-3, f"mismatch: x={dx}, img={di}"

    print("KERNEL_OK")
</pallas_src>

<mosaic_0001>
module attributes {stable_mosaic.version = 11 : i64} {
  func.func @_style_kernel(%arg0: memref<2x32xf32, #tpu.memory_space<vmem>>, %arg1: memref<2x32xf32, #tpu.memory_space<vmem>>, %arg2: memref<2x32xf32, #tpu.memory_space<vmem>>, %arg3: memref<32x4xf32, #tpu.memory_space<vmem>>, %arg4: memref<1x4xf32, #tpu.memory_space<vmem>>, %arg5: memref<32x8xf32, #tpu.memory_space<vmem>>, %arg6: memref<1x8xf32, #tpu.memory_space<vmem>>, %arg7: memref<32x8xf32, #tpu.memory_space<vmem>>, %arg8: memref<1x8xf32, #tpu.memory_space<vmem>>, %arg9: memref<4x8xf32, #tpu.memory_space<vmem>>, %arg10: memref<8x8xf32, #tpu.memory_space<vmem>>, %arg11: memref<2x4xf32, #tpu.memory_space<vmem>>, %arg12: memref<2x8xf32, #tpu.memory_space<vmem>>, %arg13: memref<2x8xf32, #tpu.memory_space<vmem>>, %arg14: memref<2x8xf32, #tpu.memory_space<vmem>>, %arg15: memref<2x8xf32, #tpu.memory_space<vmem>>) attributes {dimension_semantics = [], scalar_prefetch = 0 : i64, scratch_operands = 0 : i64, tpu.core_type = #tpu.core_type<tc>} {
    %c0 = arith.constant 0 : index
    %c0_0 = arith.constant 0 : index
    %0 = vector.load %arg0[%c0, %c0_0] : memref<2x32xf32, #tpu.memory_space<vmem>>, vector<2x32xf32>
    %c0_1 = arith.constant 0 : index
    %c0_2 = arith.constant 0 : index
    %1 = vector.load %arg3[%c0_1, %c0_2] : memref<32x4xf32, #tpu.memory_space<vmem>>, vector<32x4xf32>
    %cst = arith.constant dense<0.000000e+00> : vector<2x4xf32>
    %2 = tpu.matmul %0, %1, %cst {dimension_numbers = #tpu.dot_dimension_numbers<[1], [0], [0], [1], [0, 0, 1, 1], [], []>} : vector<2x32xf32>, vector<32x4xf32>, vector<2x4xf32> -> vector<2x4xf32>
    %c0_3 = arith.constant 0 : index
    %c0_4 = arith.constant 0 : index
    %3 = vector.load %arg4[%c0_3, %c0_4] : memref<1x4xf32, #tpu.memory_space<vmem>>, vector<1x4xf32>
    %4 = vector.broadcast %3 : vector<1x4xf32> to vector<2x4xf32>
    %5 = arith.addf %2, %4 : vector<2x4xf32>
    %c0_5 = arith.constant 0 : index
    %c0_6 = arith.constant 0 : index
    %6 = vector.load %arg11[%c0_5, %c0_6] : memref<2x4xf32, #tpu.memory_space<vmem>>, vector<2x4xf32>
    tpu.vector_store %arg11[%c0_5, %c0_6], %5 {strides = array<i32>} : memref<2x4xf32, #tpu.memory_space<vmem>>, vector<2x4xf32>,
    %7 = arith.mulf %5, %5 : vector<2x4xf32>
    %c0_7 = arith.constant 0 : index
    %c0_8 = arith.constant 0 : index
    %8 = vector.load %arg9[%c0_7, %c0_8] : memref<4x8xf32, #tpu.memory_space<vmem>>, vector<4x8xf32>
    %cst_9 = arith.constant dense<0.000000e+00> : vector<2x8xf32>
    %9 = tpu.matmul %7, %8, %cst_9 {dimension_numbers = #tpu.dot_dimension_numbers<[1], [0], [0], [1], [0, 0, 1, 1], [], []>} : vector<2x4xf32>, vector<4x8xf32>, vector<2x8xf32> -> vector<2x8xf32>
    %cst_10 = arith.constant 9.99999993E-9 : f32
    %10 = vector.broadcast %cst_10 : f32 to vector<2x8xf32>
    %11 = arith.addf %9, %10 : vector<2x8xf32>
    %12 = math.rsqrt %11 : vector<2x8xf32>
    %c0_11 = arith.constant 0 : index
    %c0_12 = arith.constant 0 : index
    %13 = vector.load %arg12[%c0_11, %c0_12] : memref<2x8xf32, #tpu.memory_space<vmem>>, vector<2x8xf32>
    tpu.vector_store %arg12[%c0_11, %c0_12], %12 {strides = array<i32>} : memref<2x8xf32, #tpu.memory_space<vmem>>, vector<2x8xf32>,
    %c0_13 = arith.constant 0 : index
    %c0_14 = arith.constant 0 : index
    %14 = vector.load %arg1[%c0_13, %c0_14] : memref<2x32xf32, #tpu.memory_space<vmem>>, vector<2x32xf32>
    %c0_15 = arith.constant 0 : index
    %c0_16 = arith.constant 0 : index
    %15 = vector.load %arg5[%c0_15, %c0_16] : memref<32x8xf32, #tpu.memory_space<vmem>>, vector<32x8xf32>
    %cst_17 = arith.constant dense<0.000000e+00> : vector<2x8xf32>
    %16 = tpu.matmul %14, %15, %cst_17 {dimension_numbers = #tpu.dot_dimension_numbers<[1], [0], [0], [1], [0, 0, 1, 1], [], []>} : vector<2x32xf32>, vector<32x8xf32>, vector<2x8xf32> -> vector<2x8xf32>
    %c0_18 = arith.constant 0 : index
    %c0_19 = arith.constant 0 : index
    %17 = vector.load %arg6[%c0_18, %c0_19] : memref<1x8xf32, #tpu.memory_space<vmem>>, vector<1x8xf32>
    %18 = vector.broadcast %17 : vector<1x8xf32> to vector<2x8xf32>
    %19 = arith.addf %16, %18 : vector<2x8xf32>
    %c0_20 = arith.constant 0 : index
    %c0_21 = arith.constant 0 : index
    %20 = vector.load %arg13[%c0_20, %c0_21] : memref<2x8xf32, #tpu.memory_space<vmem>>, vector<2x8xf32>
    tpu.vector_store %arg13[%c0_20, %c0_21], %19 {strides = array<i32>} : memref<2x8xf32, #tpu.memory_space<vmem>>, vector<2x8xf32>,
    %21 = arith.mulf %19, %19 : vector<2x8xf32>
    %c0_22 = arith.constant 0 : index
    %c0_23 = arith.constant 0 : index
    %22 = vector.load %arg10[%c0_22, %c0_23] : memref<8x8xf32, #tpu.memory_space<vmem>>, vector<8x8xf32>
    %cst_24 = arith.constant dense<0.000000e+00> : vector<2x8xf32>
    %23 = tpu.matmul %21, %22, %cst_24 {dimension_numbers = #tpu.dot_dimension_numbers<[1], [0], [0], [1], [0, 0, 1, 1], [], []>} : vector<2x8xf32>, vector<8x8xf32>, vector<2x8xf32> -> vector<2x8xf32>
    %cst_25 = arith.constant 9.99999993E-9 : f32
    %24 = vector.broadcast %cst_25 : f32 to vector<2x8xf32>
    %25 = arith.addf %23, %24 : vector<2x8xf32>
    %26 = math.rsqrt %25 : vector<2x8xf32>
    %c0_26 = arith.constant 0 : index
    %c0_27 = arith.constant 0 : index
    %27 = vector.load %arg14[%c0_26, %c0_27] : memref<2x8xf32, #tpu.memory_space<vmem>>, vector<2x8xf32>
    tpu.vector_store %arg14[%c0_26, %c0_27], %26 {strides = array<i32>} : memref<2x8xf32, #tpu.memory_space<vmem>>, vector<2x8xf32>,
    %c0_28 = arith.constant 0 : index
    %c0_29 = arith.constant 0 : index
    %28 = vector.load %arg2[%c0_28, %c0_29] : memref<2x32xf32, #tpu.memory_space<vmem>>, vector<2x32xf32>
    %c0_30 = arith.constant 0 : index
    %c0_31 = arith.constant 0 : index
    %29 = vector.load %arg7[%c0_30, %c0_31] : memref<32x8xf32, #tpu.memory_space<vmem>>, vector<32x8xf32>
    %cst_32 = arith.constant dense<0.000000e+00> : vector<2x8xf32>
    %30 = tpu.matmul %28, %29, %cst_32 {dimension_numbers = #tpu.dot_dimension_numbers<[1], [0], [0], [1], [0, 0, 1, 1], [], []>} : vector<2x32xf32>, vector<32x8xf32>, vector<2x8xf32> -> vector<2x8xf32>
    %c0_33 = arith.constant 0 : index
    %c0_34 = arith.constant 0 : index
    %31 = vector.load %arg8[%c0_33, %c0_34] : memref<1x8xf32, #tpu.memory_space<vmem>>, vector<1x8xf32>
    %32 = vector.broadcast %31 : vector<1x8xf32> to vector<2x8xf32>
    %33 = arith.addf %30, %32 : vector<2x8xf32>
    %cst_35 = arith.constant 0.353553385 : f32
    %34 = vector.broadcast %cst_35 : f32 to vector<2x8xf32>
    %35 = arith.mulf %33, %34 : vector<2x8xf32>
    %c0_36 = arith.constant 0 : index
    %c0_37 = arith.constant 0 : index
    %36 = vector.load %arg15[%c0_36, %c0_37] : memref<2x8xf32, #tpu.memory_space<vmem>>, vector<2x8xf32>
    tpu.vector_store %arg15[%c0_36, %c0_37], %35 {strides = array<i32>} : memref<2x8xf32, #tpu.memory_space<vmem>>, vector<2x8xf32>,
    return
  }
}

module attributes {stable_mosaic.version = 11 : i64} {
  func.func @_modconv3_kernel(%arg0: i32, %arg1: memref<1x4x256xf32, #tpu.memory_space<vmem>>, %arg2: memref<1x1x4xf32, #tpu.memory_space<vmem>>, %arg3: memref<1x8x1xf32, #tpu.memory_space<vmem>>, %arg4: memref<9x8x4xf32, #tpu.memory_space<vmem>>, %arg5: memref<9x256xf32, #tpu.memory_space<vmem>>, %arg6: memref<1x8x256xf32, #tpu.memory_space<vmem>>, %arg7: memref<4x290xf32, #tpu.memory_space<vmem>>) attributes {dimension_semantics = [#tpu.dimension_semantics<parallel>], iteration_bounds = array<i64: 2>, scalar_prefetch = 0 : i64, scratch_operands = 1 : i64, tpu.core_type = #tpu.core_type<tc>, window_params = [{transform_indices = @transform_0, window_bounds = array<i64: 1, 4, 256>}, {transform_indices = @transform_1, window_bounds = array<i64: 1, 1, 4>}, {transform_indices = @transform_2, window_bounds = array<i64: 1, 8, 1>}, {pipeline_mode = #tpu.pipeline_mode<synchronous>, transform_indices = @transform_3, window_bounds = array<i64: 9, 8, 4>}, {pipeline_mode = #tpu.pipeline_mode<synchronous>, transform_indices = @transform_4, window_bounds = array<i64: 9, 256>}, {transform_indices = @transform_5, window_bounds = array<i64: 1, 8, 256>}]} {
    %c0 = arith.constant 0 : index
    %c0_0 = arith.constant 0 : index
    %c0_1 = arith.constant 0 : index
    %0 = vector.load %arg1[%c0, %c0_0, %c0_1] : memref<1x4x256xf32, #tpu.memory_space<vmem>>, vector<1x4x256xf32>
    %1 = vector.shape_cast %0 : vector<1x4x256xf32> to vector<4x256xf32>
    %c0_2 = arith.constant 0 : index
    %c0_3 = arith.constant 0 : index
    %c0_4 = arith.constant 0 : index
    %2 = vector.load %arg2[%c0_2, %c0_3, %c0_4] : memref<1x1x4xf32, #tpu.memory_space<vmem>>, vector<1x1x4xf32>
    %3 = vector.shape_cast %2 : vector<1x1x4xf32> to vector<1x4xf32>
    %c0_5 = arith.constant 0 : index
    %c0_6 = arith.constant 0 : index
    %c0_7 = arith.constant 0 : index
    %4 = vector.load %arg3[%c0_5, %c0_6, %c0_7] : memref<1x8x1xf32, #tpu.memory_space<vmem>>, vector<1x8x1xf32>
    %5 = vector.shape_cast %4 : vector<1x8x1xf32> to vector<8x1xf32>
    %cst = arith.constant 0.000000e+00 : f32
    %6 = vector.broadcast %cst : f32 to vector<4x17xf32>
    %c0_8 = arith.constant 0 : index
    %c0_9 = arith.constant 0 : index
    %7 = vector.load %arg7[%c0_8, %c0_9] : memref<4x290xf32, #tpu.memory_space<vmem>>, vector<4x17xf32>
    tpu.vector_store %arg7[%c0_8, %c0_9], %6 {strides = array<i32>} : memref<4x290xf32, #tpu.memory_space<vmem>>, vector<4x17xf32>,
    %c0_10 = arith.constant 0 : index
    %c273 = arith.constant 273 : index
    %8 = vector.load %arg7[%c0_10, %c273] : memref<4x290xf32, #tpu.memory_space<vmem>>, vector<4x17xf32>
    tpu.vector_store %arg7[%c0_10, %c273], %6 {strides = array<i32>} : memref<4x290xf32, #tpu.memory_space<vmem>>, vector<4x17xf32>,
    %c0_11 = arith.constant 0 : index
    %c17 = arith.constant 17 : index
    %9 = vector.load %arg7[%c0_11, %c17] : memref<4x290xf32, #tpu.memory_space<vmem>>, vector<4x256xf32>
    tpu.vector_store %arg7[%c0_11, %c17], %1 {strides = array<i32>} : memref<4x290xf32, #tpu.memory_space<vmem>>, vector<4x256xf32>,
    %c0_12 = arith.constant 0 : index
    %c0_13 = arith.constant 0 : index
    %10 = vector.load %arg7[%c0_12, %c0_13] : memref<4x290xf32, #tpu.memory_space<vmem>>, vector<4x256xf32>
    %c0_14 = arith.constant 0 : index
    %c0_15 = arith.constant 0 : index
    %11 = vector.load %arg5[%c0_14, %c0_15] : memref<9x256xf32, #tpu.memory_space<vmem>>, vector<1x256xf32>
    %12 = vector.broadcast %11 : vector<1x256xf32> to vector<4x256xf32>
    %13 = arith.mulf %10, %12 : vector<4x256xf32>
    %c0_16 = arith.constant 0 : index
    %c0_17 = arith.constant 0 : index
    %c0_18 = arith.constant 0 : index
    %14 = vector.load %arg4[%c0_16, %c0_17, %c0_18] : memref<9x8x4xf32, #tpu.memory_space<vmem>>, vector<1x8x4xf32>
    %15 = vector.shape_cast %14 : vector<1x8x4xf32> to vector<8x4xf32>
    %16 = vector.broadcast %3 : vector<1x4xf32> to vector<8x4xf32>
    %17 = arith.mulf %15, %16 : vector<8x4xf32>
    %18 = vector.broadcast %5 : vector<8x1xf32> to vector<8x4xf32>
    %19 = arith.mulf %17, %18 : vector<8x4xf32>
    %cst_19 = arith.constant dense<0.000000e+00> : vector<8x256xf32>
    %20 = tpu.matmul %19, %13, %cst_19 {dimension_numbers = #tpu.dot_dimension_numbers<[1], [0], [0], [1], [0, 0, 1, 1], [], []>} : vector<8x4xf32>, vector<4x256xf32>, vector<8x256xf32> -> vector<8x256xf32>
    %c0_20 = arith.constant 0 : index
    %c1 = arith.constant 1 : index
    %21 = vector.load %arg7[%c0_20, %c1] : memref<4x290xf32, #tpu.memory_space<vmem>>, vector<4x256xf32>
    %c1_21 = arith.constant 1 : index
    %c0_22 = arith.constant 0 : index
    %22 = vector.load %arg5[%c1_21, %c0_22] : memref<9x256xf32, #tpu.memory_space<vmem>>, vector<1x256xf32>
    %23 = vector.broadcast %22 : vector<1x256xf32> to vector<4x256xf32>
    %24 = arith.mulf %21, %23 : vector<4x256xf32>
    %c1_23 = arith.constant 1 : index
    %c0_24 = arith.constant 0 : index
    %c0_25 = arith.constant 0 : index
    %25 = vector.load %arg4[%c1_23, %c0_24, %c0_25] : memref<9x8x4xf32, #tpu.memory_space<vmem>>, vector<1x8x4xf32>
    %26 = vector.shape_cast %25 : vector<1x8x4xf32> to vector<8x4xf32>
    %27 = vector.broadcast %3 : vector<1x4xf32> to vector<8x4xf32>
    %28 = arith.mulf %26, %27 : vector<8x4xf32>
    %29 = vector.broadcast %5 : vector<8x1xf32> to vector<8x4xf32>
    %30 = arith.mulf %28, %29 : vector<8x4xf32>
    %cst_26 = arith.constant dense<0.000000e+00> : vector<8x256xf32>
    %31 = tpu.matmul %30, %24, %cst_26 {dimension_numbers = #tpu.dot_dimension_numbers<[1], [0], [0], [1], [0, 0, 1, 1], [], []>} : vector<8x4xf32>, vector<4x256xf32>, vector<8x256xf32> -> vector<8x256xf32>
    %32 = arith.addf %20, %31 : vector<8x256xf32>
    %c0_27 = arith.constant 0 : index
    %c2 = arith.constant 2 : index
    %33 = vector.load %arg7[%c0_27, %c2] : memref<4x290xf32, #tpu.memory_space<vmem>>, vector<4x256xf32>
    %c2_28 = arith.constant 2 : index
    %c0_29 = arith.constant 0 : index
    %34 = vector.load %arg5[%c2_28, %c0_29] : memref<9x256xf32, #tpu.memory_space<vmem>>, vector<1x256xf32>
    %35 = vector.broadcast %34 : vector<1x256xf32> to vector<4x256xf32>
    %36 = arith.mulf %33, %35 : vector<4x256xf32>
    %c2_30 = arith.constant 2 : index
    %c0_31 = arith.constant 0 : index
    %c0_32 = arith.constant 0 : index
    %37 = vector.load %arg4[%c2_30, %c0_31, %c0_32] : memref<9x8x4xf32, #tpu.memory_space<vmem>>, vector<1x8x4xf32>
    %38 = vector.shape_cast %37 : vector<1x8x4xf32> to vector<8x4xf32>
    %39 = vector.broadcast %3 : vector<1x4xf32> to vector<8x4xf32>
    %40 = arith.mulf %38, %39 : vector<8x4xf32>
    %41 = vector.broadcast %5 : vector<8x1xf32> to vector<8x4xf32>
    %42 = arith.mulf %40, %41 : vector<8x4xf32>
    %cst_33 = arith.constant dense<0.000000e+00> : vector<8x256xf32>
    %43 = tpu.matmul %42, %36, %cst_33 {dimension_numbers = #tpu.dot_dimension_numbers<[1], [0], [0], [1], [0, 0, 1, 1], [], []>} : vector<8x4xf32>, vector<4x256xf32>, vector<8x256xf32> -> vector<8x256xf32>
    %44 = arith.addf %32, %43 : vector<8x256xf32>
    %c0_34 = arith.constant 0 : index
    %c16 = arith.constant 16 : index
    %45 = vector.load %arg7[%c0_34, %c16] : memref<4x290xf32, #tpu.memory_space<vmem>>, vector<4x256xf32>
    %c3 = arith.constant 3 : index
    %c0_35 = arith.constant 0 : index
    %46 = vector.load %arg5[%c3, %c0_35] : memref<9x256xf32, #tpu.memory_space<vmem>>, vector<1x256xf32>
    %47 = vector.broadcast %46 : vector<1x256xf32> to vector<4x256xf32>
    %48 = arith.mulf %45, %47 : vector<4x256xf32>
    %c3_36 = arith.constant 3 : index
    %c0_37 = arith.constant 0 : index
    %c0_38 = arith.constant 0 : index
    %49 = vector.load %arg4[%c3_36, %c0_37, %c0_38] : memref<9x8x4xf32, #tpu.memory_space<vmem>>, vector<1x8x4xf32>
    %50 = vector.shape_cast %49 : vector<1x8x4xf32> to vector<8x4xf32>
    %51 = vector.broadcast %3 : vector<1x4xf32> to vector<8x4xf32>
    %52 = arith.mulf %50, %51 : vector<8x4xf32>
    %53 = vector.broadcast %5 : vector<8x1xf32> to vector<8x4xf32>
    %54 = arith.mulf %52, %53 : vector<8x4xf32>
    %cst_39 = arith.constant dense<0.000000e+00> : vector<8x256xf32>
    %55 = tpu.matmul %54, %48, %cst_39 {dimension_numbers = #tpu.dot_dimension_numbers<[1], [0], [0], [1], [0, 0, 1, 1], [], []>} : vector<8x4xf32>, vector<4x256xf32>, vector<8x256xf32> -> vector<8x256xf32>
    %56 = arith.addf %44, %55 : vector<8x256xf32>
    %c0_40 = arith.constant 0 : index
    %c17_41 = arith.constant 17 : index
    %57 = vector.load %arg7[%c0_40, %c17_41] : memref<4x290xf32, #tpu.memory_space<vmem>>, vector<4x256xf32>
    %c4 = arith.constant 4 : index
    %c0_42 = arith.constant 0 : index
    %58 = vector.load %arg5[%c4, %c0_42] : memref<9x256xf32, #tpu.memory_space<vmem>>, vector<1x256xf32>
    %59 = vector.broadcast %58 : vector<1x256xf32> to vector<4x256xf32>
    %60 = arith.mulf %57, %59 : vector<4x256xf32>
    %c4_43 = arith.constant 4 : index
    %c0_44 = arith.constant 0 : index
    %c0_45 = arith.constant 0 : index
    %61 = vector.load %arg4[%c4_43, %c0_44, %c0_45] : memref<9x8x4xf32, #tpu.memory_space<vmem>>, vector<1x8x4xf32>
    %62 = vector.shape_cast %61 : vector<1x8x4xf32> to vector<8x4xf32>
    %63 = vector.broadcast %3 : vector<1x4xf32> to vector<8x4xf32>
    %64 = arith.mulf %62, %63 : vector<8x4xf32>
    %65 = vector.broadcast %5 : vector<8x1xf32> to vector<8x4xf32>
    %66 = arith.mulf %64, %65 : vector<8x4xf32>
    %cst_46 = arith.constant dense<0.000000e+00> : vector<8x256xf32>
    %67 = tpu.matmul %66, %60, %cst_46 {dimension_numbers = #tpu.dot_dimension_numbers<[1], [0], [0], [1], [0, 0, 1, 1], [], []>} : vector<8x4xf32>, vector<4x256xf32>, vector<8x256xf32> -> vector<8x256xf32>
    %68 = arith.addf %56, %67 : vector<8x256xf32>
    %c0_47 = arith.constant 0 : index
    %c18 = arith.constant 18 : index
    %69 = vector.load %arg7[%c0_47, %c18] : memref<4x290xf32, #tpu.memory_space<vmem>>, vector<4x256xf32>
    %c5 = arith.constant 5 : index
    %c0_48 = arith.constant 0 : index
    %70 = vector.load %arg5[%c5, %c0_48] : memref<9x256xf32, #tpu.memory_space<vmem>>, vector<1x256xf32>
    %71 = vector.broadcast %70 : vector<1x256xf32> to vector<4x256xf32>
    %72 = arith.mulf %69, %71 : vector<4x256xf32>
    %c5_49 = arith.constant 5 : index
    %c0_50 = arith.constant 0 : index
    %c0_51 = arith.constant 0 : index
    %73 = vector.load %arg4[%c5_49, %c0_50, %c0_51] : memref<9x8x4xf32, #tpu.memory_space<vmem>>, vector<1x8x4xf32>
    %74 = vector.shape_cast %73 : vector<1x8x4xf32> to vector<8x4xf32>
    %75 = vector.broadcast %3 : vector<1x4xf32> to vector<8x4xf32>
    %76 = arith.mulf %74, %75 : vector<8x4xf32>
    %77 = vector.broadcast %5 : vector<8x1xf32> to vector<8x4xf32>
    %78 = arith.mulf %76, %77 : vector<8x4xf32>
    %cst_52 = arith.constant dense<0.000000e+00> : vector<8x256xf32>
    %79 = tpu.matmul %78, %72, %cst_52 {dimension_numbers = #tpu.dot_dimension_numbers<[1], [0], [0], [1], [0, 0, 1, 1], [], []>} : vector<8x4xf32>, vector<4x256xf32>, vector<8x256xf32> -> vector<8x256xf32>
    %80 = arith.addf %68, %79 : vector<8x256xf32>
    %c0_53 = arith.constant 0 : index
    %c32 = arith.constant 32 : index
    %81 = vector.load %arg7[%c0_53, %c32] : memref<4x290xf32, #tpu.memory_space<vmem>>, vector<4x256xf32>
    %c6 = arith.constant 6 : index
    %c0_54 = arith.constant 0 : index
    %82 = vector.load %arg5[%c6, %c0_54] : memref<9x256xf32, #tpu.memory_space<vmem>>, vector<1x256xf32>
    %83 = vector.broadcast %82 : vector<1x256xf32> to vector<4x256xf32>
    %84 = arith.mulf %81, %83 : vector<4x256xf32>
    %c6_55 = arith.constant 6 : index
    %c0_56 = arith.constant 0 : index
    %c0_57 = arith.constant 0 : index
    %85 = vector.load %arg4[%c6_55, %c0_56, %c0_57] : memref<9x8x4xf32, #tpu.memory_space<vmem>>, vector<1x8x4xf32>
    %86 = vector.shape_cast %85 : vector<1x8x4xf32> to vector<8x4xf32>
    %87 = vector.broadcast %3 : vector<1x4xf32> to vector<8x4xf32>
    %88 = arith.mulf %86, %87 : vector<8x4xf32>
    %89 = vector.broadcast %5 : vector<8x1xf32> to vector<8x4xf32>
    %90 = arith.mulf %88, %89 : vector<8x4xf32>
    %cst_58 = arith.constant dense<0.000000e+00> : vector<8x256xf32>
    %91 = tpu.matmul %90, %84, %cst_58 {dimension_numbers = #tpu.dot_dimension_numbers<[1], [0], [0], [1], [0, 0, 1, 1], [], []>} : vector<8x4xf32>, vector<4x256xf32>, vector<8x256xf32> -> vector<8x256xf32>
    %92 = arith.addf %80, %91 : vector<8x256xf32>
    %c0_59 = arith.constant 0 : index
    %c33 = arith.constant 33 : index
    %93 = vector.load %arg7[%c0_59, %c33] : memref<4x290xf32, #tpu.memory_space<vmem>>, vector<4x256xf32>
    %c7 = arith.constant 7 : index
    %c0_60 = arith.constant 0 : index
    %94 = vector.load %arg5[%c7, %c0_60] : memref<9x256xf32, #tpu.memory_space<vmem>>, vector<1x256xf32>
    %95 = vector.broadcast %94 : vector<1x256xf32> to vector<4x256xf32>
    %96 = arith.mulf %93, %95 : vector<4x256xf32>
    %c7_61 = arith.constant 7 : index
    %c0_62 = arith.constant 0 : index
    %c0_63 = arith.constant 0 : index
    %97 = vector.load %arg4[%c7_61, %c0_62, %c0_63] : memref<9x8x4xf32, #tpu.memory_space<vmem>>, vector<1x8x4xf32>
    %98 = vector.shape_cast %97 : vector<1x8x4xf32> to vector<8x4xf32>
    %99 = vector.broadcast %3 : vector<1x4xf32> to vector<8x4xf32>
    %100 = arith.mulf %98, %99 : vector<8x4xf32>
    %101 = vector.broadcast %5 : vector<8x1xf32> to vector<8x4xf32>
    %102 = arith.mulf %100, %101 : vector<8x4xf32>
    %cst_64 = arith.constant dense<0.000000e+00> : vector<8x256xf32>
    %103 = tpu.matmul %102, %96, %cst_64 {dimension_numbers = #tpu.dot_dimension_numbers<[1], [0], [0], [1], [0, 0, 1, 1], [], []>} : vector<8x4xf32>, vector<4x256xf32>, vector<8x256xf32> -> vector<8x256xf32>
    %104 = arith.addf %92, %103 : vector<8x256xf32>
    %c0_65 = arith.constant 0 : index
    %c34 = arith.constant 34 : index
    %105 = vector.load %arg7[%c0_65, %c34] : memref<4x290xf32, #tpu.memory_space<vmem>>, vector<4x256xf32>
    %c8 = arith.constant 8 : index
    %c0_66 = arith.constant 0 : index
    %106 = vector.load %arg5[%c8, %c0_66] : memref<9x256xf32, #tpu.memory_space<vmem>>, vector<1x256xf32>
    %107 = vector.broadcast %106 : vector<1x256xf32> to vector<4x256xf32>
    %108 = arith.mulf %105, %107 : vector<4x256xf32>
    %c8_67 = arith.constant 8 : index
    %c0_68 = arith.constant 0 : index
    %c0_69 = arith.constant 0 : index
    %109 = vector.load %arg4[%c8_67, %c0_68, %c0_69] : memref<9x8x4xf32, #tpu.memory_space<vmem>>, vector<1x8x4xf32>
    %110 = vector.shape_cast %109 : vector<1x8x4xf32> to vector<8x4xf32>
    %111 = vector.broadcast %3 : vector<1x4xf32> to vector<8x4xf32>
    %112 = arith.mulf %110, %111 : vector<8x4xf32>
    %113 = vector.broadcast %5 : vector<8x1xf32> to vector<8x4xf32>
    %114 = arith.mulf %112, %113 : vector<8x4xf32>
    %cst_70 = arith.constant dense<0.000000e+00> : vector<8x256xf32>
    %115 = tpu.matmul %114, %108, %cst_70 {dimension_numbers = #tpu.dot_dimension_numbers<[1], [0], [0], [1], [0, 0, 1, 1], [], []>} : vector<8x4xf32>, vector<4x256xf32>, vector<8x256xf32> -> vector<8x256xf32>
    %116 = arith.addf %104, %115 : vector<8x256xf32>
    %c0_71 = arith.constant 0 : index
    %c0_72 = arith.constant 0 : index
    %c0_73 = arith.constant 0 : index
    %117 = vector.load %arg6[%c0_71, %c0_72, %c0_73] : memref<1x8x256xf32, #tpu.memory_space<vmem>>, vector<1x8x256xf32>
    %118 = vector.shape_cast %117 : vector<1x8x256xf32> to vector<8x256xf32>
    %119 = vector.shape_cast %116 : vector<8x256xf32> to vector<1x8x256xf32>
    tpu.vector_store %arg6[%c0_71, %c0_72, %c0_73], %119 {strides = array<i32>} : memref<1x8x256xf32, #tpu.memory_space<vmem>>, vector<1x8x256xf32>,
    return
  }
  func.func @transform_0(%arg0: i32) -> (i32, i32, i32) {
    %c0_i32 = arith.constant 0 : i32
    %c0_i32_0 = arith.constant 0 : i32
    %c0_i32_1 = arith.constant 0 : i32
    return %arg0, %c0_i32, %c0_i32_0 : i32, i32, i32
  }
  func.func @transform_1(%arg0: i32) -> (i32, i32, i32) {
    %c0_i32 = arith.constant 0 : i32
    %c0_i32_0 = arith.constant 0 : i32
    %c0_i32_1 = arith.constant 0 : i32
    return %arg0, %c0_i32, %c0_i32_0 : i32, i32, i32
  }
  func.func @transform_2(%arg0: i32) -> (i32, i32, i32) {
    %c0_i32 = arith.constant 0 : i32
    %c0_i32_0 = arith.constant 0 : i32
    %c0_i32_1 = arith.constant 0 : i32
    return %arg0, %c0_i32, %c0_i32_0 : i32, i32, i32
  }
  func.func @transform_3(%arg0: i32) -> (i32, i32, i32) {
    %c0_i32 = arith.constant 0 : i32
    %c0_i32_0 = arith.constant 0 : i32
    %c0_i32_1 = arith.constant 0 : i32
    %c0_i32_2 = arith.constant 0 : i32
    return %c0_i32, %c0_i32_0, %c0_i32_1 : i32, i32, i32
  }
  func.func @transform_4(%arg0: i32) -> (i32, i32) {
    %c0_i32 = arith.constant 0 : i32
    %c0_i32_0 = arith.constant 0 : i32
    %c0_i32_1 = arith.constant 0 : i32
    return %c0_i32, %c0_i32_0 : i32, i32
  }
  func.func @transform_5(%arg0: i32) -> (i32, i32, i32) {
    %c0_i32 = arith.constant 0 : i32
    %c0_i32_0 = arith.constant 0 : i32
    %c0_i32_1 = arith.constant 0 : i32
    return %arg0, %c0_i32, %c0_i32_0 : i32, i32, i32
  }
}

module attributes {stable_mosaic.version = 11 : i64} {
  func.func @_upblur_pair_kernel(%arg0: i32, %arg1: memref<1x8x16x16xf32, #tpu.memory_space<vmem>>, %arg2: memref<1x3x16x16xf32, #tpu.memory_space<vmem>>, %arg3: memref<16x32xf32, #tpu.memory_space<vmem>>, %arg4: memref<32x16xf32, #tpu.memory_space<vmem>>, %arg5: memref<1x32x32xf32, #tpu.memory_space<vmem>>, %arg6: memref<8x1x1xf32, #tpu.memory_space<vmem>>, %arg7: memref<1x8x32x32xf32, #tpu.memory_space<vmem>>, %arg8: memref<1x3x32x32xf32, #tpu.memory_space<vmem>>) attributes {dimension_semantics = [#tpu.dimension_semantics<parallel>], iteration_bounds = array<i64: 2>, scalar_prefetch = 0 : i64, scratch_operands = 0 : i64, tpu.core_type = #tpu.core_type<tc>, window_params = [{transform_indices = @transform_0, window_bounds = array<i64: 1, 8, 16, 16>}, {transform_indices = @transform_1, window_bounds = array<i64: 1, 3, 16, 16>}, {pipeline_mode = #tpu.pipeline_mode<synchronous>, transform_indices = @transform_2, window_bounds = array<i64: 16, 32>}, {pipeline_mode = #tpu.pipeline_mode<synchronous>, transform_indices = @transform_3, window_bounds = array<i64: 32, 16>}, {pipeline_mode = #tpu.pipeline_mode<synchronous>, transform_indices = @transform_4, window_bounds = array<i64: 1, 32, 32>}, {pipeline_mode = #tpu.pipeline_mode<synchronous>, transform_indices = @transform_5, window_bounds = array<i64: 8, 1, 1>}, {transform_indices = @transform_6, window_bounds = array<i64: 1, 8, 32, 32>}, {transform_indices = @transform_7, window_bounds = array<i64: 1, 3, 32, 32>}]} {
    %c0 = arith.constant 0 : index
    %c0_0 = arith.constant 0 : index
    %c0_1 = arith.constant 0 : index
    %c0_2 = arith.constant 0 : index
    %0 = vector.load %arg1[%c0, %c0_0, %c0_1, %c0_2] : memref<1x8x16x16xf32, #tpu.memory_space<vmem>>, vector<1x8x16x16xf32>
    %1 = vector.shape_cast %0 : vector<1x8x16x16xf32> to vector<8x16x16xf32>
    %c0_3 = arith.constant 0 : index
    %c0_4 = arith.constant 0 : index
    %2 = vector.load %arg3[%c0_3, %c0_4] : memref<16x32xf32, #tpu.memory_space<vmem>>, vector<16x32xf32>
    %3 = vector.shape_cast %2 : vector<16x32xf32> to vector<1x16x32xf32>
    %4 = vector.broadcast %3 : vector<1x16x32xf32> to vector<8x16x32xf32>
    "tpu.trace_start"() <{level = 10 : i32, message = "chw,cwx->chx"}> : () -> ()
    %cst = arith.constant dense<0.000000e+00> : vector<8x16x32xf32>
    %5 = tpu.matmul %1, %4, %cst {dimension_numbers = #tpu.dot_dimension_numbers<[2], [1], [1], [2], [0, 0, 0, 1, 1, 2], [0], [0]>} : vector<8x16x16xf32>, vector<8x16x32xf32>, vector<8x16x32xf32> -> vector<8x16x32xf32>
    "tpu.trace_stop"() : () -> ()
    %c0_5 = arith.constant 0 : index
    %c0_6 = arith.constant 0 : index
    %6 = vector.load %arg4[%c0_5, %c0_6] : memref<32x16xf32, #tpu.memory_space<vmem>>, vector<32x16xf32>
    %7 = vector.shape_cast %6 : vector<32x16xf32> to vector<1x32x16xf32>
    %8 = vector.broadcast %7 : vector<1x32x16xf32> to vector<8x32x16xf32>
    "tpu.trace_start"() <{level = 10 : i32, message = "crh,chx->crx"}> : () -> ()
    %cst_7 = arith.constant dense<0.000000e+00> : vector<8x32x32xf32>
    %9 = tpu.matmul %8, %5, %cst_7 {dimension_numbers = #tpu.dot_dimension_numbers<[2], [1], [1], [2], [0, 0, 0, 1, 1, 2], [0], [0]>} : vector<8x32x16xf32>, vector<8x16x32xf32>, vector<8x32x32xf32> -> vector<8x32x32xf32>
    "tpu.trace_stop"() : () -> ()
    %c0_8 = arith.constant 0 : index
    %c0_9 = arith.constant 0 : index
    %c0_10 = arith.constant 0 : index
    %10 = vector.load %arg5[%c0_8, %c0_9, %c0_10] : memref<1x32x32xf32, #tpu.memory_space<vmem>>, vector<1x32x32xf32>
    %11 = vector.broadcast %10 : vector<1x32x32xf32> to vector<8x32x32xf32>
    %12 = arith.addf %9, %11 : vector<8x32x32xf32>
    %c0_11 = arith.constant 0 : index
    %c0_12 = arith.constant 0 : index
    %c0_13 = arith.constant 0 : index
    %13 = vector.load %arg6[%c0_11, %c0_12, %c0_13] : memref<8x1x1xf32, #tpu.memory_space<vmem>>, vector<8x1x1xf32>
    %14 = vector.broadcast %13 : vector<8x1x1xf32> to vector<8x32x32xf32>
    %15 = arith.addf %12, %14 : vector<8x32x32xf32>
    %cst_14 = arith.constant 0.000000e+00 : f32
    %16 = vector.broadcast %cst_14 : f32 to vector<8x32x32xf32>
    %17 = arith.cmpf oge, %15, %16 : vector<8x32x32xf32>
    %cst_15 = arith.constant 2.000000e-01 : f32
    %18 = vector.broadcast %cst_15 : f32 to vector<8x32x32xf32>
    %19 = arith.mulf %18, %15 : vector<8x32x32xf32>
    %20 = arith.select %17, %15, %19 : vector<8x32x32xi1>, vector<8x32x32xf32>
    %cst_16 = arith.constant 1.41421354 : f32
    %21 = vector.broadcast %cst_16 : f32 to vector<8x32x32xf32>
    %22 = arith.mulf %20, %21 : vector<8x32x32xf32>
    %cst_17 = arith.constant -2.560000e+02 : f32
    %cst_18 = arith.constant 2.560000e+02 : f32
    %23 = vector.broadcast %cst_17 : f32 to vector<8x32x32xf32>
    %24 = arith.maximumf %23, %22 : vector<8x32x32xf32>
    %25 = vector.broadcast %cst_18 : f32 to vector<8x32x32xf32>
    %26 = arith.minimumf %25, %24 : vector<8x32x32xf32>
    %c0_19 = arith.constant 0 : index
    %c0_20 = arith.constant 0 : index
    %c0_21 = arith.constant 0 : index
    %c0_22 = arith.constant 0 : index
    %27 = vector.load %arg7[%c0_19, %c0_20, %c0_21, %c0_22] : memref<1x8x32x32xf32, #tpu.memory_space<vmem>>, vector<1x8x32x32xf32>
    %28 = vector.shape_cast %27 : vector<1x8x32x32xf32> to vector<8x32x32xf32>
    %29 = vector.shape_cast %26 : vector<8x32x32xf32> to vector<1x8x32x32xf32>
    tpu.vector_store %arg7[%c0_19, %c0_20, %c0_21, %c0_22], %29 {strides = array<i32>} : memref<1x8x32x32xf32, #tpu.memory_space<vmem>>, vector<1x8x32x32xf32>,
    %c0_23 = arith.constant 0 : index
    %c0_24 = arith.constant 0 : index
    %c0_25 = arith.constant 0 : index
    %c0_26 = arith.constant 0 : index
    %30 = vector.load %arg2[%c0_23, %c0_24, %c0_25, %c0_26] : memref<1x3x16x16xf32, #tpu.memory_space<vmem>>, vector<1x3x16x16xf32>
    %31 = vector.shape_cast %30 : vector<1x3x16x16xf32> to vector<3x16x16xf32>
    %c0_27 = arith.constant 0 : index
    %c0_28 = arith.constant 0 : index
    %32 = vector.load %arg3[%c0_27, %c0_28] : memref<16x32xf32, #tpu.memory_space<vmem>>, vector<16x32xf32>
    %33 = vector.shape_cast %32 : vector<16x32xf32> to vector<1x16x32xf32>
    %34 = vector.broadcast %33 : vector<1x16x32xf32> to vector<3x16x32xf32>
    "tpu.trace_start"() <{level = 10 : i32, message = "chw,cwx->chx"}> : () -> ()
    %cst_29 = arith.constant dense<0.000000e+00> : vector<3x16x32xf32>
    %35 = tpu.matmul %31, %34, %cst_29 {dimension_numbers = #tpu.dot_dimension_numbers<[2], [1], [1], [2], [0, 0, 0, 1, 1, 2], [0], [0]>} : vector<3x16x16xf32>, vector<3x16x32xf32>, vector<3x16x32xf32> -> vector<3x16x32xf32>
    "tpu.trace_stop"() : () -> ()
    %c0_30 = arith.constant 0 : index
    %c0_31 = arith.constant 0 : index
    %36 = vector.load %arg4[%c0_30, %c0_31] : memref<32x16xf32, #tpu.memory_space<vmem>>, vector<32x16xf32>
    %37 = vector.shape_cast %36 : vector<32x16xf32> to vector<1x32x16xf32>
    %38 = vector.broadcast %37 : vector<1x32x16xf32> to vector<3x32x16xf32>
    "tpu.trace_start"() <{level = 10 : i32, message = "crh,chx->crx"}> : () -> ()
    %cst_32 = arith.constant dense<0.000000e+00> : vector<3x32x32xf32>
    %39 = tpu.matmul %38, %35, %cst_32 {dimension_numbers = #tpu.dot_dimension_numbers<[2], [1], [1], [2], [0, 0, 0, 1, 1, 2], [0], [0]>} : vector<3x32x16xf32>, vector<3x16x32xf32>, vector<3x32x32xf32> -> vector<3x32x32xf32>
    "tpu.trace_stop"() : () -> ()
    %c0_33 = arith.constant 0 : index
    %c0_34 = arith.constant 0 : index
    %c0_35 = arith.constant 0 : index
    %c0_36 = arith.constant 0 : index
    %40 = vector.load %arg8[%c0_33, %c0_34, %c0_35, %c0_36] : memref<1x3x32x32xf32, #tpu.memory_space<vmem>>, vector<1x3x32x32xf32>
    %41 = vector.shape_cast %40 : vector<1x3x32x32xf32> to vector<3x32x32xf32>
    %42 = vector.shape_cast %39 : vector<3x32x32xf32> to vector<1x3x32x32xf32>
    tpu.vector_store %arg8[%c0_33, %c0_34, %c0_35, %c0_36], %42 {strides = array<i32>} : memref<1x3x32x32xf32, #tpu.memory_space<vmem>>, vector<1x3x32x32xf32>,
    return
  }
  func.func @transform_0(%arg0: i32) -> (i32, i32, i32, i32) {
    %c0_i32 = arith.constant 0 : i32
    %c0_i32_0 = arith.constant 0 : i32
    %c0_i32_1 = arith.constant 0 : i32
    %c0_i32_2 = arith.constant 0 : i32
    return %arg0, %c0_i32, %c0_i32_0, %c0_i32_1 : i32, i32, i32, i32
  }
  func.func @transform_1(%arg0: i32) -> (i32, i32, i32, i32) {
    %c0_i32 = arith.constant 0 : i32
    %c0_i32_0 = arith.constant 0 : i32
    %c0_i32_1 = arith.constant 0 : i32
    %c0_i32_2 = arith.constant 0 : i32
    return %arg0, %c0_i32, %c0_i32_0, %c0_i32_1 : i32, i32, i32, i32
  }
  func.func @transform_2(%arg0: i32) -> (i32, i32) {
    %c0_i32 = arith.constant 0 : i32
    %c0_i32_0 = arith.constant 0 : i32
    %c0_i32_1 = arith.constant 0 : i32
    return %c0_i32, %c0_i32_0 : i32, i32
  }
  func.func @transform_3(%arg0: i32) -> (i32, i32) {
    %c0_i32 = arith.constant 0 : i32
    %c0_i32_0 = arith.constant 0 : i32
    %c0_i32_1 = arith.constant 0 : i32
    return %c0_i32, %c0_i32_0 : i32, i32
  }
  func.func @transform_4(%arg0: i32) -> (i32, i32, i32) {
    %c0_i32 = arith.constant 0 : i32
    %c0_i32_0 = arith.constant 0 : i32
    %c0_i32_1 = arith.constant 0 : i32
    %c0_i32_2 = arith.constant 0 : i32
    return %c0_i32, %c0_i32_0, %c0_i32_1 : i32, i32, i32
  }
  func.func @transform_5(%arg0: i32) -> (i32, i32, i32) {
    %c0_i32 = arith.constant 0 : i32
    %c0_i32_0 = arith.constant 0 : i32
    %c0_i32_1 = arith.constant 0 : i32
    %c0_i32_2 = arith.constant 0 : i32
    return %c0_i32, %c0_i32_0, %c0_i32_1 : i32, i32, i32
  }
  func.func @transform_6(%arg0: i32) -> (i32, i32, i32, i32) {
    %c0_i32 = arith.constant 0 : i32
    %c0_i32_0 = arith.constant 0 : i32
    %c0_i32_1 = arith.constant 0 : i32
    %c0_i32_2 = arith.constant 0 : i32
    return %arg0, %c0_i32, %c0_i32_0, %c0_i32_1 : i32, i32, i32, i32
  }
  func.func @transform_7(%arg0: i32) -> (i32, i32, i32, i32) {
    %c0_i32 = arith.constant 0 : i32
    %c0_i32_0 = arith.constant 0 : i32
    %c0_i32_1 = arith.constant 0 : i32
    %c0_i32_2 = arith.constant 0 : i32
    return %arg0, %c0_i32, %c0_i32_0, %c0_i32_1 : i32, i32, i32, i32
  }
}

module attributes {stable_mosaic.version = 11 : i64} {
  func.func @_conv1_torgb_kernel(%arg0: i32, %arg1: memref<1x8x1024xf32, #tpu.memory_space<vmem>>, %arg2: memref<1x1x8xf32, #tpu.memory_space<vmem>>, %arg3: memref<1x8x1xf32, #tpu.memory_space<vmem>>, %arg4: memref<9x8x8xf32, #tpu.memory_space<vmem>>, %arg5: memref<9x1024xf32, #tpu.memory_space<vmem>>, %arg6: memref<1x1024xf32, #tpu.memory_space<vmem>>, %arg7: memref<8x1xf32, #tpu.memory_space<vmem>>, %arg8: memref<1x1x8xf32, #tpu.memory_space<vmem>>, %arg9: memref<3x8xf32, #tpu.memory_space<vmem>>, %arg10: memref<3x1xf32, #tpu.memory_space<vmem>>, %arg11: memref<1x3x1024xf32, #tpu.memory_space<vmem>>, %arg12: memref<1x8x1024xf32, #tpu.memory_space<vmem>>, %arg13: memref<1x3x1024xf32, #tpu.memory_space<vmem>>, %arg14: memref<8x1090xf32, #tpu.memory_space<vmem>>) attributes {dimension_semantics = [#tpu.dimension_semantics<parallel>], iteration_bounds = array<i64: 2>, scalar_prefetch = 0 : i64, scratch_operands = 1 : i64, tpu.core_type = #tpu.core_type<tc>, window_params = [{transform_indices = @transform_0, window_bounds = array<i64: 1, 8, 1024>}, {transform_indices = @transform_1, window_bounds = array<i64: 1, 1, 8>}, {transform_indices = @transform_2, window_bounds = array<i64: 1, 8, 1>}, {pipeline_mode = #tpu.pipeline_mode<synchronous>, transform_indices = @transform_3, window_bounds = array<i64: 9, 8, 8>}, {pipeline_mode = #tpu.pipeline_mode<synchronous>, transform_indices = @transform_4, window_bounds = array<i64: 9, 1024>}, {pipeline_mode = #tpu.pipeline_mode<synchronous>, transform_indices = @transform_5, window_bounds = array<i64: 1, 1024>}, {pipeline_mode = #tpu.pipeline_mode<synchronous>, transform_indices = @transform_6, window_bounds = array<i64: 8, 1>}, {transform_indices = @transform_7, window_bounds = array<i64: 1, 1, 8>}, {pipeline_mode = #tpu.pipeline_mode<synchronous>, transform_indices = @transform_8, window_bounds = array<i64: 3, 8>}, {pipeline_mode = #tpu.pipeline_mode<synchronous>, transform_indices = @transform_9, window_bounds = array<i64: 3, 1>}, {transform_indices = @transform_10, window_bounds = array<i64: 1, 3, 1024>}, {transform_indices = @transform_11, window_bounds = array<i64: 1, 8, 1024>}, {transform_indices = @transform_12, window_bounds = array<i64: 1, 3, 1024>}]} {
    %c0 = arith.constant 0 : index
    %c0_0 = arith.constant 0 : index
    %c0_1 = arith.constant 0 : index
    %0 = vector.load %arg1[%c0, %c0_0, %c0_1] : memref<1x8x1024xf32, #tpu.memory_space<vmem>>, vector<1x8x1024xf32>
    %1 = vector.shape_cast %0 : vector<1x8x1024xf32> to vector<8x1024xf32>
    %c0_2 = arith.constant 0 : index
    %c0_3 = arith.constant 0 : index
    %c0_4 = arith.constant 0 : index
    %2 = vector.load %arg2[%c0_2, %c0_3, %c0_4] : memref<1x1x8xf32, #tpu.memory_space<vmem>>, vector<1x1x8xf32>
    %3 = vector.shape_cast %2 : vector<1x1x8xf32> to vector<1x8xf32>
    %c0_5 = arith.constant 0 : index
    %c0_6 = arith.constant 0 : index
    %c0_7 = arith.constant 0 : index
    %4 = vector.load %arg3[%c0_5, %c0_6, %c0_7] : memref<1x8x1xf32, #tpu.memory_space<vmem>>, vector<1x8x1xf32>
    %5 = vector.shape_cast %4 : vector<1x8x1xf32> to vector<8x1xf32>
    %cst = arith.constant 0.000000e+00 : f32
    %6 = vector.broadcast %cst : f32 to vector<8x33xf32>
    %c0_8 = arith.constant 0 : index
    %c0_9 = arith.constant 0 : index
    %7 = vector.load %arg14[%c0_8, %c0_9] : memref<8x1090xf32, #tpu.memory_space<vmem>>, vector<8x33xf32>
    tpu.vector_store %arg14[%c0_8, %c0_9], %6 {strides = array<i32>} : memref<8x1090xf32, #tpu.memory_space<vmem>>, vector<8x33xf32>,
    %c0_10 = arith.constant 0 : index
    %c1057 = arith.constant 1057 : index
    %8 = vector.load %arg14[%c0_10, %c1057] : memref<8x1090xf32, #tpu.memory_space<vmem>>, vector<8x33xf32>
    tpu.vector_store %arg14[%c0_10, %c1057], %6 {strides = array<i32>} : memref<8x1090xf32, #tpu.memory_space<vmem>>, vector<8x33xf32>,
    %c0_11 = arith.constant 0 : index
    %c33 = arith.constant 33 : index
    %9 = vector.load %arg14[%c0_11, %c33] : memref<8x1090xf32, #tpu.memory_space<vmem>>, vector<8x1024xf32>
    tpu.vector_store %arg14[%c0_11, %c33], %1 {strides = array<i32>} : memref<8x1090xf32, #tpu.memory_space<vmem>>, vector<8x1024xf32>,
    %c0_12 = arith.constant 0 : index
    %c0_13 = arith.constant 0 : index
    %10 = vector.load %arg14[%c0_12, %c0_13] : memref<8x1090xf32, #tpu.memory_space<vmem>>, vector<8x1024xf32>
    %c0_14 = arith.constant 0 : index
    %c0_15 = arith.constant 0 : index
    %11 = vector.load %arg5[%c0_14, %c0_15] : memref<9x1024xf32, #tpu.memory_space<vmem>>, vector<1x1024xf32>
    %12 = vector.broadcast %11 : vector<1x1024xf32> to vector<8x1024xf32>
    %13 = arith.mulf %10, %12 : vector<8x1024xf32>
    %c0_16 = arith.constant 0 : index
    %c0_17 = arith.constant 0 : index
    %c0_18 = arith.constant 0 : index
    %14 = vector.load %arg4[%c0_16, %c0_17, %c0_18] : memref<9x8x8xf32, #tpu.memory_space<vmem>>, vector<1x8x8xf32>
    %15 = vector.shape_cast %14 : vector<1x8x8xf32> to vector<8x8xf32>
    %16 = vector.broadcast %3 : vector<1x8xf32> to vector<8x8xf32>
    %17 = arith.mulf %15, %16 : vector<8x8xf32>
    %18 = vector.broadcast %5 : vector<8x1xf32> to vector<8x8xf32>
    %19 = arith.mulf %17, %18 : vector<8x8xf32>
    %cst_19 = arith.constant dense<0.000000e+00> : vector<8x1024xf32>
    %20 = tpu.matmul %19, %13, %cst_19 {dimension_numbers = #tpu.dot_dimension_numbers<[1], [0], [0], [1], [0, 0, 1, 1], [], []>} : vector<8x8xf32>, vector<8x1024xf32>, vector<8x1024xf32> -> vector<8x1024xf32>
    %c0_20 = arith.constant 0 : index
    %c1 = arith.constant 1 : index
    %21 = vector.load %arg14[%c0_20, %c1] : memref<8x1090xf32, #tpu.memory_space<vmem>>, vector<8x1024xf32>
    %c1_21 = arith.constant 1 : index
    %c0_22 = arith.constant 0 : index
    %22 = vector.load %arg5[%c1_21, %c0_22] : memref<9x1024xf32, #tpu.memory_space<vmem>>, vector<1x1024xf32>
    %23 = vector.broadcast %22 : vector<1x1024xf32> to vector<8x1024xf32>
    %24 = arith.mulf %21, %23 : vector<8x1024xf32>
    %c1_23 = arith.constant 1 : index
    %c0_24 = arith.constant 0 : index
    %c0_25 = arith.constant 0 : index
    %25 = vector.load %arg4[%c1_23, %c0_24, %c0_25] : memref<9x8x8xf32, #tpu.memory_space<vmem>>, vector<1x8x8xf32>
    %26 = vector.shape_cast %25 : vector<1x8x8xf32> to vector<8x8xf32>
    %27 = vector.broadcast %3 : vector<1x8xf32> to vector<8x8xf32>
    %28 = arith.mulf %26, %27 : vector<8x8xf32>
    %29 = vector.broadcast %5 : vector<8x1xf32> to vector<8x8xf32>
    %30 = arith.mulf %28, %29 : vector<8x8xf32>
    %cst_26 = arith.constant dense<0.000000e+00> : vector<8x1024xf32>
    %31 = tpu.matmul %30, %24, %cst_26 {dimension_numbers = #tpu.dot_dimension_numbers<[1], [0], [0], [1], [0, 0, 1, 1], [], []>} : vector<8x8xf32>, vector<8x1024xf32>, vector<8x1024xf32> -> vector<8x1024xf32>
    %32 = arith.addf %20, %31 : vector<8x1024xf32>
    %c0_27 = arith.constant 0 : index
    %c2 = arith.constant 2 : index
    %33 = vector.load %arg14[%c0_27, %c2] : memref<8x1090xf32, #tpu.memory_space<vmem>>, vector<8x1024xf32>
    %c2_28 = arith.constant 2 : index
    %c0_29 = arith.constant 0 : index
    %34 = vector.load %arg5[%c2_28, %c0_29] : memref<9x1024xf32, #tpu.memory_space<vmem>>, vector<1x1024xf32>
    %35 = vector.broadcast %34 : vector<1x1024xf32> to vector<8x1024xf32>
    %36 = arith.mulf %33, %35 : vector<8x1024xf32>
    %c2_30 = arith.constant 2 : index
    %c0_31 = arith.constant 0 : index
    %c0_32 = arith.constant 0 : index
    %37 = vector.load %arg4[%c2_30, %c0_31, %c0_32] : memref<9x8x8xf32, #tpu.memory_space<vmem>>, vector<1x8x8xf32>
    %38 = vector.shape_cast %37 : vector<1x8x8xf32> to vector<8x8xf32>
    %39 = vector.broadcast %3 : vector<1x8xf32> to vector<8x8xf32>
    %40 = arith.mulf %38, %39 : vector<8x8xf32>
    %41 = vector.broadcast %5 : vector<8x1xf32> to vector<8x8xf32>
    %42 = arith.mulf %40, %41 : vector<8x8xf32>
    %cst_33 = arith.constant dense<0.000000e+00> : vector<8x1024xf32>
    %43 = tpu.matmul %42, %36, %cst_33 {dimension_numbers = #tpu.dot_dimension_numbers<[1], [0], [0], [1], [0, 0, 1, 1], [], []>} : vector<8x8xf32>, vector<8x1024xf32>, vector<8x1024xf32> -> vector<8x1024xf32>
    %44 = arith.addf %32, %43 : vector<8x1024xf32>
    %c0_34 = arith.constant 0 : index
    %c32 = arith.constant 32 : index
    %45 = vector.load %arg14[%c0_34, %c32] : memref<8x1090xf32, #tpu.memory_space<vmem>>, vector<8x1024xf32>
    %c3 = arith.constant 3 : index
    %c0_35 = arith.constant 0 : index
    %46 = vector.load %arg5[%c3, %c0_35] : memref<9x1024xf32, #tpu.memory_space<vmem>>, vector<1x1024xf32>
    %47 = vector.broadcast %46 : vector<1x1024xf32> to vector<8x1024xf32>
    %48 = arith.mulf %45, %47 : vector<8x1024xf32>
    %c3_36 = arith.constant 3 : index
    %c0_37 = arith.constant 0 : index
    %c0_38 = arith.constant 0 : index
    %49 = vector.load %arg4[%c3_36, %c0_37, %c0_38] : memref<9x8x8xf32, #tpu.memory_space<vmem>>, vector<1x8x8xf32>
    %50 = vector.shape_cast %49 : vector<1x8x8xf32> to vector<8x8xf32>
    %51 = vector.broadcast %3 : vector<1x8xf32> to vector<8x8xf32>
    %52 = arith.mulf %50, %51 : vector<8x8xf32>
    %53 = vector.broadcast %5 : vector<8x1xf32> to vector<8x8xf32>
    %54 = arith.mulf %52, %53 : vector<8x8xf32>
    %cst_39 = arith.constant dense<0.000000e+00> : vector<8x1024xf32>
    %55 = tpu.matmul %54, %48, %cst_39 {dimension_numbers = #tpu.dot_dimension_numbers<[1], [0], [0], [1], [0, 0, 1, 1], [], []>} : vector<8x8xf32>, vector<8x1024xf32>, vector<8x1024xf32> -> vector<8x1024xf32>
    %56 = arith.addf %44, %55 : vector<8x1024xf32>
    %c0_40 = arith.constant 0 : index
    %c33_41 = arith.constant 33 : index
    %57 = vector.load %arg14[%c0_40, %c33_41] : memref<8x1090xf32, #tpu.memory_space<vmem>>, vector<8x1024xf32>
    %c4 = arith.constant 4 : index
    %c0_42 = arith.constant 0 : index
    %58 = vector.load %arg5[%c4, %c0_42] : memref<9x1024xf32, #tpu.memory_space<vmem>>, vector<1x1024xf32>
    %59 = vector.broadcast %58 : vector<1x1024xf32> to vector<8x1024xf32>
    %60 = arith.mulf %57, %59 : vector<8x1024xf32>
    %c4_43 = arith.constant 4 : index
    %c0_44 = arith.constant 0 : index
    %c0_45 = arith.constant 0 : index
    %61 = vector.load %arg4[%c4_43, %c0_44, %c0_45] : memref<9x8x8xf32, #tpu.memory_space<vmem>>, vector<1x8x8xf32>
    %62 = vector.shape_cast %61 : vector<1x8x8xf32> to vector<8x8xf32>
    %63 = vector.broadcast %3 : vector<1x8xf32> to vector<8x8xf32>
    %64 = arith.mulf %62, %63 : vector<8x8xf32>
    %65 = vector.broadcast %5 : vector<8x1xf32> to vector<8x8xf32>
    %66 = arith.mulf %64, %65 : vector<8x8xf32>
    %cst_46 = arith.constant dense<0.000000e+00> : vector<8x1024xf32>
    %67 = tpu.matmul %66, %60, %cst_46 {dimension_numbers = #tpu.dot_dimension_numbers<[1], [0], [0], [1], [0, 0, 1, 1], [], []>} : vector<8x8xf32>, vector<8x1024xf32>, vector<8x1024xf32> -> vector<8x1024xf32>
    %68 = arith.addf %56, %67 : vector<8x1024xf32>
    %c0_47 = arith.constant 0 : index
    %c34 = arith.constant 34 : index
    %69 = vector.load %arg14[%c0_47, %c34] : memref<8x1090xf32, #tpu.memory_space<vmem>>, vector<8x1024xf32>
    %c5 = arith.constant 5 : index
    %c0_48 = arith.constant 0 : index
    %70 = vector.load %arg5[%c5, %c0_48] : memref<9x1024xf32, #tpu.memory_space<vmem>>, vector<1x1024xf32>
    %71 = vector.broadcast %70 : vector<1x1024xf32> to vector<8x1024xf32>
    %72 = arith.mulf %69, %71 : vector<8x1024xf32>
    %c5_49 = arith.constant 5 : index
    %c0_50 = arith.constant 0 : index
    %c0_51 = arith.constant 0 : index
    %73 = vector.load %arg4[%c5_49, %c0_50, %c0_51] : memref<9x8x8xf32, #tpu.memory_space<vmem>>, vector<1x8x8xf32>
    %74 = vector.shape_cast %73 : vector<1x8x8xf32> to vector<8x8xf32>
    %75 = vector.broadcast %3 : vector<1x8xf32> to vector<8x8xf32>
    %76 = arith.mulf %74, %75 : vector<8x8xf32>
    %77 = vector.broadcast %5 : vector<8x1xf32> to vector<8x8xf32>
    %78 = arith.mulf %76, %77 : vector<8x8xf32>
    %cst_52 = arith.constant dense<0.000000e+00> : vector<8x1024xf32>
    %79 = tpu.matmul %78, %72, %cst_52 {dimension_numbers = #tpu.dot_dimension_numbers<[1], [0], [0], [1], [0, 0, 1, 1], [], []>} : vector<8x8xf32>, vector<8x1024xf32>, vector<8x1024xf32> -> vector<8x1024xf32>
    %80 = arith.addf %68, %79 : vector<8x1024xf32>
    %c0_53 = arith.constant 0 : index
    %c64 = arith.constant 64 : index
    %81 = vector.load %arg14[%c0_53, %c64] : memref<8x1090xf32, #tpu.memory_space<vmem>>, vector<8x1024xf32>
    %c6 = arith.constant 6 : index
    %c0_54 = arith.constant 0 : index
    %82 = vector.load %arg5[%c6, %c0_54] : memref<9x1024xf32, #tpu.memory_space<vmem>>, vector<1x1024xf32>
    %83 = vector.broadcast %82 : vector<1x1024xf32> to vector<8x1024xf32>
    %84 = arith.mulf %81, %83 : vector<8x1024xf32>
    %c6_55 = arith.constant 6 : index
    %c0_56 = arith.constant 0 : index
    %c0_57 = arith.constant 0 : index
    %85 = vector.load %arg4[%c6_55, %c0_56, %c0_57] : memref<9x8x8xf32, #tpu.memory_space<vmem>>, vector<1x8x8xf32>
    %86 = vector.shape_cast %85 : vector<1x8x8xf32> to vector<8x8xf32>
    %87 = vector.broadcast %3 : vector<1x8xf32> to vector<8x8xf32>
    %88 = arith.mulf %86, %87 : vector<8x8xf32>
    %89 = vector.broadcast %5 : vector<8x1xf32> to vector<8x8xf32>
    %90 = arith.mulf %88, %89 : vector<8x8xf32>
    %cst_58 = arith.constant dense<0.000000e+00> : vector<8x1024xf32>
    %91 = tpu.matmul %90, %84, %cst_58 {dimension_numbers = #tpu.dot_dimension_numbers<[1], [0], [0], [1], [0, 0, 1, 1], [], []>} : vector<8x8xf32>, vector<8x1024xf32>, vector<8x1024xf32> -> vector<8x1024xf32>
    %92 = arith.addf %80, %91 : vector<8x1024xf32>
    %c0_59 = arith.constant 0 : index
    %c65 = arith.constant 65 : index
    %93 = vector.load %arg14[%c0_59, %c65] : memref<8x1090xf32, #tpu.memory_space<vmem>>, vector<8x1024xf32>
    %c7 = arith.constant 7 : index
    %c0_60 = arith.constant 0 : index
    %94 = vector.load %arg5[%c7, %c0_60] : memref<9x1024xf32, #tpu.memory_space<vmem>>, vector<1x1024xf32>
    %95 = vector.broadcast %94 : vector<1x1024xf32> to vector<8x1024xf32>
    %96 = arith.mulf %93, %95 : vector<8x1024xf32>
    %c7_61 = arith.constant 7 : index
    %c0_62 = arith.constant 0 : index
    %c0_63 = arith.constant 0 : index
    %97 = vector.load %arg4[%c7_61, %c0_62, %c0_63] : memref<9x8x8xf32, #tpu.memory_space<vmem>>, vector<1x8x8xf32>
    %98 = vector.shape_cast %97 : vector<1x8x8xf32> to vector<8x8xf32>
    %99 = vector.broadcast %3 : vector<1x8xf32> to vector<8x8xf32>
    %100 = arith.mulf %98, %99 : vector<8x8xf32>
    %101 = vector.broadcast %5 : vector<8x1xf32> to vector<8x8xf32>
    %102 = arith.mulf %100, %101 : vector<8x8xf32>
    %cst_64 = arith.constant dense<0.000000e+00> : vector<8x1024xf32>
    %103 = tpu.matmul %102, %96, %cst_64 {dimension_numbers = #tpu.dot_dimension_numbers<[1], [0], [0], [1], [0, 0, 1, 1], [], []>} : vector<8x8xf32>, vector<8x1024xf32>, vector<8x1024xf32> -> vector<8x1024xf32>
    %104 = arith.addf %92, %103 : vector<8x1024xf32>
    %c0_65 = arith.constant 0 : index
    %c66 = arith.constant 66 : index
    %105 = vector.load %arg14[%c0_65, %c66] : memref<8x1090xf32, #tpu.memory_space<vmem>>, vector<8x1024xf32>
    %c8 = arith.constant 8 : index
    %c0_66 = arith.constant 0 : index
    %106 = vector.load %arg5[%c8, %c0_66] : memref<9x1024xf32, #tpu.memory_space<vmem>>, vector<1x1024xf32>
    %107 = vector.broadcast %106 : vector<1x1024xf32> to vector<8x1024xf32>
    %108 = arith.mulf %105, %107 : vector<8x1024xf32>
    %c8_67 = arith.constant 8 : index
    %c0_68 = arith.constant 0 : index
    %c0_69 = arith.constant 0 : index
    %109 = vector.load %arg4[%c8_67, %c0_68, %c0_69] : memref<9x8x8xf32, #tpu.memory_space<vmem>>, vector<1x8x8xf32>
    %110 = vector.shape_cast %109 : vector<1x8x8xf32> to vector<8x8xf32>
    %111 = vector.broadcast %3 : vector<1x8xf32> to vector<8x8xf32>
    %112 = arith.mulf %110, %111 : vector<8x8xf32>
    %113 = vector.broadcast %5 : vector<8x1xf32> to vector<8x8xf32>
    %114 = arith.mulf %112, %113 : vector<8x8xf32>
    %cst_70 = arith.constant dense<0.000000e+00> : vector<8x1024xf32>
    %115 = tpu.matmul %114, %108, %cst_70 {dimension_numbers = #tpu.dot_dimension_numbers<[1], [0], [0], [1], [0, 0, 1, 1], [], []>} : vector<8x8xf32>, vector<8x1024xf32>, vector<8x1024xf32> -> vector<8x1024xf32>
    %116 = arith.addf %104, %115 : vector<8x1024xf32>
    %c0_71 = arith.constant 0 : index
    %c0_72 = arith.constant 0 : index
    %117 = vector.load %arg6[%c0_71, %c0_72] : memref<1x1024xf32, #tpu.memory_space<vmem>>, vector<1x1024xf32>
    %118 = vector.broadcast %117 : vector<1x1024xf32> to vector<8x1024xf32>
    %119 = arith.addf %116, %118 : vector<8x1024xf32>
    %c0_73 = arith.constant 0 : index
    %c0_74 = arith.constant 0 : index
    %120 = vector.load %arg7[%c0_73, %c0_74] : memref<8x1xf32, #tpu.memory_space<vmem>>, vector<8x1xf32>
    %121 = vector.broadcast %120 : vector<8x1xf32> to vector<8x1024xf32>
    %122 = arith.addf %119, %121 : vector<8x1024xf32>
    %cst_75 = arith.constant 0.000000e+00 : f32
    %123 = vector.broadcast %cst_75 : f32 to vector<8x1024xf32>
    %124 = arith.cmpf oge, %122, %123 : vector<8x1024xf32>
    %cst_76 = arith.constant 2.000000e-01 : f32
    %125 = vector.broadcast %cst_76 : f32 to vector<8x1024xf32>
    %126 = arith.mulf %125, %122 : vector<8x1024xf32>
    %127 = arith.select %124, %122, %126 : vector<8x1024xi1>, vector<8x1024xf32>
    %cst_77 = arith.constant 1.41421354 : f32
    %128 = vector.broadcast %cst_77 : f32 to vector<8x1024xf32>
    %129 = arith.mulf %127, %128 : vector<8x1024xf32>
    %cst_78 = arith.constant -2.560000e+02 : f32
    %cst_79 = arith.constant 2.560000e+02 : f32
    %130 = vector.broadcast %cst_78 : f32 to vector<8x1024xf32>
    %131 = arith.maximumf %130, %129 : vector<8x1024xf32>
    %132 = vector.broadcast %cst_79 : f32 to vector<8x1024xf32>
    %133 = arith.minimumf %132, %131 : vector<8x1024xf32>
    %c0_80 = arith.constant 0 : index
    %c0_81 = arith.constant 0 : index
    %c0_82 = arith.constant 0 : index
    %134 = vector.load %arg12[%c0_80, %c0_81, %c0_82] : memref<1x8x1024xf32, #tpu.memory_space<vmem>>, vector<1x8x1024xf32>
    %135 = vector.shape_cast %134 : vector<1x8x1024xf32> to vector<8x1024xf32>
    %136 = vector.shape_cast %133 : vector<8x1024xf32> to vector<1x8x1024xf32>
    tpu.vector_store %arg12[%c0_80, %c0_81, %c0_82], %136 {strides = array<i32>} : memref<1x8x1024xf32, #tpu.memory_space<vmem>>, vector<1x8x1024xf32>,
    %c0_83 = arith.constant 0 : index
    %c0_84 = arith.constant 0 : index
    %137 = vector.load %arg9[%c0_83, %c0_84] : memref<3x8xf32, #tpu.memory_space<vmem>>, vector<3x8xf32>
    %c0_85 = arith.constant 0 : index
    %c0_86 = arith.constant 0 : index
    %c0_87 = arith.constant 0 : index
    %138 = vector.load %arg8[%c0_85, %c0_86, %c0_87] : memref<1x1x8xf32, #tpu.memory_space<vmem>>, vector<1x1x8xf32>
    %139 = vector.shape_cast %138 : vector<1x1x8xf32> to vector<1x8xf32>
    %140 = vector.broadcast %139 : vector<1x8xf32> to vector<3x8xf32>
    %141 = arith.mulf %137, %140 : vector<3x8xf32>
    %cst_88 = arith.constant dense<0.000000e+00> : vector<3x1024xf32>
    %142 = tpu.matmul %141, %133, %cst_88 {dimension_numbers = #tpu.dot_dimension_numbers<[1], [0], [0], [1], [0, 0, 1, 1], [], []>} : vector<3x8xf32>, vector<8x1024xf32>, vector<3x1024xf32> -> vector<3x1024xf32>
    %c0_89 = arith.constant 0 : index
    %c0_90 = arith.constant 0 : index
    %c0_91 = arith.constant 0 : index
    %143 = vector.load %arg11[%c0_89, %c0_90, %c0_91] : memref<1x3x1024xf32, #tpu.memory_space<vmem>>, vector<1x3x1024xf32>
    %144 = vector.shape_cast %143 : vector<1x3x1024xf32> to vector<3x1024xf32>
    %c0_92 = arith.constant 0 : index
    %c0_93 = arith.constant 0 : index
    %145 = vector.load %arg10[%c0_92, %c0_93] : memref<3x1xf32, #tpu.memory_space<vmem>>, vector<3x1xf32>
    %146 = vector.broadcast %145 : vector<3x1xf32> to vector<3x1024xf32>
    %147 = arith.addf %142, %146 : vector<3x1024xf32>
    %cst_94 = arith.constant -2.560000e+02 : f32
    %cst_95 = arith.constant 2.560000e+02 : f32
    %148 = vector.broadcast %cst_94 : f32 to vector<3x1024xf32>
    %149 = arith.maximumf %148, %147 : vector<3x1024xf32>
    %150 = vector.broadcast %cst_95 : f32 to vector<3x1024xf32>
    %151 = arith.minimumf %150, %149 : vector<3x1024xf32>
    %152 = arith.addf %144, %151 : vector<3x1024xf32>
    %c0_96 = arith.constant 0 : index
    %c0_97 = arith.constant 0 : index
    %c0_98 = arith.constant 0 : index
    %153 = vector.load %arg13[%c0_96, %c0_97, %c0_98] : memref<1x3x1024xf32, #tpu.memory_space<vmem>>, vector<1x3x1024xf32>
    %154 = vector.shape_cast %153 : vector<1x3x1024xf32> to vector<3x1024xf32>
    %155 = vector.shape_cast %152 : vector<3x1024xf32> to vector<1x3x1024xf32>
    tpu.vector_store %arg13[%c0_96, %c0_97, %c0_98], %155 {strides = array<i32>} : memref<1x3x1024xf32, #tpu.memory_space<vmem>>, vector<1x3x1024xf32>,
    return
  }
  func.func @transform_0(%arg0: i32) -> (i32, i32, i32) {
    %c0_i32 = arith.constant 0 : i32
    %c0_i32_0 = arith.constant 0 : i32
    %c0_i32_1 = arith.constant 0 : i32
    return %arg0, %c0_i32, %c0_i32_0 : i32, i32, i32
  }
  func.func @transform_1(%arg0: i32) -> (i32, i32, i32) {
    %c0_i32 = arith.constant 0 : i32
    %c0_i32_0 = arith.constant 0 : i32
    %c0_i32_1 = arith.constant 0 : i32
    return %arg0, %c0_i32, %c0_i32_0 : i32, i32, i32
  }
  func.func @transform_2(%arg0: i32) -> (i32, i32, i32) {
    %c0_i32 = arith.constant 0 : i32
    %c0_i32_0 = arith.constant 0 : i32
    %c0_i32_1 = arith.constant 0 : i32
    return %arg0, %c0_i32, %c0_i32_0 : i32, i32, i32
  }
  func.func @transform_3(%arg0: i32) -> (i32, i32, i32) {
    %c0_i32 = arith.constant 0 : i32
    %c0_i32_0 = arith.constant 0 : i32
    %c0_i32_1 = arith.constant 0 : i32
    %c0_i32_2 = arith.constant 0 : i32
    return %c0_i32, %c0_i32_0, %c0_i32_1 : i32, i32, i32
  }
  func.func @transform_4(%arg0: i32) -> (i32, i32) {
    %c0_i32 = arith.constant 0 : i32
    %c0_i32_0 = arith.constant 0 : i32
    %c0_i32_1 = arith.constant 0 : i32
    return %c0_i32, %c0_i32_0 : i32, i32
  }
  func.func @transform_5(%arg0: i32) -> (i32, i32) {
    %c0_i32 = arith.constant 0 : i32
    %c0_i32_0 = arith.constant 0 : i32
    %c0_i32_1 = arith.constant 0 : i32
    return %c0_i32, %c0_i32_0 : i32, i32
  }
  func.func @transform_6(%arg0: i32) -> (i32, i32) {
    %c0_i32 = arith.constant 0 : i32
    %c0_i32_0 = arith.constant 0 : i32
    %c0_i32_1 = arith.constant 0 : i32
    return %c0_i32, %c0_i32_0 : i32, i32
  }
  func.func @transform_7(%arg0: i32) -> (i32, i32, i32) {
    %c0_i32 = arith.constant 0 : i32
    %c0_i32_0 = arith.constant 0 : i32
    %c0_i32_1 = arith.constant 0 : i32
    return %arg0, %c0_i32, %c0_i32_0 : i32, i32, i32
  }
  func.func @transform_8(%arg0: i32) -> (i32, i32) {
    %c0_i32 = arith.constant 0 : i32
    %c0_i32_0 = arith.constant 0 : i32
    %c0_i32_1 = arith.constant 0 : i32
    return %c0_i32, %c0_i32_0 : i32, i32
  }
  func.func @transform_9(%arg0: i32) -> (i32, i32) {
    %c0_i32 = arith.constant 0 : i32
    %c0_i32_0 = arith.constant 0 : i32
    %c0_i32_1 = arith.constant 0 : i32
    return %c0_i32, %c0_i32_0 : i32, i32
  }
  func.func @transform_10(%arg0: i32) -> (i32, i32, i32) {
    %c0_i32 = arith.constant 0 : i32
    %c0_i32_0 = arith.constant 0 : i32
    %c0_i32_1 = arith.constant 0 : i32
    return %arg0, %c0_i32, %c0_i32_0 : i32, i32, i32
  }
  func.func @transform_11(%arg0: i32) -> (i32, i32, i32) {
    %c0_i32 = arith.constant 0 : i32
    %c0_i32_0 = arith.constant 0 : i32
    %c0_i32_1 = arith.constant 0 : i32
    return %arg0, %c0_i32, %c0_i32_0 : i32, i32, i32
  }
  func.func @transform_12(%arg0: i32) -> (i32, i32, i32) {
    %c0_i32 = arith.constant 0 : i32
    %c0_i32_0 = arith.constant 0 : i32
    %c0_i32_1 = arith.constant 0 : i32
    return %arg0, %c0_i32, %c0_i32_0 : i32, i32, i32
  }
}

</mosaic_0001>

<bundles_post_ra>
// kernel: synthesis_block_forward.4
= control target key start
LH: loop header
LB: loop body
LE: loop exit
PB: predicated region body
PF: predicated region fallthrough
CT: control target
= control target key end

     0   :  { %vm52_vm0 = vcmask 261120   ;;  %vm84_vm1 = vcmask 1043456   ;;  %vm76_vm2 = vcmask 25600   ;;  %vm80_vm3 = vcmask 31744   ;;  %s419_s3 = inlined_call_operand.vmem [shape: f32[32,4], index: 3, kind: input, shape index: {}]   ;;  %s420_s5 = inlined_call_operand.vmem [shape: f32[32,8], index: 5, kind: input, shape index: {}]   ;;  %s421_s0 = inlined_call_operand.vmem [shape: f32[2,32], index: 0, kind: input, shape index: {}]   ;;  %s422_s1 = inlined_call_operand.vmem [shape: f32[2,32], index: 1, kind: input, shape index: {}]   ;;  %s423_s4 = inlined_call_operand.vmem [shape: f32[1,4], index: 4, kind: input, shape index: {}]   ;;  %s424_s6 = inlined_call_operand.vmem [shape: f32[1,8], index: 6, kind: input, shape index: {}]   ;;  %s425_s9 = inlined_call_operand.vmem [shape: f32[4,8], index: 9, kind: input, shape index: {}]   ;;  %s426_s10 = inlined_call_operand.vmem [shape: f32[8,8], index: 10, kind: input, shape index: {}]   ;;  %s427_s7 = inlined_call_operand.vmem [shape: f32[32,8], index: 7, kind: input, shape index: {}]   ;;  %s428_s11 = inlined_call_operand.vmem [shape: f32[2,4], index: 11, kind: output, shape index: {0}]   ;;  %s429_s13 = inlined_call_operand.vmem [shape: f32[2,8], index: 13, kind: output, shape index: {2}]   ;;  %s430_s2 = inlined_call_operand.vmem [shape: f32[2,32], index: 2, kind: input, shape index: {}]   ;;  %s431_s8 = inlined_call_operand.vmem [shape: f32[1,8], index: 8, kind: input, shape index: {}]   ;;  %s432_s15 = inlined_call_operand.vmem [shape: f32[2,8], index: 15, kind: output, shape index: {4}]   ;;  %s433_s12 = inlined_call_operand.vmem [shape: f32[2,8], index: 12, kind: output, shape index: {1}]   ;;  %s434_s14 = inlined_call_operand.vmem [shape: f32[2,8], index: 14, kind: output, shape index: {3}]  }
   0x1   :  { %v47_v0 = vld [vmem:[%s419_s3 + $0x18] sm:$0xff]  ;;  %v46_v2 = vld [vmem:[%s419_s3 + $0x10] sm:$0xff]  ;;  %v45_v4 = vld [vmem:[%s419_s3 + $0x8] sm:$0xff]  ;;  %vm118_vm4 = vcmask 58368   ;;  %vm155_vm5 = vcmask 64512  }
   0x2   :  { %v124_v1 = vld [vmem:[%s420_s5 + $0x18] sm:$0xff]  ;;  %68 = vmatpush.msra.mxu0 %v47_v0  ;;  %v123_v3 = vld [vmem:[%s420_s5 + $0x10] sm:$0xff]  ;;  %v122_v5 = vld [vmem:[%s420_s5 + $0x8] sm:$0xff] }
   0x3   :  { %144 = vmatpush.msra.mxu2 %v124_v1  ;;  %v44_v6 = vld [vmem:[%s419_s3] sm:$0xff]  ;;  %v194_v12 = vld [vmem:[%s427_s7 + $0x18] sm:$0xff]  ;;  %v193_v13 = vld [vmem:[%s427_s7 + $0x10] sm:$0xff] }
   0x4   :  { %69 = vmatpush.msra.mxu0 %v46_v2  ;;  %v121_v7 = vld [vmem:[%s420_s5] sm:$0xff]  ;;  %v192_v14 = vld [vmem:[%s427_s7 + $0x8] sm:$0xff] }
   0x5   :  { %145 = vmatpush.msra.mxu2 %v123_v3  ;;  %v43_v8 = vld [vmem:[%s421_s0] sm:$0x3] }
   0x6   :  { %70 = vmatpush.msra.mxu0 %v45_v4  ;;  %v120_v9 = vld [vmem:[%s422_s1] sm:$0x3] }
   0x7   :  { %146 = vmatpush.msra.mxu2 %v122_v5  ;;  %v79_v10 = vld [vmem:[%s425_s9] sm:$0xf] }
   0x8   :  { %71 = vmatpush.msra.mxu0 %v44_v6  ;;  %245 = vmatpush.msk.msra.mxu1 %vm84_vm1, %v79_v10  ;;  %v154_v11 = vld [vmem:[%s426_s10] sm:$0xff] }
   0x9   :  { %147 = vmatpush.msra.mxu2 %v121_v7  ;;  %244 = vmatmul.msk.f32.vlgmr.msra.gmra.mxu0 %vm52_vm0, %v43_v8  ;;  %v191_v15 = vld [vmem:[%s427_s7] sm:$0xff] }
   0xa   :  { %247 = vmatmul.msk.f32.vlgmr.msra.gmra.mxu2 %vm52_vm0, %v120_v9  ;;  %174 = vmatpush.msra.mxu3 %v154_v11  ;;  %v250_v16 = vld [vmem:[%s423_s4] ss:$0 sm:$0xff] }
   0xb   :  { %214 = vmatpush.msrb.mxu1 %v194_v12  ;;  %v251_v20 = vld [vmem:[%s424_s6] ss:$0 sm:$0xff] }
   0xc   :  { %v190_v24 = vld [vmem:[%s430_s2] sm:$0x3] }
   0xd   :  { %215 = vmatpush.msrb.mxu1 %v193_v13  ;;  %v252_v27 = vld [vmem:[%s431_s8] ss:$0 sm:$0xff] }
   0xf   :  { %216 = vmatpush.msrb.mxu1 %v192_v14 }
  0x11   :  { %217 = vmatpush.msrb.mxu1 %v191_v15 }
  0x86   :  { %v73_v17 = vpop.f32.mrf.mxu0 }
  0x87   :  { %v74_v18 = vadd.f32 %v250_v16, %v73_v17 }
  0x89   :  { %77 = vst.msk [vmem:[%s428_s11] sm:$0x3] %vm76_vm2, %v74_v18  ;;  %v78_v19 = vmul.f32 %v74_v18, %v74_v18 }
  0x8b   :  { %246 = vmatmul.msk.f32.vlgmr.msra.gmra.mxu1 %vm80_vm3, %v78_v19 }
  0x8d   :  { %v149_v21 = vpop.f32.mrf.mxu2 }
  0x8e   :  { %v150_v22 = vadd.f32 %v251_v20, %v149_v21 }
  0x90   :  { %152 = vst.msk [vmem:[%s429_s13] sm:$0x3] %vm118_vm4, %v150_v22  ;;  %v153_v23 = vmul.f32 %v150_v22, %v150_v22 }
  0x92   :  { %248 = vmatmul.msk.f32.vlgmr.msra.gmra.mxu3 %vm155_vm5, %v153_v23 }
  0x93   :  { %249 = vmatmul.msk.f32.vlgmr.msrb.gmra.mxu1 %vm52_vm0, %v190_v24 }
 0x108   :  { %v105_v25 = vpop.f32.mrf.mxu1 }
 0x109   :  { %v106_v26 = vadd.f32 1e-08, %v105_v25 }
 0x10b   :  { %253 = vrsqrt.f32 %v106_v26  ;;  %vm114_vm6 = vweird.f32 %v106_v26 }
 0x110   :  { %v219_v28 = vpop.f32.mrf.mxu1 }
 0x111   :  { %v254_v29 = vpop.eup %253  ;;  %v220_v30 = vadd.f32 %v252_v27, %v219_v28 }
 0x112   :  { %v109_v31 = vmul.f32 %v254_v29, %v106_v26  ;;  %vm115_vm7 = vweird.f32 %v254_v29 }
 0x113   :  { %v222_v32 = vmul.f32 0.35355338, %v220_v30  ;;  %vm116_vm8 = vmor %vm114_vm6, %vm115_vm7 }
 0x114   :  { %v110_v33 = vmul.f32 %v254_v29, %v109_v31 }
 0x115   :  { %v176_v34 = vpop.f32.mrf.mxu3  ;;  %223 = vst.msk [vmem:[%s432_s15] sm:$0x3] %vm118_vm4, %v222_v32 }
 0x116   :  { %v177_v35 = vadd.f32 1e-08, %v176_v34  ;;  %v111_v36 = vmul.f32 0.5, %v110_v33 }
 0x118   :  { %255 = vrsqrt.f32 %v177_v35  ;;  %v112_v37 = vsub.f32 1.5, %v111_v36  ;;  %vm185_vm10 = vweird.f32 %v177_v35 }
 0x11a   :  { %v113_v38 = vmul.f32 %v254_v29, %v112_v37 }
 0x11c   :  { %v117_v39 = vsel %vm116_vm8, %v254_v29, %v113_v38 }
 0x11d   :  { %119 = vst.msk [vmem:[%s433_s12] sm:$0x3] %vm118_vm4, %v117_v39 }
 0x11e   :  { %v256_v40 = vpop.eup %255 }
 0x11f   :  { %v180_v41 = vmul.f32 %v256_v40, %v177_v35  ;;  %vm186_vm9 = vweird.f32 %v256_v40 }
 0x120   :  { %vm187_vm11 = vmor %vm185_vm10, %vm186_vm9 }
 0x121   :  { %v181_v42 = vmul.f32 %v256_v40, %v180_v41 }
 0x123   :  { %v182_v43 = vmul.f32 0.5, %v181_v42 }
 0x125   :  { %v183_v44 = vsub.f32 1.5, %v182_v43 }
 0x127   :  { %v184_v45 = vmul.f32 %v256_v40, %v183_v44 }
 0x129   :  { %v188_v46 = vsel %vm187_vm11, %v256_v40, %v184_v45 }
 0x12a   :  { %189 = vst.msk [vmem:[%s434_s14] sm:$0x3] %vm118_vm4, %v188_v46 }

// kernel: synthesis_block_forward.5
= control target key start
LH: loop header
LB: loop body
LE: loop exit
PB: predicated region body
PF: predicated region fallthrough
CT: control target
= control target key end

     0   :  { %s1278_s18 = smov 0   ;;  %s1456_s0 = inlined_call_operand.vmem [shape: f32[2,4,256], index: 0, kind: input, shape index: {}]   ;;  %s1457_s1 = inlined_call_operand.vmem [shape: f32[2,1,4], index: 1, kind: input, shape index: {}]   ;;  %s1458_s2 = inlined_call_operand.vmem [shape: f32[2,8,1], index: 2, kind: input, shape index: {}]   ;;  %s1459_s3 = inlined_call_operand.vmem [shape: f32[9,8,4], index: 3, kind: input, shape index: {}]   ;;  %s1460_s4 = inlined_call_operand.vmem [shape: f32[9,256], index: 4, kind: input, shape index: {}]   ;;  %s1461_s5 = inlined_call_operand.vmem [shape: f32[2,8,256], index: 5, kind: output, shape index: {}]  }
   0x1 LB: > { %s1128_s19 = sadd.s32 4294967295, %s1228_s18   ;;  %p1132_p0 = scmp.ge.s32.totalorder %s1228_s18, 1  ;;  %s1228_s18 = sphi %s1278_s18, %s15_s18  }
   0x2   : > { %p204_p1 = scmp.lt.s32.totalorder %s1228_s18, 3 }
   0x4   : > { %p205_p2 = pnand %p1132_p0, %p204_p1 }
   0x5   : > { %p239_p3 = scmp.lt.s32.totalorder (!%p205_p2), %s1128_s19, 1  ;;  %s1230_s8 = smov (!%p205_p2), 2  }
   0x6   : > { %208 = sbr.rel (%p205_p2) target bundleno = 464 (0x1d0), region = 40  ;;  %s1231_s11 = smov (!%p205_p2), 17  }
   0x7   : > { %s1232_s20 = smov (!%p205_p2), 16   ;;  %s1233_s23 = smov (!%p205_p2), 1  }
   0x8   : > { %s1234_s24 = smov (!%p205_p2), 18   ;;  %s1235_s25 = smov (!%p205_p2), 33  }
   0x9   : > { %s1236_s27 = smov (!%p205_p2), 32   ;;  %s1237_s28 = smov (!%p205_p2), 34  }
   0xa   : > { %s1241_s10 = smov (!%p205_p2), 126   ;;  %s1243_s12 = smov (!%p205_p2), 111  }
   0xb   : > { %v1148_v0 = vld [vmem:[%s1460_s4 + $0x2] ss:$8 sm:$0x3]  ;;  %v1154_v3 = vld [vmem:[%s1460_s4 + $0x3] ss:$8 sm:$0x3] }
   0xc   : > { %v440_v1 = vperm.slane %v1148_v0, 0  ;;  %v441_v2 = vperm.slane %v1148_v0, 1  ;;  %vm282_vm0 = vcmask 1043456   ;;  %s1463_s19 = smov (!%p239_p3, %s1128_s19), 1  ;;  %v529_v6 = vperm.slane %v1154_v3, 1  ;;  %s1244_s13 = smov 110  }
   0xd   : > { %v1138_v4 = vld [vmem:[%s1460_s4 + $0x1] ss:$8 sm:$0x3]  ;;  %s1192_s26 = sshll.u32 %s1463_s19, 3  ;;  %s246_s29 = scalar_lea.vmem %s1457_s1, %s1463_s19  ;;  %v528_v10 = vperm.slane %v1154_v3, 0  ;;  %vm261_vm1 = vcmask 273544  }
   0xe   : > { %v442_v5 = vrot.slane %v441_v2, 4  ;;  %v303_v7 = vperm.slane %v1138_v4, 1  ;;  %s243_s7 = scalar_lea.vmem %s1456_s0, %s1192_s26  ;;  %v1160_v11 = vld [vmem:[%s1460_s4 + $0x4] ss:$8 sm:$0x3]  ;;  %v530_v12 = vrot.slane %v529_v6, 4 }
   0xf   : > { %v256_v9 = vld [vmem:[%s243_s7] sm:$0xff]  ;;  %v616_v14 = vperm.slane %v1160_v11, 0  ;;  %v617_v15 = vperm.slane %v1160_v11, 1  ;;  %v302_v16 = vperm.slane %v1138_v4, 0  ;;  %vm259_vm2 = vcmask 134144   ;;  %s250_s7 = scalar_lea.vmem %s1458_s2, %s1192_s26  ;;  %s1240_s26 = smov 127  }
  0x10   : > { %v443_v8 = vsel %vm282_vm0, %v440_v1, %v442_v5  ;;  %264 = vrot.lane.b32.xlu0 %v256_v9, %s1231_s11  ;;  %v1178_v13 = vld [vmem:[%s1460_s4 + $0x7] ss:$8 sm:$0x3]  ;;  %v304_v17 = vrot.slane %v303_v7, 4  ;;  %v531_v22 = vsel %vm282_vm0, %v528_v10, %v530_v12  ;;  %v1238_v41 = vmov 0.0   ;;  %s1245_s14 = smov 96  }
  0x11   : > { %444 = vrot.lane.b32.xlu1 %v443_v8, %s1230_s8  ;;  %v1166_v18 = vld [vmem:[%s1460_s4 + $0x5] ss:$8 sm:$0x3]  ;;  %v618_v19 = vrot.slane %v617_v15, 4  ;;  %v880_v23 = vperm.slane %v1178_v13, 1  ;;  %v879_v30 = vperm.slane %v1178_v13, 0 }
  0x12   : > { %v1172_v20 = vld [vmem:[%s1460_s4 + $0x6] ss:$8 sm:$0x3]  ;;  %v704_v21 = vperm.slane %v1166_v18, 1  ;;  %v305_v25 = vsel %vm282_vm0, %v302_v16, %v304_v17  ;;  %v703_v27 = vperm.slane %v1166_v18, 0  ;;  %v1239_v42 = vmov 0  }
  0x13   : > { %v619_v24 = vsel %vm282_vm0, %v616_v14, %v618_v19  ;;  %v792_v26 = vperm.slane %v1172_v20, 1  ;;  %v1184_v29 = vld [vmem:[%s1460_s4 + $0x10] ss:$8 sm:$0x3]  ;;  %v881_v31 = vrot.slane %v880_v23, 4  ;;  %v791_v32 = vperm.slane %v1172_v20, 0  ;;  %1220 = vset.pattern.permute.xlu0 %v1239_v42 }
  0x14   : > { %620 = vrot.lane.b32.xlu2 %v619_v24, %s1231_s11  ;;  %v705_v28 = vrot.slane %v704_v21, 4  ;;  %v968_v35 = vperm.slane %v1184_v29, 1  ;;  %v967_v38 = vperm.slane %v1184_v29, 0  ;;  %262 = vst.msk [vmem:[#allocation2 + $0x8] sm:$0xf] %vm261_vm1, %v1238_v41  ;;  %v258_v43 = vld [vmem:[%s250_s7] sm:$0xff] }
  0x15   : > { %v793_v33 = vrot.slane %v792_v26, 4  ;;  %v882_v36 = vsel %vm282_vm0, %v879_v30, %v881_v31  ;;  %260 = vst.msk [vmem:[#allocation2] sm:$0xf] %vm259_vm2, %v1238_v41  ;;  %vm271_vm3 = vcmask 1043592   ;;  %vm272_vm4 = vcmask 1047556   ;;  %s1242_s11 = smov 112  }
  0x16   : > { %v706_v34 = vsel %vm282_vm0, %v703_v27, %v705_v28  ;;  %v969_v39 = vrot.slane %v968_v35, 4  ;;  %vm267_vm5 = vcmask 138240   ;;  %vm273_vm6 = vmor %vm272_vm4, %vm271_vm3  ;;  %v277_v47 = vld [vmem:[%s1460_s4] ss:$8 sm:$0x3]  ;;  %vm309_vm7 = vcmask 7168  }
  0x17   : > { %v794_v37 = vsel %vm282_vm0, %v791_v32, %v793_v33  ;;  %v280_v51 = vperm.slane %v277_v47, 1  ;;  %v279_v57 = vperm.slane %v277_v47, 0  ;;  %vm447_vm8 = vcmask 15360   ;;  %s1246_s15 = smov 95   ;;  %s1247_s16 = smov 94  }
  0x18   : > { %306 = vrot.lane.b32.xlu0 %v305_v25, %s1233_s23  ;;  %v970_v40 = vsel %vm282_vm0, %v967_v38, %v969_v39  ;;  %vm535_vm9 = vcmask 130048   ;;  %vm710_vm10 = vcmask 146432   ;;  %vm798_vm11 = vcmask 261120  }
  0x19   : > { %532 = vrot.lane.b32.xlu1 %v531_v22, %s1232_s20  ;;  %v281_v58 = vrot.slane %v280_v51, 4  ;;  %vm886_vm12 = vcmask 269312   ;;  %vm974_vm13 = vcmask 277504   ;;  %vm336_vm14 = vcmask 31744  }
  0x1a   : > { %vm333_vm15 = vcmask 1039360   ;;  %vm471_vm1 = vcmask 1031168   ;;  %vm646_vm3 = vcmask 908288   ;;  %vm734_vm4 = vcmask 900096  }
  0x1b   : > { %v283_v61 = vsel %vm282_vm0, %v279_v57, %v281_v58 }
  0x1c   : > { %707 = vrot.lane.b32.xlu2 %v706_v34, %s1234_s24 }
  0x20   : > { %795 = vrot.lane.b32.xlu0 %v794_v37, %s1236_s27 }
  0x21   : > { %883 = vrot.lane.b32.xlu1 %v882_v36, %s1235_s25 }
  0x24   : > { %971 = vrot.lane.b32.xlu2 %v970_v40, %s1237_s28 }
  0x28   : > { %293 = vperm.xlu0 %1220, %v258_v43  }
  0x6e   : > { %v621_v8 = vpop.permute.xlu2 %620 }
  0x6f   : > { %v622_v13 = vrot.slane %v621_v8, 4 }
  0x71   : > { %v623_v24 = vsel %vm267_vm5, %v622_v13, %v621_v8 }
  0x76   : > { %v708_v19 = vpop.permute.xlu2 %707 }
  0x77   : > { %v709_v22 = vrot.slane %v708_v19, 4 }
  0x79   : > { %v711_v32 = vsel %vm710_vm10, %v709_v22, %v708_v19 }
  0x82   : > { %v265_v44 = vpop.permute.xlu0 %264 }
  0x83   : > { %v266_v45 = vrot.slane %v265_v44, 4  ;;  %v445_v50 = vpop.permute.xlu1 %444 }
  0x84   : > { %v446_v59 = vrot.slane %v445_v50, 4 }
  0x85   : > { %v268_v46 = vsel %vm267_vm5, %v266_v45, %v265_v44  ;;  %275 = vst.msk [vmem:[#allocation2 + $0x8] sm:$0xf] %vm259_vm2, %v266_v45  ;;  %v972_v44 = vpop.permute.xlu2 %971  ;;  %vm559_vm2 = vcmask 916480   ;;  %vm822_vm5 = vcmask 785408  }
  0x86   : > { %274 = vst.msk [vmem:[#allocation2] sm:$0xff] %vm273_vm6, %v268_v46  ;;  %v448_v6 = vsel %vm447_vm8, %v446_v59, %v445_v50  ;;  %vm910_vm6 = vcmask 777216  }
  0x8a   : > { %v307_v48 = vpop.permute.xlu0 %306 }
  0x8b   : > { %v308_v49 = vrot.slane %v307_v48, 4  ;;  %v533_v63 = vpop.permute.xlu1 %532 }
  0x8c   : > { %v298_v52 = vld [vmem:[#allocation2 + $0x8] sm:$0xf]  ;;  %v534_v4 = vrot.slane %v533_v63, 4 }
  0x8d   : > { %v1341_v53 = vld [vmem:[#allocation2] sm:$0xff]  ;;  %v310_v54 = vsel %vm309_vm7, %v308_v49, %v307_v48  ;;  %v314_v55 = vmul.f32 %v308_v49, %v298_v52  ;;  %v436_v60 = vld [vmem:[#allocation2 + $0x8] sm:$0xf]  ;;  %v973_v49 = vrot.slane %v972_v44, 4  ;;  %vm998_vm7 = vcmask 769024  }
  0x8e   : > { %v313_v56 = vmul.f32 %v1341_v53, %v310_v54  ;;  %v452_v62 = vmul.f32 %v446_v59, %v436_v60  ;;  %v285_v1 = vmul.f32 %v1341_v53, %v283_v61  ;;  %v524_v5 = vld [vmem:[#allocation2 + $0x8] sm:$0xf]  ;;  %v451_v10 = vmul.f32 %v448_v6, %v1341_v53 }
  0x8f   : > { %323 = vst [vmem:[#allocation1 + $0x10] ss:$2 sm:$0xff] %v314_v55  ;;  %v540_v7 = vmul.f32 %v534_v4, %v524_v5  ;;  %v612_v14 = vld [vmem:[#allocation2 + $0x8] sm:$0xf]  ;;  %v536_v15 = vsel %vm535_vm9, %v534_v4, %v533_v63  ;;  %v626_v28 = vmul.f32 %v623_v24, %v1341_v53  ;;  %v714_v37 = vmul.f32 %v711_v32, %v1341_v53  ;;  %v1167_v5 = vld [vmem:[%s1459_s3 + $0x28] sm:$0xff] }
  0x90   : > { %321 = vst [vmem:[#allocation1] ss:$2 sm:$0xff] %v313_v56  ;;  %v627_v16 = vmul.f32 %v622_v13, %v612_v14  ;;  %v539_v18 = vmul.f32 %v536_v15, %v1341_v53  ;;  %v699_v23 = vld [vmem:[#allocation2 + $0x8] sm:$0xf]  ;;  %v975_v58 = vsel %vm974_vm13, %v973_v49, %v972_v44 }
  0x91   : > { %v715_v25 = vmul.f32 %v709_v22, %v699_v23  ;;  %v787_v33 = vld [vmem:[#allocation2 + $0x8] sm:$0xf]  ;;  %v978_v59 = vmul.f32 %v975_v58, %v1341_v53 }
  0x92   : > { %v796_v26 = vpop.permute.xlu0 %795  ;;  %v875_v41 = vld [vmem:[#allocation2 + $0x8] sm:$0xf] }
  0x93   : > { %v797_v31 = vrot.slane %v796_v26, 4  ;;  %v884_v35 = vpop.permute.xlu1 %883  ;;  %v963_v50 = vld [vmem:[#allocation2 + $0x8] sm:$0xf] }
  0x94   : > { %v885_v40 = vrot.slane %v884_v35, 4  ;;  %v979_v52 = vmul.f32 %v973_v49, %v963_v50  ;;  %v1173_v6 = vld [vmem:[%s1459_s3 + $0x30] sm:$0xff] }
  0x95   : > { %v803_v34 = vmul.f32 %v797_v31, %v787_v33  ;;  %v799_v42 = vsel %vm798_vm11, %v797_v31, %v796_v26  ;;  %v1149_v26 = vld [vmem:[%s1459_s3 + $0x10] sm:$0xff] }
  0x96   : > { %v326_v0 = vld.sshfl [vmem:[#allocation1 + $0x10] sm:$0xff pattern:$0x75316420]  ;;  %v891_v43 = vmul.f32 %v885_v40, %v875_v41  ;;  %v802_v46 = vmul.f32 %v799_v42, %v1341_v53  ;;  %v887_v51 = vsel %vm886_vm12, %v885_v40, %v884_v35  ;;  %v1161_v42 = vld [vmem:[%s1459_s3 + $0x20] sm:$0xff] }
  0x97   : > { %461 = vst [vmem:[#allocation1 + $0x10] ss:$2 sm:$0xff] %v452_v62  ;;  %331 = vrot.lane.b32.xlu1 %v326_v0, %s1240_s26  ;;  %v324_v2 = vld.sshfl [vmem:[#allocation1] sm:$0xff pattern:$0x75316420]  ;;  %v890_v55 = vmul.f32 %v887_v51, %v1341_v53 }
  0x98   : > { %v325_v3 = vld.sshfl [vmem:[#allocation1 + $0x8] sm:$0xff pattern:$0x75316420]  ;;  %v286_v53 = vld [vmem:[%s1459_s3] sm:$0xff] }
  0x99   : > { %385 = vst [vmem:[#allocation1] ss:$2 sm:$0xff] %v285_v1  ;;  %329 = vrot.lane.b32.xlu2 %v325_v3, %s1240_s26  ;;  %v1221_v1 = vld [vmem:[%s246_s29] ss:$0 sm:$0xff] }
  0x9a   : > { %v1364_v3 = vpop.permute.xlu0 %293  ;;  %v806_v8 = vmul.f32 %v1221_v1, %v1173_v6 }
  0x9c   : > { %v1385_v13 = vmul.f32 %v806_v8, %v1364_v3 }
  0x9e   : > { %v464_v9 = vld.sshfl [vmem:[#allocation1 + $0x10] sm:$0xff pattern:$0x75316420] }
  0x9f   : > { %549 = vst [vmem:[#allocation1 + $0x10] ss:$2 sm:$0xff] %v540_v7  ;;  %327 = vrot.lane.b32.xlu1 %v324_v2, %s1240_s26  ;;  %v290_v2 = vmul.f32 %v1221_v1, %v286_v53  ;;  %v718_v7 = vmul.f32 %v1221_v1, %v1167_v5 }
  0xa0   : > { %v386_v11 = vld.sshfl [vmem:[#allocation1] sm:$0xff pattern:$0x75316420]  ;;  %v387_v12 = vld.sshfl [vmem:[#allocation1 + $0x8] sm:$0xff pattern:$0x75316420] }
  0xa1   : > { %1144 = vmatpush.msk.msra.mxu2 %vm282_vm0, %v386_v11  ;;  %1146 = vmatpush.msk.msra.mxu3 %vm282_vm0, %v387_v12  ;;  %459 = vst [vmem:[#allocation1] ss:$2 sm:$0xff] %v451_v10  ;;  %v296_v4 = vmul.f32 %v1364_v3, %v290_v2  ;;  %v1185_v10 = vld [vmem:[%s1459_s3 + $0x40] sm:$0xff]  ;;  %v1382_v12 = vmul.f32 %v718_v7, %v1364_v3 }
  0xa2   : > { %v982_v14 = vmul.f32 %v1221_v1, %v1185_v10 }
  0xa3   : > { %1145 = vmatmul.msk.f32.vlgmr.msra.gmra.mxu2 %vm336_vm14, %v296_v4  ;;  %1147 = vmatmul.msk.f32.vlgmr.msra.gmra.mxu3 %vm336_vm14, %v296_v4 }
  0xa6   : > { %v552_v17 = vld.sshfl [vmem:[#allocation1 + $0x10] sm:$0xff pattern:$0x75316420] }
  0xa7   : > { %469 = vrot.lane.b32.xlu1 %v464_v9, %s1241_s10  ;;  %636 = vst [vmem:[#allocation1 + $0x10] ss:$2 sm:$0xff] %v627_v16  ;;  %v1179_v9 = vld [vmem:[%s1459_s3 + $0x38] sm:$0xff]  ;;  %v1391_v16 = vmul.f32 %v982_v14, %v1364_v3 }
  0xa8   : > { %v463_v20 = vld.sshfl [vmem:[#allocation1 + $0x8] sm:$0xff pattern:$0x75316420]  ;;  %v462_v21 = vld.sshfl [vmem:[#allocation1] sm:$0xff pattern:$0x75316420]  ;;  %v894_v11 = vmul.f32 %v1221_v1, %v1179_v9 }
  0xa9   : > { %467 = vrot.lane.b32.xlu0 %v463_v20, %s1241_s10  ;;  %465 = vrot.lane.b32.xlu2 %v462_v21, %s1241_s10  ;;  %547 = vst [vmem:[#allocation1] ss:$2 sm:$0xff] %v539_v18 }
  0xaa   : > { %v1388_v15 = vmul.f32 %v894_v11, %v1364_v3 }
  0xae   : > { %v639_v27 = vld.sshfl [vmem:[#allocation1 + $0x10] sm:$0xff pattern:$0x75316420] }
  0xaf   : > { %557 = vrot.lane.b32.xlu1 %v552_v17, %s1242_s11  ;;  %724 = vst [vmem:[#allocation1 + $0x10] ss:$2 sm:$0xff] %v715_v25  ;;  %v1139_v17 = vld [vmem:[%s1459_s3 + $0x8] sm:$0xff] }
  0xb0   : > { %v551_v29 = vld.sshfl [vmem:[#allocation1 + $0x8] sm:$0xff pattern:$0x75316420]  ;;  %v550_v30 = vld.sshfl [vmem:[#allocation1] sm:$0xff pattern:$0x75316420]  ;;  %v317_v18 = vmul.f32 %v1221_v1, %v1139_v17 }
  0xb1   : > { %555 = vrot.lane.b32.xlu0 %v551_v29, %s1242_s11  ;;  %553 = vrot.lane.b32.xlu2 %v550_v30, %s1242_s11  ;;  %634 = vst [vmem:[#allocation1] ss:$2 sm:$0xff] %v626_v28 }
  0xb2   : > { %v318_v20 = vmul.f32 %v317_v18, %v1364_v3 }
  0xb6   : > { %v727_v36 = vld.sshfl [vmem:[#allocation1 + $0x10] sm:$0xff pattern:$0x75316420] }
  0xb7   : > { %644 = vrot.lane.b32.xlu1 %v639_v27, %s1243_s12  ;;  %812 = vst [vmem:[#allocation1 + $0x10] ss:$2 sm:$0xff] %v803_v34  ;;  %v455_v27 = vmul.f32 %v1221_v1, %v1149_v26  ;;  %v1155_v34 = vld [vmem:[%s1459_s3 + $0x18] sm:$0xff] }
  0xb8   : > { %v638_v38 = vld.sshfl [vmem:[#allocation1 + $0x8] sm:$0xff pattern:$0x75316420]  ;;  %v637_v39 = vld.sshfl [vmem:[#allocation1] sm:$0xff pattern:$0x75316420]  ;;  %v543_v35 = vmul.f32 %v1221_v1, %v1155_v34 }
  0xb9   : > { %642 = vrot.lane.b32.xlu0 %v638_v38, %s1243_s12  ;;  %640 = vrot.lane.b32.xlu2 %v637_v39, %s1243_s12  ;;  %722 = vst [vmem:[#allocation1] ss:$2 sm:$0xff] %v714_v37  ;;  %v456_v33 = vmul.f32 %v455_v27, %v1364_v3 }
  0xba   : > { %v544_v41 = vmul.f32 %v543_v35, %v1364_v3 }
  0xbe   : > { %v815_v45 = vld.sshfl [vmem:[#allocation1 + $0x10] sm:$0xff pattern:$0x75316420] }
  0xbf   : > { %732 = vrot.lane.b32.xlu1 %v727_v36, %s1244_s13  ;;  %900 = vst [vmem:[#allocation1 + $0x10] ss:$2 sm:$0xff] %v891_v43  ;;  %v630_v43 = vmul.f32 %v1221_v1, %v1161_v42 }
  0xc0   : > { %v726_v47 = vld.sshfl [vmem:[#allocation1 + $0x8] sm:$0xff pattern:$0x75316420]  ;;  %v725_v48 = vld.sshfl [vmem:[#allocation1] sm:$0xff pattern:$0x75316420] }
  0xc1   : > { %730 = vrot.lane.b32.xlu0 %v726_v47, %s1244_s13  ;;  %728 = vrot.lane.b32.xlu2 %v725_v48, %s1244_s13  ;;  %810 = vst [vmem:[#allocation1] ss:$2 sm:$0xff] %v802_v46  ;;  %v631_v48 = vmul.f32 %v630_v43, %v1364_v3 }
  0xc6   : > { %v903_v54 = vld.sshfl [vmem:[#allocation1 + $0x10] sm:$0xff pattern:$0x75316420] }
  0xc7   : > { %820 = vrot.lane.b32.xlu1 %v815_v45, %s1245_s14  ;;  %988 = vst [vmem:[#allocation1 + $0x10] ss:$2 sm:$0xff] %v979_v52 }
  0xc8   : > { %v814_v56 = vld.sshfl [vmem:[#allocation1 + $0x8] sm:$0xff pattern:$0x75316420]  ;;  %v813_v57 = vld.sshfl [vmem:[#allocation1] sm:$0xff pattern:$0x75316420] }
  0xc9   : > { %818 = vrot.lane.b32.xlu0 %v814_v56, %s1245_s14  ;;  %816 = vrot.lane.b32.xlu2 %v813_v57, %s1245_s14  ;;  %898 = vst [vmem:[#allocation1] ss:$2 sm:$0xff] %v890_v55  ;;  %s1193_s14 = sshll.u32 %s1463_s19, 4 }
  0xca   : > { %s255_s17 = scalar_lea.vmem %s1461_s5, %s1193_s14 }
  0xce   : > { %v991_v62 = vld.sshfl [vmem:[#allocation1 + $0x10] sm:$0xff pattern:$0x75316420] }
  0xcf   : > { %908 = vrot.lane.b32.xlu1 %v903_v54, %s1246_s15 }
  0xd0   : > { %v902_v60 = vld.sshfl [vmem:[#allocation1 + $0x8] sm:$0xff pattern:$0x75316420]  ;;  %v901_v61 = vld.sshfl [vmem:[#allocation1] sm:$0xff pattern:$0x75316420] }
  0xd1   : > { %906 = vrot.lane.b32.xlu0 %v902_v60, %s1246_s15  ;;  %904 = vrot.lane.b32.xlu2 %v901_v61, %s1246_s15  ;;  %986 = vst [vmem:[#allocation1] ss:$2 sm:$0xff] %v978_v59 }
  0xd7   : > { %996 = vrot.lane.b32.xlu1 %v991_v62, %s1247_s16 }
  0xd8   : > { %v990_v63 = vld.sshfl [vmem:[#allocation1 + $0x8] sm:$0xff pattern:$0x75316420]  ;;  %v989_v0 = vld.sshfl [vmem:[#allocation1] sm:$0xff pattern:$0x75316420] }
  0xd9   : > { %994 = vrot.lane.b32.xlu0 %v990_v63, %s1247_s16  ;;  %992 = vrot.lane.b32.xlu2 %v989_v0, %s1247_s16 }
  0xf3   : > { %v330_v19 = vpop.permute.xlu2 %329 }
 0x103   : > { %v466_v23 = vpop.permute.xlu2 %465 }
 0x109   : > { %v332_v21 = vpop.permute.xlu1 %331 }
 0x10a   : > { %v335_v22 = vsel %vm333_vm15, %v330_v19, %v332_v21 }
 0x10b   : > { %1142 = vmatpush.msk.msra.mxu1 %vm282_vm0, %v335_v22  ;;  %v554_v28 = vpop.permute.xlu2 %553 }
 0x10c   : > { %1143 = vmatmul.msk.f32.vlgmr.msra.gmra.mxu1 %vm336_vm14, %v318_v20 }
 0x111   : > { %v328_v24 = vpop.permute.xlu1 %327 }
 0x112   : > { %v334_v25 = vsel %vm333_vm15, %v328_v24, %v330_v19 }
 0x113   : > { %1140 = vmatpush.msk.msra.mxu0 %vm282_vm0, %v334_v25  ;;  %v641_v37 = vpop.permute.xlu2 %640 }
 0x114   : > { %1141 = vmatmul.msk.f32.vlgmr.msra.gmra.mxu0 %vm336_vm14, %v318_v20 }
 0x119   : > { %v470_v29 = vpop.permute.xlu1 %469 }
 0x11b   : > { %v468_v30 = vpop.permute.xlu0 %467  ;;  %v729_v49 = vpop.permute.xlu2 %728 }
 0x11c   : > { %v472_v31 = vsel %vm471_vm1, %v466_v23, %v468_v30  ;;  %v473_v32 = vsel %vm471_vm1, %v468_v30, %v470_v29 }
 0x11d   : > { %1150 = vmatpush.msk.msrb.mxu0 %vm282_vm0, %v472_v31  ;;  %1152 = vmatpush.msk.msrb.mxu1 %vm282_vm0, %v473_v32 }
 0x11e   : > { %1151 = vmatmul.msk.f32.vlgmr.msrb.gmra.mxu0 %vm336_vm14, %v456_v33  ;;  %1153 = vmatmul.msk.f32.vlgmr.msrb.gmra.mxu1 %vm336_vm14, %v456_v33 }
 0x121   : > { %v558_v36 = vpop.permute.xlu1 %557 }
 0x123   : > { %v556_v38 = vpop.permute.xlu0 %555  ;;  %v817_v55 = vpop.permute.xlu2 %816 }
 0x124   : > { %v560_v39 = vsel %vm559_vm2, %v554_v28, %v556_v38  ;;  %v561_v40 = vsel %vm559_vm2, %v556_v38, %v558_v36 }
 0x125   : > { %1156 = vmatpush.msk.msrb.mxu2 %vm282_vm0, %v560_v39  ;;  %1158 = vmatpush.msk.msrb.mxu3 %vm282_vm0, %v561_v40 }
 0x126   : > { %1157 = vmatmul.msk.f32.vlgmr.msrb.gmra.mxu2 %vm336_vm14, %v544_v41  ;;  %1159 = vmatmul.msk.f32.vlgmr.msrb.gmra.mxu3 %vm336_vm14, %v544_v41  ;;  %v412_v7 = vpop.f32.mrf.mxu2  ;;  %v432_v8 = vpop.f32.mrf.mxu3 }
 0x129   : > { %v645_v44 = vpop.permute.xlu1 %644 }
 0x12b   : > { %v643_v45 = vpop.permute.xlu0 %642  ;;  %v905_v60 = vpop.permute.xlu2 %904 }
 0x12c   : > { %v647_v46 = vsel %vm646_vm3, %v641_v37, %v643_v45  ;;  %v648_v47 = vsel %vm646_vm3, %v643_v45, %v645_v44 }
 0x12d   : > { %1162 = vmatpush.msk.msra.mxu0 %vm282_vm0, %v647_v46  ;;  %1164 = vmatpush.msk.msra.mxu1 %vm282_vm0, %v648_v47 }
 0x12e   : > { %1163 = vmatmul.msk.f32.vlgmr.msra.gmra.mxu0 %vm336_vm14, %v631_v48  ;;  %1165 = vmatmul.msk.f32.vlgmr.msra.gmra.mxu1 %vm336_vm14, %v631_v48 }
 0x131   : > { %v733_v50 = vpop.permute.xlu1 %732 }
 0x133   : > { %v731_v51 = vpop.permute.xlu0 %730  ;;  %v993_v53 = vpop.permute.xlu2 %992 }
 0x134   : > { %v735_v52 = vsel %vm734_vm4, %v729_v49, %v731_v51  ;;  %v736_v54 = vsel %vm734_vm4, %v731_v51, %v733_v50 }
 0x135   : > { %1168 = vmatpush.msk.msra.mxu2 %vm282_vm0, %v735_v52  ;;  %1170 = vmatpush.msk.msra.mxu3 %vm282_vm0, %v736_v54 }
 0x136   : > { %1169 = vmatmul.msk.f32.vlgmr.msra.gmra.mxu2 %vm336_vm14, %v1382_v12  ;;  %1171 = vmatmul.msk.f32.vlgmr.msra.gmra.mxu3 %vm336_vm14, %v1382_v12 }
 0x139   : > { %v821_v56 = vpop.permute.xlu1 %820 }
 0x13b   : > { %v819_v57 = vpop.permute.xlu0 %818 }
 0x13c   : > { %v823_v58 = vsel %vm822_vm5, %v817_v55, %v819_v57  ;;  %v824_v59 = vsel %vm822_vm5, %v819_v57, %v821_v56 }
 0x13d   : > { %1174 = vmatpush.msk.msrb.mxu0 %vm282_vm0, %v823_v58  ;;  %1176 = vmatpush.msk.msrb.mxu1 %vm282_vm0, %v824_v59 }
 0x13e   : > { %1175 = vmatmul.msk.f32.vlgmr.msrb.gmra.mxu0 %vm336_vm14, %v1385_v13  ;;  %1177 = vmatmul.msk.f32.vlgmr.msrb.gmra.mxu1 %vm336_vm14, %v1385_v13 }
 0x141   : > { %v909_v61 = vpop.permute.xlu1 %908 }
 0x143   : > { %v907_v62 = vpop.permute.xlu0 %906 }
 0x144   : > { %v911_v63 = vsel %vm910_vm6, %v905_v60, %v907_v62  ;;  %v912_v0 = vsel %vm910_vm6, %v907_v62, %v909_v61 }
 0x145   : > { %1180 = vmatpush.msk.msrb.mxu2 %vm282_vm0, %v911_v63  ;;  %1182 = vmatpush.msk.msrb.mxu3 %vm282_vm0, %v912_v0 }
 0x146   : > { %1181 = vmatmul.msk.f32.vlgmr.msrb.gmra.mxu2 %vm336_vm14, %v1388_v15  ;;  %1183 = vmatmul.msk.f32.vlgmr.msrb.gmra.mxu3 %vm336_vm14, %v1388_v15 }
 0x149   : > { %v997_v1 = vpop.permute.xlu1 %996 }
 0x14b   : > { %v995_v2 = vpop.permute.xlu0 %994 }
 0x14c   : > { %v999_v3 = vsel %vm998_vm7, %v993_v53, %v995_v2  ;;  %v1000_v4 = vsel %vm998_vm7, %v995_v2, %v997_v1 }
 0x14d   : > { %1186 = vmatpush.msk.msra.mxu0 %vm282_vm0, %v999_v3  ;;  %1188 = vmatpush.msk.msra.mxu1 %vm282_vm0, %v1000_v4 }
 0x14e   : > { %1187 = vmatmul.msk.f32.vlgmr.msra.gmra.mxu0 %vm336_vm14, %v1391_v16  ;;  %1189 = vmatmul.msk.f32.vlgmr.msra.gmra.mxu1 %vm336_vm14, %v1391_v16 }
 0x189   : > { %v381_v6 = vpop.f32.mrf.mxu1 }
 0x18a   : > { %v433_v14 = vadd.f32 %v432_v8, %v381_v6 }
 0x191   : > { %v361_v5 = vpop.f32.mrf.mxu0 }
 0x192   : > { %v413_v13 = vadd.f32 %v412_v7, %v361_v5 }
 0x19b   : > { %v498_v9 = vpop.f32.mrf.mxu0  ;;  %v518_v10 = vpop.f32.mrf.mxu1 }
 0x19c   : > { %v521_v18 = vadd.f32 %v498_v9, %v413_v13  ;;  %v522_v19 = vadd.f32 %v518_v10, %v433_v14 }
 0x1a9   : > { %v586_v11 = vpop.f32.mrf.mxu2  ;;  %v606_v12 = vpop.f32.mrf.mxu3 }
 0x1aa   : > { %v609_v20 = vadd.f32 %v586_v11, %v521_v18  ;;  %v610_v21 = vadd.f32 %v606_v12, %v522_v19 }
 0x1ab   : > { %v673_v15 = vpop.f32.mrf.mxu0  ;;  %v693_v17 = vpop.f32.mrf.mxu1 }
 0x1ac   : > { %v696_v16 = vadd.f32 %v673_v15, %v609_v20  ;;  %v697_v24 = vadd.f32 %v693_v17, %v610_v21 }
 0x1b9   : > { %v761_v22 = vpop.f32.mrf.mxu2  ;;  %v781_v23 = vpop.f32.mrf.mxu3 }
 0x1ba   : > { %v784_v27 = vadd.f32 %v761_v22, %v696_v16  ;;  %v785_v28 = vadd.f32 %v781_v23, %v697_v24 }
 0x1bb   : > { %v849_v25 = vpop.f32.mrf.mxu0  ;;  %v869_v26 = vpop.f32.mrf.mxu1 }
 0x1bc   : > { %v872_v29 = vadd.f32 %v849_v25, %v784_v27  ;;  %v873_v30 = vadd.f32 %v869_v26, %v785_v28 }
 0x1c9   : > { %v937_v31 = vpop.f32.mrf.mxu2  ;;  %v957_v32 = vpop.f32.mrf.mxu3 }
 0x1ca   : > { %v960_v33 = vadd.f32 %v937_v31, %v872_v29  ;;  %v961_v34 = vadd.f32 %v957_v32, %v873_v30 }
 0x1cb   : > { %v1025_v35 = vpop.f32.mrf.mxu0  ;;  %v1045_v36 = vpop.f32.mrf.mxu1 }
 0x1cc   : > { %v1048_v37 = vadd.f32 %v1025_v35, %v960_v33  ;;  %v1049_v38 = vadd.f32 %v1045_v36, %v961_v34 }
 0x1ce   : > { %1050 = vst [vmem:[%s255_s17] sm:$0xff] %v1048_v37 }
 0x1cf   : > { %1051 = vst [vmem:[%s255_s17 + $0x8] sm:$0xff] %v1049_v38 }
 0x1d0 PF: > { %s15_s18 = sadd.s32 1, %s1228_s18  }
 0x1d1   : > { %p12_p4 = scmp.ge.s32.totalorder %s15_s18, 4  }
 0x1d3   :  { %14 = sbr.rel (!%p12_p4) target bundleno = 1 (0x1), region = 100 }

// kernel: synthesis_block_forward.6
= control target key start
LH: loop header
LB: loop body
LE: loop exit
PB: predicated region body
PF: predicated region fallthrough
CT: control target
= control target key end

     0   :  { %s1624_s24 = smov 0   ;;  %s2013_s0 = inlined_call_operand.vmem [shape: f32[2,8,16,16], index: 0, kind: input, shape index: {}]   ;;  %s2014_s1 = inlined_call_operand.vmem [shape: f32[2,3,16,16], index: 1, kind: input, shape index: {}]   ;;  %s2015_s2 = inlined_call_operand.vmem [shape: f32[16,32], index: 2, kind: input, shape index: {}]   ;;  %s2016_s3 = inlined_call_operand.vmem [shape: f32[32,16], index: 3, kind: input, shape index: {}]   ;;  %s2017_s4 = inlined_call_operand.vmem [shape: f32[1,32,32], index: 4, kind: input, shape index: {}]   ;;  %s2018_s5 = inlined_call_operand.vmem [shape: f32[8,1,1], index: 5, kind: input, shape index: {}]   ;;  %s2019_s6 = inlined_call_operand.vmem [shape: f32[2,8,32,32], index: 6, kind: output, shape index: {0}]   ;;  %s2020_s7 = inlined_call_operand.vmem [shape: f32[2,3,32,32], index: 7, kind: output, shape index: {1}]  }
   0x1 LB: > { %s1438_s25 = sadd.s32 4294967295, %s1581_s24   ;;  %p1442_p0 = scmp.ge.s32.totalorder %s1581_s24, 1  ;;  %s1581_s24 = sphi %s1624_s24, %s18_s24  }
   0x2   : > { %p250_p1 = scmp.lt.s32.totalorder %s1581_s24, 3 }
   0x4   : > { %p251_p2 = pnand %p1442_p0, %p250_p1 }
   0x5   : > { %p292_p3 = scmp.lt.s32.totalorder (!%p251_p2), %s1438_s25, 1 }
   0x6   : > { %254 = sbr.rel (%p251_p2) target bundleno = 534 (0x216), region = 44 }
   0xb   : > { %v1635_v0 = vld [vmem:[%s2015_s2 + $0x8] sm:$0xff]  ;;  %v1640_v1 = vld [vmem:[%s2015_s2] sm:$0xff]  ;;  %s2022_s25 = smov (!%p292_p3, %s1438_s25), 1  ;;  %vm330_vm0 = vcmask 130048   ;;  %v1583_v16 = vmov 0   ;;  %v1728_v32 = vld [vmem:[%s2016_s3 + $0x10] sm:$0xff] }
   0xc   : > { %351 = vmatpush.msra.mxu2 %v1635_v0  ;;  %380 = vmatpush.msra.mxu0 %v1635_v0  ;;  %s1549_s30 = sshll.u32 %s2022_s25, 7  ;;  %v1567_v17 = vld [vmem:[%s2018_s5] ss:$0 sm:$0xff]  ;;  %v1713_v26 = vld [vmem:[%s2016_s3 + $0x8] sm:$0xff]  ;;  %v1568_v30 = vld [vmem:[%s2018_s5 + $0x1] ss:$0 sm:$0xff] }
   0xd   : > { %1551 = vmatpush.msra.mxu1 %v1635_v0  ;;  %438 = vmatpush.msra.mxu3 %v1635_v0  ;;  %s1656_s10 = scalar_lea.vmem %s2013_s0, %s1549_s30  ;;  %v1704_v21 = vld [vmem:[%s2016_s3] sm:$0xff]  ;;  %v1741_v34 = vld [vmem:[%s2016_s3 + $0x18] sm:$0xff]  ;;  %s1553_s8 = smul.u32 48, %s2022_s25  ;;  %v1817_v56 = vld [vmem:[%s2017_s4 + $0x8] sm:$0xff]  ;;  %vm1095_vm2 = vcmask 261120  }
   0xe   : > { %352 = vmatpush.msra.mxu2 %v1640_v1  ;;  %381 = vmatpush.msra.mxu0 %v1640_v1  ;;  %v312_v2 = vld [vmem:[%s1656_s10] sm:$0xff]  ;;  %v314_v3 = vld [vmem:[%s1656_s10 + $0x10] sm:$0xff]  ;;  %v315_v4 = vld [vmem:[%s1656_s10 + $0x18] sm:$0xff]  ;;  %s1550_s18 = sshll.u32 %s2022_s25, 8  ;;  %s1554_s9 = smul.u32 96, %s2022_s25 }
   0xf   : > { %1552 = vmatpush.msra.mxu1 %v1640_v1  ;;  %439 = vmatpush.msra.mxu3 %v1640_v1  ;;  %v313_v5 = vld [vmem:[%s1656_s10 + $0x8] sm:$0xff]  ;;  %v320_v6 = vld [vmem:[%s1656_s10 + $0x40] sm:$0xff]  ;;  %v322_v7 = vld [vmem:[%s1656_s10 + $0x50] sm:$0xff]  ;;  %s301_s11 = scalar_lea.vmem %s2014_s1, %s1553_s8  ;;  %s1824_s21 = scalar_lea.vmem %s2019_s6, %s1550_s18 }
  0x10   : > { %409 = vmatpush.msrb.mxu2 %v1635_v0  ;;  %467 = vmatpush.msrb.mxu0 %v1635_v0  ;;  %v316_v8 = vld [vmem:[%s1656_s10 + $0x20] sm:$0xff]  ;;  %v321_v9 = vld [vmem:[%s1656_s10 + $0x48] sm:$0xff]  ;;  %v323_v10 = vld [vmem:[%s1656_s10 + $0x58] sm:$0xff]  ;;  %s311_s12 = scalar_lea.vmem %s2020_s7, %s1554_s9 }
  0x11   : > { %496 = vmatpush.msrb.mxu1 %v1635_v0  ;;  %1449 = vmatmul.msk.f32.vlgmr.msra.gmra.mxu2 %vm330_vm0, %v312_v2  ;;  %v317_v11 = vld [vmem:[%s1656_s10 + $0x28] sm:$0xff]  ;;  %v324_v12 = vld [vmem:[%s1656_s10 + $0x60] sm:$0xff]  ;;  %v318_v14 = vld [vmem:[%s1656_s10 + $0x30] sm:$0xff] }
  0x12   : > { %410 = vmatpush.msrb.mxu2 %v1640_v1  ;;  %468 = vmatpush.msrb.mxu0 %v1640_v1  ;;  %v325_v13 = vld [vmem:[%s1656_s10 + $0x68] sm:$0xff]  ;;  %v319_v15 = vld [vmem:[%s1656_s10 + $0x38] sm:$0xff]  ;;  %v326_v20 = vld [vmem:[%s1656_s10 + $0x70] sm:$0xff] }
  0x13   : > { %1451 = vmatmul.msk.f32.vlgmr.msra.gmra.mxu0 %vm330_vm0, %v314_v3  ;;  %1452 = vmatmul.msk.f32.vlgmr.msra.gmra.mxu1 %vm330_vm0, %v315_v4  ;;  %v327_v23 = vld [vmem:[%s1656_s10 + $0x78] sm:$0xff]  ;;  %v1569_v31 = vld [vmem:[%s2018_s5 + $0x2] ss:$0 sm:$0xff]  ;;  %v1570_v38 = vld [vmem:[%s2018_s5 + $0x6] ss:$0 sm:$0xff] }
  0x14   : > { %525 = vmatpush.msra.mxu2 %v1635_v0  ;;  %497 = vmatpush.msrb.mxu1 %v1640_v1  ;;  %v1571_v39 = vld [vmem:[%s2018_s5 + $0x4] ss:$0 sm:$0xff]  ;;  %v1130_v40 = vld [vmem:[%s301_s11 + $0x10] sm:$0xff]  ;;  %v1572_v41 = vld [vmem:[%s2018_s5 + $0x5] ss:$0 sm:$0xff] }
  0x15   : > { %554 = vmatpush.msrb.mxu3 %v1635_v0  ;;  %1564 = vset.pattern.permute.xlu0 %v1583_v16  ;;  %v1131_v42 = vld [vmem:[%s301_s11 + $0x18] sm:$0xff]  ;;  %v1128_v43 = vld [vmem:[%s301_s11] sm:$0xff]  ;;  %v1129_v44 = vld [vmem:[%s301_s11 + $0x8] sm:$0xff] }
  0x16   : > { %526 = vmatpush.msra.mxu2 %v1640_v1  ;;  %1455 = vmatmul.msk.f32.vlgmr.msra.gmra.mxu3 %vm330_vm0, %v318_v14  ;;  %v1132_v45 = vld [vmem:[%s301_s11 + $0x20] sm:$0xff]  ;;  %v1133_v46 = vld [vmem:[%s301_s11 + $0x28] sm:$0xff] }
  0x17   : > { %555 = vmatpush.msrb.mxu3 %v1640_v1  ;;  %1565 = vset.pattern.permute.xlu1 %v1583_v16  ;;  %v1809_v50 = vld [vmem:[%s2017_s4] sm:$0xff] }
  0x18   : > { %1566 = vset.pattern.permute.xlu2 %v1583_v16  ;;  %840 = vperm.xlu0 %1564, %v1567_v17  }
  0x19   : > { %1450 = vmatmul.msk.f32.gmra.mxu2 %vm330_vm0, %v313_v5  ;;  %848 = vperm.xlu1 %1565, %v1569_v31   ;;  %v1835_v5 = vld [vmem:[%s2017_s4 + $0x10] sm:$0xff] }
  0x1a   : > { %856 = vperm.xlu2 %1566, %v1571_v39  }
  0x1b   : > { %1457 = vmatmul.msk.f32.vlgmr.msrb.gmra.mxu0 %vm330_vm0, %v320_v6  ;;  %1459 = vmatmul.msk.f32.vlgmr.msrb.gmra.mxu1 %vm330_vm0, %v322_v7 }
  0x1e   : > { %1456 = vmatmul.msk.f32.gmra.mxu3 %vm330_vm0, %v319_v15 }
  0x20   : > { %844 = vperm.xlu0 %1564, %v1568_v30  }
  0x21   : > { %1453 = vmatmul.msk.f32.vlgmr.msrb.gmra.mxu2 %vm330_vm0, %v316_v8 }
  0x22   : > { %860 = vperm.xlu2 %1566, %v1572_v41  }
  0x23   : > { %1458 = vmatmul.msk.f32.gmra.mxu0 %vm330_vm0, %v321_v9  ;;  %1460 = vmatmul.msk.f32.gmra.mxu1 %vm330_vm0, %v323_v10 }
  0x26   : > { %1463 = vmatmul.msk.f32.vlgmr.msrb.gmra.mxu3 %vm330_vm0, %v326_v20 }
  0x28   : > { %864 = vperm.xlu0 %1564, %v1570_v38  }
  0x29   : > { %1454 = vmatmul.msk.f32.gmra.mxu2 %vm330_vm0, %v317_v11 }
  0x2e   : > { %1464 = vmatmul.msk.f32.gmra.mxu3 %vm330_vm0, %v327_v23 }
  0x31   : > { %1461 = vmatmul.msk.f32.vlgmr.msra.gmra.mxu2 %vm330_vm0, %v324_v12 }
  0x39   : > { %1462 = vmatmul.msk.f32.gmra.mxu2 %vm330_vm0, %v325_v13 }
  0x8a   : > { %v1802_v48 = vpop.permute.xlu0 %840 }
  0x90   : > { %v383_v18 = vpop.f32.mrf.mxu0  ;;  %v386_v19 = vpop.f32.mrf.mxu1 }
  0x91   : > { %626 = vmatpush.msra.mxu1 %v386_v19 }
  0x92   : > { %v845_v53 = vpop.permute.xlu0 %844 }
  0x93   : > { %627 = vmatpush.msra.mxu1 %v383_v18 }
  0x94   : > { %1469 = vmatmul.msk.f32.vlgmr.msra.gmra.mxu1 %vm330_vm0, %v1704_v21  ;;  %v354_v22 = vpop.f32.mrf.mxu2 }
  0x98   : > { %v470_v24 = vpop.f32.mrf.mxu0  ;;  %v499_v25 = vpop.f32.mrf.mxu1 }
  0x99   : > { %v441_v47 = vpop.f32.mrf.mxu3 }
  0x9c   : > { %1470 = vmatmul.msk.f32.gmra.mxu1 %vm330_vm0, %v1713_v26  ;;  %v357_v27 = vpop.f32.mrf.mxu2 }
  0x9d   : > { %597 = vmatpush.msra.mxu0 %v357_v27  ;;  %v1854_v27 = vpop.permute.xlu2 %856 }
  0x9f   : > { %598 = vmatpush.msra.mxu0 %v354_v22  ;;  %v1847_v22 = vld [vmem:[%s2017_s4 + $0x18] sm:$0xff] }
  0xa0   : > { %v473_v28 = vpop.f32.mrf.mxu0  ;;  %v502_v29 = vpop.f32.mrf.mxu1  ;;  %1465 = vmatmul.msk.f32.vlgmr.msra.gmra.mxu0 %vm330_vm0, %v1704_v21 }
  0xa1   : > { %742 = vmatpush.msrb.mxu1 %v502_v29  ;;  %713 = vmatpush.msrb.mxu0 %v473_v28  ;;  %v444_v49 = vpop.f32.mrf.mxu3 }
  0xa2   : > { %684 = vmatpush.msra.mxu3 %v444_v49 }
  0xa3   : > { %743 = vmatpush.msrb.mxu1 %v499_v25  ;;  %714 = vmatpush.msrb.mxu0 %v470_v24  ;;  %v1573_v25 = vld [vmem:[%s2018_s5 + $0x3] ss:$0 sm:$0xff] }
  0xa4   : > { %1471 = vmatmul.msk.f32.gmra.mxu1 %vm330_vm0, %v1728_v32  ;;  %v412_v33 = vpop.f32.mrf.mxu2  ;;  %685 = vmatpush.msra.mxu3 %v441_v47 }
  0xa5   : > { %1156 = vmatpush.msra.mxu0 %v1635_v0  ;;  %1185 = vmatpush.msra.mxu1 %v1635_v0 }
  0xa6   : > { %1477 = vmatmul.msk.f32.vlgmr.msra.gmra.mxu3 %vm330_vm0, %v1704_v21  ;;  %852 = vperm.xlu1 %1565, %v1573_v25  }
  0xa7   : > { %1157 = vmatpush.msra.mxu0 %v1640_v1  ;;  %1186 = vmatpush.msra.mxu1 %v1640_v1 }
  0xa8   : > { %1466 = vmatmul.msk.f32.gmra.mxu0 %vm330_vm0, %v1713_v26 }
  0xa9   : > { %v557_v61 = vpop.f32.mrf.mxu3 }
  0xac   : > { %1472 = vmatmul.msk.f32.gmra.mxu1 %vm330_vm0, %v1741_v34  ;;  %v415_v35 = vpop.f32.mrf.mxu2 }
  0xad   : > { %655 = vmatpush.msrb.mxu2 %v415_v35 }
  0xae   : > { %1478 = vmatmul.msk.f32.gmra.mxu3 %vm330_vm0, %v1713_v26 }
  0xaf   : > { %656 = vmatpush.msrb.mxu2 %v412_v33 }
  0xb0   : > { %1467 = vmatmul.msk.f32.gmra.mxu0 %vm330_vm0, %v1728_v32  ;;  %1473 = vmatmul.msk.f32.vlgmr.msrb.gmra.mxu2 %vm330_vm0, %v1704_v21 }
  0xb1   : > { %v560_v9 = vpop.f32.mrf.mxu3 }
  0xb2   : > { %800 = vmatpush.msrb.mxu3 %v560_v9 }
  0xb4   : > { %1485 = vmatmul.msk.f32.vlgmr.msrb.gmra.mxu1 %vm330_vm0, %v1704_v21  ;;  %v528_v36 = vpop.f32.mrf.mxu2  ;;  %801 = vmatpush.msrb.mxu3 %v557_v61 }
  0xb6   : > { %1479 = vmatmul.msk.f32.gmra.mxu3 %vm330_vm0, %v1728_v32 }
  0xb8   : > { %1468 = vmatmul.msk.f32.gmra.mxu0 %vm330_vm0, %v1741_v34  ;;  %1474 = vmatmul.msk.f32.gmra.mxu2 %vm330_vm0, %v1713_v26 }
  0xbc   : > { %1486 = vmatmul.msk.f32.gmra.mxu1 %vm330_vm0, %v1713_v26  ;;  %v531_v37 = vpop.f32.mrf.mxu2 }
  0xbd   : > { %771 = vmatpush.msra.mxu2 %v531_v37 }
  0xbe   : > { %1480 = vmatmul.msk.f32.gmra.mxu3 %vm330_vm0, %v1741_v34 }
  0xbf   : > { %772 = vmatpush.msra.mxu2 %v528_v36 }
  0xc0   : > { %1475 = vmatmul.msk.f32.gmra.mxu2 %vm330_vm0, %v1728_v32  ;;  %1481 = vmatmul.msk.f32.vlgmr.msrb.gmra.mxu0 %vm330_vm0, %v1704_v21 }
  0xc1   : > { %1214 = vmatpush.msrb.mxu2 %v1635_v0 }
  0xc3   : > { %1215 = vmatpush.msrb.mxu2 %v1640_v1 }
  0xc4   : > { %1487 = vmatmul.msk.f32.gmra.mxu1 %vm330_vm0, %v1728_v32 }
  0xc6   : > { %1493 = vmatmul.msk.f32.vlgmr.msrb.gmra.mxu3 %vm330_vm0, %v1704_v21 }
  0xc8   : > { %1476 = vmatmul.msk.f32.gmra.mxu2 %vm330_vm0, %v1741_v34  ;;  %1482 = vmatmul.msk.f32.gmra.mxu0 %vm330_vm0, %v1713_v26 }
  0xcc   : > { %1488 = vmatmul.msk.f32.gmra.mxu1 %vm330_vm0, %v1741_v34 }
  0xce   : > { %1494 = vmatmul.msk.f32.gmra.mxu3 %vm330_vm0, %v1713_v26 }
  0xd0   : > { %1483 = vmatmul.msk.f32.gmra.mxu0 %vm330_vm0, %v1728_v32  ;;  %1489 = vmatmul.msk.f32.vlgmr.msra.gmra.mxu2 %vm330_vm0, %v1704_v21 }
  0xd4   : > { %1531 = vmatmul.msk.f32.vlgmr.msra.gmra.mxu1 %vm330_vm0, %v1130_v40 }
  0xd6   : > { %1495 = vmatmul.msk.f32.gmra.mxu3 %vm330_vm0, %v1728_v32 }
  0xd8   : > { %1484 = vmatmul.msk.f32.gmra.mxu0 %vm330_vm0, %v1741_v34  ;;  %1490 = vmatmul.msk.f32.gmra.mxu2 %vm330_vm0, %v1713_v26 }
  0xdc   : > { %1532 = vmatmul.msk.f32.gmra.mxu1 %vm330_vm0, %v1131_v42 }
  0xde   : > { %1496 = vmatmul.msk.f32.gmra.mxu3 %vm330_vm0, %v1741_v34 }
  0xe0   : > { %1491 = vmatmul.msk.f32.gmra.mxu2 %vm330_vm0, %v1728_v32  ;;  %1529 = vmatmul.msk.f32.vlgmr.msra.gmra.mxu0 %vm330_vm0, %v1128_v43 }
  0xe8   : > { %1492 = vmatmul.msk.f32.gmra.mxu2 %vm330_vm0, %v1741_v34  ;;  %1530 = vmatmul.msk.f32.gmra.mxu0 %vm330_vm0, %v1129_v44 }
  0xf0   : > { %1533 = vmatmul.msk.f32.vlgmr.msrb.gmra.mxu2 %vm330_vm0, %v1132_v45 }
  0xf8   : > { %1534 = vmatmul.msk.f32.gmra.mxu2 %vm330_vm0, %v1133_v46  ;;  %v1866_v46 = vpop.permute.xlu1 %848 }
 0x111   : > { %v629_v51 = vpop.f32.mrf.mxu1 }
 0x112   : > { %v630_v52 = vadd.f32 %v629_v51, %v1809_v50  ;;  %v1868_v51 = vpop.permute.xlu2 %860 }
 0x114   : > { %v875_v54 = vadd.f32 %v845_v53, %v630_v52 }
 0x116   : > { %v939_v55 = vmul.f32 0.2, %v875_v54  ;;  %vm907_vm1 = vcmp.ge.f32.partialorder %v875_v54, 0.0 }
 0x118   : > { %v971_v58 = vsel %vm907_vm1, %v875_v54, %v939_v55 }
 0x119   : > { %v632_v57 = vpop.f32.mrf.mxu1  ;;  %v1003_v60 = vmul.f32 1.4142135, %v971_v58 }
 0x11a   : > { %v633_v59 = vadd.f32 %v632_v57, %v1817_v56 }
 0x11b   : > { %v1501_v63 = vclamps-f32 %v1003_v60, 256.0 }
 0x11c   : > { %v876_v62 = vadd.f32 %v845_v53, %v633_v59 }
 0x11d   : > { %v600_v0 = vpop.f32.mrf.mxu0  ;;  %1100 = vst.msk [vmem:[%s1824_s21 + $0x20] sm:$0xff] %vm1095_vm2, %v1501_v63 }
 0x11e   : > { %vm908_vm3 = vcmp.ge.f32.partialorder %v876_v62, 0.0  ;;  %v940_v1 = vmul.f32 0.2, %v876_v62  ;;  %v601_v2 = vadd.f32 %v600_v0, %v1809_v50 }
 0x120   : > { %v972_v3 = vsel %vm908_vm3, %v876_v62, %v940_v1  ;;  %v871_v4 = vadd.f32 %v1802_v48, %v601_v2 }
 0x121   : > { %v1004_v6 = vmul.f32 1.4142135, %v972_v3  ;;  %v635_v7 = vpop.f32.mrf.mxu1 }
 0x122   : > { %v636_v8 = vadd.f32 %v635_v7, %v1835_v5  ;;  %vm903_vm4 = vcmp.ge.f32.partialorder %v871_v4, 0.0  ;;  %v935_v10 = vmul.f32 0.2, %v871_v4 }
 0x123   : > { %v1502_v11 = vclamps-f32 %v1004_v6, 256.0 }
 0x124   : > { %v877_v12 = vadd.f32 %v845_v53, %v636_v8  ;;  %v967_v13 = vsel %vm903_vm4, %v871_v4, %v935_v10 }
 0x125   : > { %1101 = vst.msk [vmem:[%s1824_s21 + $0x28] sm:$0xff] %vm1095_vm2, %v1502_v11  ;;  %v999_v14 = vmul.f32 1.4142135, %v967_v13  ;;  %v603_v15 = vpop.f32.mrf.mxu0 }
 0x126   : > { %vm909_vm5 = vcmp.ge.f32.partialorder %v877_v12, 0.0  ;;  %v941_v16 = vmul.f32 0.2, %v877_v12  ;;  %v604_v17 = vadd.f32 %v603_v15, %v1817_v56 }
 0x127   : > { %v1497_v18 = vclamps-f32 %v999_v14, 256.0 }
 0x128   : > { %v973_v19 = vsel %vm909_vm5, %v877_v12, %v941_v16  ;;  %v872_v20 = vadd.f32 %v1802_v48, %v604_v17 }
 0x129   : > { %v1005_v23 = vmul.f32 1.4142135, %v973_v19  ;;  %v638_v24 = vpop.f32.mrf.mxu1  ;;  %1096 = vst.msk [vmem:[%s1824_s21] sm:$0xff] %vm1095_vm2, %v1497_v18 }
 0x12a   : > { %v639_v28 = vadd.f32 %v638_v24, %v1847_v22  ;;  %vm904_vm6 = vcmp.ge.f32.partialorder %v872_v20, 0.0  ;;  %v936_v29 = vmul.f32 0.2, %v872_v20 }
 0x12b   : > { %v1503_v30 = vclamps-f32 %v1005_v23, 256.0 }
 0x12c   : > { %v878_v31 = vadd.f32 %v845_v53, %v639_v28  ;;  %v968_v33 = vsel %vm904_vm6, %v872_v20, %v936_v29 }
 0x12d   : > { %1102 = vst.msk [vmem:[%s1824_s21 + $0x30] sm:$0xff] %vm1095_vm2, %v1503_v30  ;;  %v1000_v35 = vmul.f32 1.4142135, %v968_v33  ;;  %v606_v36 = vpop.f32.mrf.mxu0 }
 0x12e   : > { %vm910_vm7 = vcmp.ge.f32.partialorder %v878_v31, 0.0  ;;  %v942_v37 = vmul.f32 0.2, %v878_v31  ;;  %v607_v38 = vadd.f32 %v606_v36, %v1835_v5 }
 0x12f   : > { %v1498_v39 = vclamps-f32 %v1000_v35, 256.0 }
 0x130   : > { %v974_v40 = vsel %vm910_vm7, %v878_v31, %v942_v37  ;;  %v873_v41 = vadd.f32 %v1802_v48, %v607_v38 }
 0x131   : > { %v1006_v42 = vmul.f32 1.4142135, %v974_v40  ;;  %v745_v43 = vpop.f32.mrf.mxu1  ;;  %1097 = vst.msk [vmem:[%s1824_s21 + $0x8] sm:$0xff] %vm1095_vm2, %v1498_v39 }
 0x132   : > { %v746_v44 = vadd.f32 %v745_v43, %v1809_v50  ;;  %vm905_vm8 = vcmp.ge.f32.partialorder %v873_v41, 0.0  ;;  %v937_v45 = vmul.f32 0.2, %v873_v41 }
 0x133   : > { %v1504_v47 = vclamps-f32 %v1006_v42, 256.0  ;;  %v658_v49 = vpop.f32.mrf.mxu2 }
 0x134   : > { %v969_v52 = vsel %vm905_vm8, %v873_v41, %v937_v45  ;;  %v659_v53 = vadd.f32 %v658_v49, %v1809_v50  ;;  %v891_v54 = vadd.f32 %v1868_v51, %v746_v44 }
 0x135   : > { %1103 = vst.msk [vmem:[%s1824_s21 + $0x38] sm:$0xff] %vm1095_vm2, %v1504_v47  ;;  %v1001_v55 = vmul.f32 1.4142135, %v969_v52  ;;  %v609_v57 = vpop.f32.mrf.mxu0 }
 0x136   : > { %v879_v58 = vadd.f32 %v1866_v46, %v659_v53  ;;  %v610_v59 = vadd.f32 %v609_v57, %v1847_v22  ;;  %v955_v60 = vmul.f32 0.2, %v891_v54  ;;  %vm923_vm9 = vcmp.ge.f32.partialorder %v891_v54, 0.0  ;;  %v1574_v57 = vld [vmem:[%s2018_s5 + $0x7] ss:$0 sm:$0xff] }
 0x137   : > { %v1499_v61 = vclamps-f32 %v1001_v55, 256.0  ;;  %868 = vperm.xlu1 %1565, %v1574_v57  }
 0x138   : > { %vm911_vm10 = vcmp.ge.f32.partialorder %v879_v58, 0.0  ;;  %v943_v62 = vmul.f32 0.2, %v879_v58  ;;  %v874_v63 = vadd.f32 %v1802_v48, %v610_v59  ;;  %v987_v1 = vsel %vm923_vm9, %v891_v54, %v955_v60 }
 0x139   : > { %v748_v0 = vpop.f32.mrf.mxu1  ;;  %1098 = vst.msk [vmem:[%s1824_s21 + $0x10] sm:$0xff] %vm1095_vm2, %v1499_v61  ;;  %v1019_v3 = vmul.f32 1.4142135, %v987_v1 }
 0x13a   : > { %v749_v2 = vadd.f32 %v748_v0, %v1817_v56  ;;  %v975_v4 = vsel %vm911_vm10, %v879_v58, %v943_v62  ;;  %vm906_vm11 = vcmp.ge.f32.partialorder %v874_v63, 0.0  ;;  %v938_v6 = vmul.f32 0.2, %v874_v63 }
 0x13b   : > { %v1007_v7 = vmul.f32 1.4142135, %v975_v4  ;;  %v661_v8 = vpop.f32.mrf.mxu2  ;;  %v1517_v10 = vclamps-f32 %v1019_v3, 256.0 }
 0x13c   : > { %v892_v9 = vadd.f32 %v1868_v51, %v749_v2  ;;  %v970_v11 = vsel %vm906_vm11, %v874_v63, %v938_v6  ;;  %v662_v48 = vadd.f32 %v661_v8, %v1817_v56 }
 0x13d   : > { %v1505_v12 = vclamps-f32 %v1007_v7, 256.0  ;;  %v1002_v13 = vmul.f32 1.4142135, %v970_v11  ;;  %v716_v14 = vpop.f32.mrf.mxu0  ;;  %1116 = vst.msk [vmem:[%s1824_s21 + $0xa0] sm:$0xff] %vm1095_vm2, %v1517_v10 }
 0x13e   : > { %vm924_vm12 = vcmp.ge.f32.partialorder %v892_v9, 0.0  ;;  %v956_v15 = vmul.f32 0.2, %v892_v9  ;;  %v880_v16 = vadd.f32 %v1866_v46, %v662_v48  ;;  %v717_v17 = vadd.f32 %v716_v14, %v1809_v50 }
 0x13f   : > { %1104 = vst.msk [vmem:[%s1824_s21 + $0x40] sm:$0xff] %vm1095_vm2, %v1505_v12  ;;  %v1500_v18 = vclamps-f32 %v1002_v13, 256.0 }
 0x140   : > { %v988_v19 = vsel %vm924_vm12, %v892_v9, %v956_v15  ;;  %vm912_vm13 = vcmp.ge.f32.partialorder %v880_v16, 0.0  ;;  %v944_v20 = vmul.f32 0.2, %v880_v16  ;;  %v887_v23 = vadd.f32 %v1854_v27, %v717_v17  ;;  %v865_v17 = vpop.permute.xlu0 %864 }
 0x141   : > { %v1020_v24 = vmul.f32 1.4142135, %v988_v19  ;;  %v751_v25 = vpop.f32.mrf.mxu1  ;;  %1099 = vst.msk [vmem:[%s1824_s21 + $0x18] sm:$0xff] %vm1095_vm2, %v1500_v18 }
 0x142   : > { %v752_v28 = vadd.f32 %v751_v25, %v1835_v5  ;;  %v976_v29 = vsel %vm912_vm13, %v880_v16, %v944_v20  ;;  %vm919_vm14 = vcmp.ge.f32.partialorder %v887_v23, 0.0  ;;  %v951_v30 = vmul.f32 0.2, %v887_v23 }
 0x143   : > { %v1518_v31 = vclamps-f32 %v1020_v24, 256.0  ;;  %v1008_v33 = vmul.f32 1.4142135, %v976_v29  ;;  %v664_v35 = vpop.f32.mrf.mxu2 }
 0x144   : > { %v893_v36 = vadd.f32 %v1868_v51, %v752_v28  ;;  %v983_v37 = vsel %vm919_vm14, %v887_v23, %v951_v30  ;;  %v665_v38 = vadd.f32 %v664_v35, %v1835_v5 }
 0x145   : > { %1117 = vst.msk [vmem:[%s1824_s21 + $0xa8] sm:$0xff] %vm1095_vm2, %v1518_v31  ;;  %v1506_v39 = vclamps-f32 %v1008_v33, 256.0  ;;  %v1015_v40 = vmul.f32 1.4142135, %v983_v37  ;;  %v719_v41 = vpop.f32.mrf.mxu0 }
 0x146   : > { %vm925_vm15 = vcmp.ge.f32.partialorder %v893_v36, 0.0  ;;  %v957_v42 = vmul.f32 0.2, %v893_v36  ;;  %v881_v43 = vadd.f32 %v1866_v46, %v665_v38  ;;  %v720_v44 = vadd.f32 %v719_v41, %v1817_v56 }
 0x147   : > { %1105 = vst.msk [vmem:[%s1824_s21 + $0x48] sm:$0xff] %vm1095_vm2, %v1506_v39  ;;  %v1513_v45 = vclamps-f32 %v1015_v40, 256.0 }
 0x148   : > { %v989_v47 = vsel %vm925_vm15, %v893_v36, %v957_v42  ;;  %vm913_vm1 = vcmp.ge.f32.partialorder %v881_v43, 0.0  ;;  %v945_v49 = vmul.f32 0.2, %v881_v43  ;;  %v888_v52 = vadd.f32 %v1854_v27, %v720_v44 }
 0x149   : > { %v1021_v53 = vmul.f32 1.4142135, %v989_v47  ;;  %v754_v54 = vpop.f32.mrf.mxu1  ;;  %1112 = vst.msk [vmem:[%s1824_s21 + $0x80] sm:$0xff] %vm1095_vm2, %v1513_v45 }
 0x14a   : > { %v755_v55 = vadd.f32 %v754_v54, %v1847_v22  ;;  %v977_v58 = vsel %vm913_vm1, %v881_v43, %v945_v49  ;;  %vm920_vm3 = vcmp.ge.f32.partialorder %v888_v52, 0.0  ;;  %v952_v59 = vmul.f32 0.2, %v888_v52 }
 0x14b   : > { %v1519_v60 = vclamps-f32 %v1021_v53, 256.0  ;;  %v1009_v61 = vmul.f32 1.4142135, %v977_v58  ;;  %v667_v62 = vpop.f32.mrf.mxu2 }
 0x14c   : > { %v894_v63 = vadd.f32 %v1868_v51, %v755_v55  ;;  %v984_v0 = vsel %vm920_vm3, %v888_v52, %v952_v59  ;;  %v668_v1 = vadd.f32 %v667_v62, %v1847_v22 }
 0x14d   : > { %1118 = vst.msk [vmem:[%s1824_s21 + $0xb0] sm:$0xff] %vm1095_vm2, %v1519_v60  ;;  %v1507_v2 = vclamps-f32 %v1009_v61, 256.0  ;;  %v1016_v3 = vmul.f32 1.4142135, %v984_v0  ;;  %v722_v4 = vpop.f32.mrf.mxu0 }
 0x14e   : > { %vm926_vm4 = vcmp.ge.f32.partialorder %v894_v63, 0.0  ;;  %v958_v6 = vmul.f32 0.2, %v894_v63  ;;  %v882_v7 = vadd.f32 %v1866_v46, %v668_v1  ;;  %v723_v8 = vadd.f32 %v722_v4, %v1835_v5 }
 0x14f   : > { %1106 = vst.msk [vmem:[%s1824_s21 + $0x50] sm:$0xff] %vm1095_vm2, %v1507_v2  ;;  %v1514_v9 = vclamps-f32 %v1016_v3, 256.0 }
 0x150   : > { %v990_v51 = vsel %vm926_vm4, %v894_v63, %v958_v6  ;;  %vm914_vm5 = vcmp.ge.f32.partialorder %v882_v7, 0.0  ;;  %v946_v10 = vmul.f32 0.2, %v882_v7  ;;  %v889_v11 = vadd.f32 %v1854_v27, %v723_v8  ;;  %v687_v8 = vpop.f32.mrf.mxu3 }
 0x151   : > { %v1022_v48 = vmul.f32 1.4142135, %v990_v51  ;;  %v1188_v12 = vpop.f32.mrf.mxu1  ;;  %1113 = vst.msk [vmem:[%s1824_s21 + $0x88] sm:$0xff] %vm1095_vm2, %v1514_v9  ;;  %v688_v9 = vadd.f32 %v687_v8, %v1809_v50 }
 0x152   : > { %v978_v13 = vsel %vm914_vm5, %v882_v7, %v946_v10  ;;  %vm921_vm6 = vcmp.ge.f32.partialorder %v889_v11, 0.0  ;;  %v953_v14 = vmul.f32 0.2, %v889_v11 }
 0x153   : > { %v1520_v46 = vclamps-f32 %v1022_v48, 256.0  ;;  %v1010_v15 = vmul.f32 1.4142135, %v978_v13  ;;  %v774_v16 = vpop.f32.mrf.mxu2 }
 0x154   : > { %v985_v18 = vsel %vm921_vm6, %v889_v11, %v953_v14  ;;  %v775_v19 = vadd.f32 %v774_v16, %v1809_v50  ;;  %v853_v11 = vpop.permute.xlu1 %852 }
 0x155   : > { %1119 = vst.msk [vmem:[%s1824_s21 + $0xb8] sm:$0xff] %vm1095_vm2, %v1520_v46  ;;  %v1508_v20 = vclamps-f32 %v1010_v15, 256.0  ;;  %v1017_v23 = vmul.f32 1.4142135, %v985_v18  ;;  %v725_v24 = vpop.f32.mrf.mxu0 }
 0x156   : > { %v895_v25 = vadd.f32 %v865_v17, %v775_v19  ;;  %v726_v28 = vadd.f32 %v725_v24, %v1847_v22 }
 0x157   : > { %1107 = vst.msk [vmem:[%s1824_s21 + $0x58] sm:$0xff] %vm1095_vm2, %v1508_v20  ;;  %v1515_v29 = vclamps-f32 %v1017_v23, 256.0 }
 0x158   : > { %vm927_vm7 = vcmp.ge.f32.partialorder %v895_v25, 0.0  ;;  %v959_v30 = vmul.f32 0.2, %v895_v25  ;;  %v890_v31 = vadd.f32 %v1854_v27, %v726_v28  ;;  %v690_v51 = vpop.f32.mrf.mxu3 }
 0x159   : > { %v1191_v33 = vpop.f32.mrf.mxu1  ;;  %1114 = vst.msk [vmem:[%s1824_s21 + $0x90] sm:$0xff] %vm1095_vm2, %v1515_v29  ;;  %v691_v10 = vadd.f32 %v690_v51, %v1817_v56 }
 0x15a   : > { %1282 = vmatpush.msrb.mxu0 %v1191_v33  ;;  %v991_v35 = vsel %vm927_vm7, %v895_v25, %v959_v30  ;;  %vm922_vm8 = vcmp.ge.f32.partialorder %v890_v31, 0.0  ;;  %v954_v36 = vmul.f32 0.2, %v890_v31 }
 0x15b   : > { %v1023_v37 = vmul.f32 1.4142135, %v991_v35  ;;  %v777_v38 = vpop.f32.mrf.mxu2  ;;  %v884_v48 = vadd.f32 %v853_v11, %v691_v10 }
 0x15c   : > { %1283 = vmatpush.msrb.mxu0 %v1188_v12  ;;  %v986_v39 = vsel %vm922_vm8, %v890_v31, %v954_v36  ;;  %v778_v40 = vadd.f32 %v777_v38, %v1817_v56 }
 0x15d   : > { %1539 = vmatmul.msk.f32.vlgmr.msrb.gmra.mxu0 %vm330_vm0, %v1704_v21  ;;  %v1521_v41 = vclamps-f32 %v1023_v37, 256.0  ;;  %v1018_v27 = vmul.f32 1.4142135, %v986_v39  ;;  %v1159_v42 = vpop.f32.mrf.mxu0  ;;  %vm916_vm13 = vcmp.ge.f32.partialorder %v884_v48, 0.0 }
 0x15e   : > { %v896_v43 = vadd.f32 %v865_v17, %v778_v40 }
 0x15f   : > { %1120 = vst.msk [vmem:[%s1824_s21 + $0xc0] sm:$0xff] %vm1095_vm2, %v1521_v41  ;;  %v1516_v44 = vclamps-f32 %v1018_v27, 256.0 }
 0x160   : > { %vm928_vm9 = vcmp.ge.f32.partialorder %v896_v43, 0.0  ;;  %v960_v45 = vmul.f32 0.2, %v896_v43 }
 0x161   : > { %1115 = vst.msk [vmem:[%s1824_s21 + $0x98] sm:$0xff] %vm1095_vm2, %v1516_v44 }
 0x162   : > { %v992_v47 = vsel %vm928_vm9, %v896_v43, %v960_v45 }
 0x163   : > { %v1024_v49 = vmul.f32 1.4142135, %v992_v47  ;;  %v780_v52 = vpop.f32.mrf.mxu2 }
 0x164   : > { %v781_v53 = vadd.f32 %v780_v52, %v1835_v5 }
 0x165   : > { %1540 = vmatmul.msk.f32.gmra.mxu0 %vm330_vm0, %v1713_v26  ;;  %v1522_v54 = vclamps-f32 %v1024_v49, 256.0  ;;  %v1162_v55 = vpop.f32.mrf.mxu0 }
 0x166   : > { %v897_v57 = vadd.f32 %v865_v17, %v781_v53  ;;  %1253 = vmatpush.msra.mxu3 %v1162_v55 }
 0x167   : > { %1121 = vst.msk [vmem:[%s1824_s21 + $0xc8] sm:$0xff] %vm1095_vm2, %v1522_v54 }
 0x168   : > { %vm929_vm10 = vcmp.ge.f32.partialorder %v897_v57, 0.0  ;;  %v961_v58 = vmul.f32 0.2, %v897_v57  ;;  %1254 = vmatpush.msra.mxu3 %v1159_v42 }
 0x169   : > { %1535 = vmatmul.msk.f32.vlgmr.msra.gmra.mxu3 %vm330_vm0, %v1704_v21 }
 0x16a   : > { %v993_v59 = vsel %vm929_vm10, %v897_v57, %v961_v58 }
 0x16b   : > { %v1025_v60 = vmul.f32 1.4142135, %v993_v59  ;;  %v783_v61 = vpop.f32.mrf.mxu2 }
 0x16c   : > { %v784_v62 = vadd.f32 %v783_v61, %v1847_v22 }
 0x16d   : > { %1541 = vmatmul.msk.f32.gmra.mxu0 %vm330_vm0, %v1728_v32  ;;  %v1523_v63 = vclamps-f32 %v1025_v60, 256.0 }
 0x16e   : > { %v898_v0 = vadd.f32 %v865_v17, %v784_v62 }
 0x16f   : > { %1122 = vst.msk [vmem:[%s1824_s21 + $0xd0] sm:$0xff] %vm1095_vm2, %v1523_v63 }
 0x170   : > { %vm930_vm11 = vcmp.ge.f32.partialorder %v898_v0, 0.0  ;;  %v962_v1 = vmul.f32 0.2, %v898_v0 }
 0x171   : > { %1536 = vmatmul.msk.f32.gmra.mxu3 %vm330_vm0, %v1713_v26 }
 0x172   : > { %v994_v2 = vsel %vm930_vm11, %v898_v0, %v962_v1 }
 0x173   : > { %v1026_v3 = vmul.f32 1.4142135, %v994_v2  ;;  %v1217_v4 = vpop.f32.mrf.mxu2 }
 0x175   : > { %1542 = vmatmul.msk.f32.gmra.mxu0 %vm330_vm0, %v1741_v34  ;;  %v1524_v6 = vclamps-f32 %v1026_v3, 256.0 }
 0x177   : > { %1123 = vst.msk [vmem:[%s1824_s21 + $0xd8] sm:$0xff] %vm1095_vm2, %v1524_v6 }
 0x179   : > { %1537 = vmatmul.msk.f32.gmra.mxu3 %vm330_vm0, %v1728_v32 }
 0x17b   : > { %v1220_v7 = vpop.f32.mrf.mxu2 }
 0x17c   : > { %1311 = vmatpush.msrb.mxu1 %v1220_v7 }
 0x17e   : > { %1312 = vmatpush.msrb.mxu1 %v1217_v4 }
 0x17f   : > { %1543 = vmatmul.msk.f32.vlgmr.msrb.gmra.mxu1 %vm330_vm0, %v1704_v21  ;;  %v883_v21 = vadd.f32 %v853_v11, %v688_v9 }
 0x181   : > { %1538 = vmatmul.msk.f32.gmra.mxu3 %vm330_vm0, %v1741_v34  ;;  %vm915_vm12 = vcmp.ge.f32.partialorder %v883_v21, 0.0  ;;  %v947_v12 = vmul.f32 0.2, %v883_v21 }
 0x183   : > { %v979_v13 = vsel %vm915_vm12, %v883_v21, %v947_v12 }
 0x184   : > { %v1011_v14 = vmul.f32 1.4142135, %v979_v13 }
 0x186   : > { %v1509_v16 = vclamps-f32 %v1011_v14, 256.0 }
 0x187   : > { %1544 = vmatmul.msk.f32.gmra.mxu1 %vm330_vm0, %v1713_v26  ;;  %v948_v26 = vmul.f32 0.2, %v884_v48 }
 0x188   : > { %1108 = vst.msk [vmem:[%s1824_s21 + $0x60] sm:$0xff] %vm1095_vm2, %v1509_v16 }
 0x18f   : > { %1545 = vmatmul.msk.f32.gmra.mxu1 %vm330_vm0, %v1728_v32  ;;  %v980_v32 = vsel %vm916_vm13, %v884_v48, %v948_v26 }
 0x190   : > { %v1012_v46 = vmul.f32 1.4142135, %v980_v32 }
 0x192   : > { %v1510_v17 = vclamps-f32 %v1012_v46, 256.0 }
 0x194   : > { %1109 = vst.msk [vmem:[%s1824_s21 + $0x68] sm:$0xff] %vm1095_vm2, %v1510_v17 }
 0x197   : > { %1546 = vmatmul.msk.f32.gmra.mxu1 %vm330_vm0, %v1741_v34  ;;  %v693_v34 = vpop.f32.mrf.mxu3 }
 0x198   : > { %v694_v15 = vadd.f32 %v693_v34, %v1835_v5 }
 0x19a   : > { %v885_v18 = vadd.f32 %v853_v11, %v694_v15 }
 0x19c   : > { %vm917_vm0 = vcmp.ge.f32.partialorder %v885_v18, 0.0  ;;  %v949_v19 = vmul.f32 0.2, %v885_v18 }
 0x19e   : > { %v981_v20 = vsel %vm917_vm0, %v885_v18, %v949_v19 }
 0x19f   : > { %v1013_v23 = vmul.f32 1.4142135, %v981_v20  ;;  %v696_v24 = vpop.f32.mrf.mxu3 }
 0x1a0   : > { %v697_v25 = vadd.f32 %v696_v24, %v1847_v22 }
 0x1a1   : > { %v1511_v28 = vclamps-f32 %v1013_v23, 256.0 }
 0x1a2   : > { %v886_v29 = vadd.f32 %v853_v11, %v697_v25 }
 0x1a3   : > { %1110 = vst.msk [vmem:[%s1824_s21 + $0x70] sm:$0xff] %vm1095_vm2, %v1511_v28 }
 0x1a4   : > { %vm918_vm14 = vcmp.ge.f32.partialorder %v886_v29, 0.0  ;;  %v950_v30 = vmul.f32 0.2, %v886_v29 }
 0x1a6   : > { %v982_v31 = vsel %vm918_vm14, %v886_v29, %v950_v30 }
 0x1a7   : > { %v1014_v33 = vmul.f32 1.4142135, %v982_v31  ;;  %v803_v35 = vpop.f32.mrf.mxu3 }
 0x1a8   : > { %v804_v37 = vadd.f32 %v803_v35, %v1809_v50 }
 0x1a9   : > { %v1512_v36 = vclamps-f32 %v1014_v33, 256.0  ;;  %v869_v40 = vpop.permute.xlu1 %868 }
 0x1aa   : > { %v899_v41 = vadd.f32 %v869_v40, %v804_v37 }
 0x1ab   : > { %1111 = vst.msk [vmem:[%s1824_s21 + $0x78] sm:$0xff] %vm1095_vm2, %v1512_v36 }
 0x1ac   : > { %vm931_vm15 = vcmp.ge.f32.partialorder %v899_v41, 0.0  ;;  %v963_v42 = vmul.f32 0.2, %v899_v41 }
 0x1ae   : > { %v995_v44 = vsel %vm931_vm15, %v899_v41, %v963_v42 }
 0x1af   : > { %v806_v38 = vpop.f32.mrf.mxu3  ;;  %v1027_v49 = vmul.f32 1.4142135, %v995_v44 }
 0x1b0   : > { %v807_v39 = vadd.f32 %v806_v38, %v1817_v56 }
 0x1b1   : > { %v1525_v53 = vclamps-f32 %v1027_v49, 256.0 }
 0x1b2   : > { %v900_v27 = vadd.f32 %v869_v40, %v807_v39 }
 0x1b3   : > { %1124 = vst.msk [vmem:[%s1824_s21 + $0xe0] sm:$0xff] %vm1095_vm2, %v1525_v53 }
 0x1b4   : > { %vm932_vm1 = vcmp.ge.f32.partialorder %v900_v27, 0.0  ;;  %v964_v43 = vmul.f32 0.2, %v900_v27 }
 0x1b6   : > { %v996_v45 = vsel %vm932_vm1, %v900_v27, %v964_v43 }
 0x1b7   : > { %v809_v47 = vpop.f32.mrf.mxu3  ;;  %v1028_v52 = vmul.f32 1.4142135, %v996_v45 }
 0x1b8   : > { %v810_v50 = vadd.f32 %v809_v47, %v1835_v5 }
 0x1b9   : > { %v1526_v54 = vclamps-f32 %v1028_v52, 256.0 }
 0x1ba   : > { %v901_v56 = vadd.f32 %v869_v40, %v810_v50 }
 0x1bb   : > { %1125 = vst.msk [vmem:[%s1824_s21 + $0xe8] sm:$0xff] %vm1095_vm2, %v1526_v54 }
 0x1bc   : > { %vm933_vm3 = vcmp.ge.f32.partialorder %v901_v56, 0.0  ;;  %v965_v55 = vmul.f32 0.2, %v901_v56 }
 0x1be   : > { %v997_v57 = vsel %vm933_vm3, %v901_v56, %v965_v55 }
 0x1bf   : > { %v1029_v58 = vmul.f32 1.4142135, %v997_v57  ;;  %v812_v59 = vpop.f32.mrf.mxu3 }
 0x1c0   : > { %v813_v60 = vadd.f32 %v812_v59, %v1847_v22 }
 0x1c1   : > { %v1527_v61 = vclamps-f32 %v1029_v58, 256.0 }
 0x1c2   : > { %v902_v62 = vadd.f32 %v869_v40, %v813_v60 }
 0x1c3   : > { %1126 = vst.msk [vmem:[%s1824_s21 + $0xf0] sm:$0xff] %vm1095_vm2, %v1527_v61 }
 0x1c4   : > { %vm934_vm4 = vcmp.ge.f32.partialorder %v902_v62, 0.0  ;;  %v966_v5 = vmul.f32 0.2, %v902_v62 }
 0x1c6   : > { %v998_v63 = vsel %vm934_vm4, %v902_v62, %v966_v5 }
 0x1c7   : > { %v1030_v0 = vmul.f32 1.4142135, %v998_v63 }
 0x1c9   : > { %v1528_v1 = vclamps-f32 %v1030_v0, 256.0 }
 0x1cb   : > { %1127 = vst.msk [vmem:[%s1824_s21 + $0xf8] sm:$0xff] %vm1095_vm2, %v1528_v1 }
 0x1da   : > { %v1285_v2 = vpop.f32.mrf.mxu0 }
 0x1db   : > { %1330 = vst.msk [vmem:[%s311_s12 + $0x20] sm:$0xff] %vm1095_vm2, %v1285_v2 }
 0x1e2   : > { %v1288_v22 = vpop.f32.mrf.mxu0 }
 0x1e3   : > { %1331 = vst.msk [vmem:[%s311_s12 + $0x28] sm:$0xff] %vm1095_vm2, %v1288_v22 }
 0x1ea   : > { %v1291_v3 = vpop.f32.mrf.mxu0 }
 0x1eb   : > { %1332 = vst.msk [vmem:[%s311_s12 + $0x30] sm:$0xff] %vm1095_vm2, %v1291_v3 }
 0x1ec   : > { %v1256_v4 = vpop.f32.mrf.mxu3 }
 0x1ed   : > { %1326 = vst.msk [vmem:[%s311_s12] sm:$0xff] %vm1095_vm2, %v1256_v4 }
 0x1f2   : > { %v1294_v6 = vpop.f32.mrf.mxu0 }
 0x1f3   : > { %1333 = vst.msk [vmem:[%s311_s12 + $0x38] sm:$0xff] %vm1095_vm2, %v1294_v6 }
 0x1f4   : > { %v1259_v7 = vpop.f32.mrf.mxu3 }
 0x1f5   : > { %1327 = vst.msk [vmem:[%s311_s12 + $0x8] sm:$0xff] %vm1095_vm2, %v1259_v7 }
 0x1fc   : > { %v1314_v8 = vpop.f32.mrf.mxu1  ;;  %v1262_v9 = vpop.f32.mrf.mxu3 }
 0x1fd   : > { %1334 = vst.msk [vmem:[%s311_s12 + $0x40] sm:$0xff] %vm1095_vm2, %v1314_v8 }
 0x1fe   : > { %1328 = vst.msk [vmem:[%s311_s12 + $0x10] sm:$0xff] %vm1095_vm2, %v1262_v9 }
 0x204   : > { %v1317_v51 = vpop.f32.mrf.mxu1  ;;  %v1265_v10 = vpop.f32.mrf.mxu3 }
 0x205   : > { %1335 = vst.msk [vmem:[%s311_s12 + $0x48] sm:$0xff] %vm1095_vm2, %v1317_v51 }
 0x206   : > { %1329 = vst.msk [vmem:[%s311_s12 + $0x18] sm:$0xff] %vm1095_vm2, %v1265_v10 }
 0x20c   : > { %v1320_v11 = vpop.f32.mrf.mxu1 }
 0x20d   : > { %1336 = vst.msk [vmem:[%s311_s12 + $0x50] sm:$0xff] %vm1095_vm2, %v1320_v11 }
 0x214   : > { %v1323_v21 = vpop.f32.mrf.mxu1 }
 0x215   : > { %1337 = vst.msk [vmem:[%s311_s12 + $0x58] sm:$0xff] %vm1095_vm2, %v1323_v21 }
 0x216 PF: > { %s18_s24 = sadd.s32 1, %s1581_s24  }
 0x217   : > { %p15_p4 = scmp.ge.s32.totalorder %s18_s24, 4  }
 0x219   :  { %17 = sbr.rel (!%p15_p4) target bundleno = 1 (0x1), region = 89 }

// kernel: synthesis_block_forward.7
= control target key start
LH: loop header
LB: loop body
LE: loop exit
PB: predicated region body
PF: predicated region fallthrough
CT: control target
= control target key end

     0   :  { %s3837_s21 = smov 0   ;;  %s4813_s0 = inlined_call_operand.vmem [shape: f32[2,8,1024], index: 0, kind: input, shape index: {}]   ;;  %s4814_s1 = inlined_call_operand.vmem [shape: f32[2,1,8], index: 1, kind: input, shape index: {}]   ;;  %s4815_s2 = inlined_call_operand.vmem [shape: f32[2,8,1], index: 2, kind: input, shape index: {}]   ;;  %s4816_s3 = inlined_call_operand.vmem [shape: f32[9,8,8], index: 3, kind: input, shape index: {}]   ;;  %s4817_s4 = inlined_call_operand.vmem [shape: f32[9,1024], index: 4, kind: input, shape index: {}]   ;;  %s4818_s5 = inlined_call_operand.vmem [shape: f32[1,1024], index: 5, kind: input, shape index: {}]   ;;  %s4819_s6 = inlined_call_operand.vmem [shape: f32[8,1], index: 6, kind: input, shape index: {}]   ;;  %s4820_s7 = inlined_call_operand.vmem [shape: f32[2,1,8], index: 7, kind: input, shape index: {}]   ;;  %s4821_s8 = inlined_call_operand.vmem [shape: f32[3,8], index: 8, kind: input, shape index: {}]   ;;  %s4822_s9 = inlined_call_operand.vmem [shape: f32[3,1], index: 9, kind: input, shape index: {}]   ;;  %s4823_s10 = inlined_call_operand.vmem [shape: f32[2,3,1024], index: 10, kind: input, shape index: {}]   ;;  %s4824_s11 = inlined_call_operand.vmem [shape: f32[2,8,1024], index: 11, kind: output, shape index: {0}]   ;;  %s4825_s12 = inlined_call_operand.vmem [shape: f32[2,3,1024], index: 12, kind: output, shape index: {1}]  }
   0x1 LB: > { %s3408_s22 = sadd.s32 4294967295, %s3753_s21   ;;  %p3412_p0 = scmp.ge.s32.totalorder %s3753_s21, 1  ;;  %s3753_s21 = sphi %s3837_s21, %s23_s21  }
   0x2   : > { %p400_p1 = scmp.lt.s32.totalorder %s3753_s21, 3 }
   0x4   : > { %p401_p2 = pnand %p3412_p0, %p400_p1 }
   0x5   : > { %p462_p3 = scmp.lt.s32.totalorder (!%p401_p2), %s3408_s22, 1  ;;  %s3755_s30 = smov (!%p401_p2), 33  }
   0x6   : > { %404 = sbr.rel (%p401_p2) target bundleno = 887 (0x377), region = 64  ;;  %s3756_s17 = smov (!%p401_p2), 1  }
   0x7   : > { %s3758_s25 = smov (!%p401_p2), 2   ;;  %s3759_s18 = smov (!%p401_p2), 32  }
   0x8   : > { %s3761_s14 = smov (!%p401_p2), 34   ;;  %s3763_s19 = smov (!%p401_p2), 126  }
   0x9   : > { %s3764_s20 = smov (!%p401_p2), 96   ;;  %s3765_s28 = smov (!%p401_p2), 64  }
   0xa   : > { %s3770_s15 = smov (!%p401_p2), 63  }
   0xb   : > { %s4827_s22 = smov (!%p462_p3, %s3408_s22), 1  ;;  %v3422_v3 = vld [vmem:[%s4817_s4 + $0x1] ss:$8 sm:$0xf]  ;;  %v3757_v12 = vmov 0   ;;  %vm504_vm0 = vcmask 539912  }
   0xc   : > { %s3544_s23 = sshll.u32 %s4827_s22, 6  ;;  %s469_s26 = scalar_lea.vmem %s4814_s1, %s4827_s22  ;;  %v3423_v6 = vld [vmem:[%s4817_s4 + $0x1] ss:$8 sm:$0xf0]  ;;  %3573 = vset.pattern.permute.xlu1 %v3757_v12  ;;  %3734 = vset.pattern.permute.xlu2 %v3757_v12  ;;  %vm502_vm1 = vcmask 269312   ;;  %v3760_v37 = vmov 0.0  }
   0xd   : > { %s466_s29 = scalar_lea.vmem %s4813_s0, %s3544_s23  ;;  %v615_v8 = vor.u32 %v3423_v6, %v3422_v3  ;;  %3735 = vset.pattern.permute.xlu0 %v3757_v12  ;;  %v3441_v19 = vld [vmem:[%s4817_s4 + $0x2] ss:$8 sm:$0xf]  ;;  %s3415_s27 = sshll.u32 %s4827_s22, 3  ;;  %505 = vst.msk [vmem:[#allocation2 + $0x40] sm:$0xff] %vm504_vm0, %v3760_v37  ;;  %vm546_vm2 = vcmask 1047816  }
   0xe   : > { %v498_v0 = vld [vmem:[%s466_s29 + $0x30] sm:$0xff]  ;;  %v496_v1 = vld [vmem:[%s466_s29 + $0x20] sm:$0xff]  ;;  %v499_v4 = vld [vmem:[%s466_s29 + $0x38] sm:$0xff]  ;;  %s473_s13 = scalar_lea.vmem %s4815_s2, %s3415_s27  ;;  %503 = vst.msk [vmem:[#allocation2] sm:$0xff] %vm502_vm1, %v3760_v37  ;;  %vm641_vm3 = vcmask 7168   ;;  %vm1071_vm4 = vcmask 15360  }
   0xf   : > { %v494_v2 = vld [vmem:[%s466_s29 + $0x10] sm:$0xff]  ;;  %526 = vrot.lane.b32.xlu2 %v498_v0, %s3755_s30  ;;  %522 = vrot.lane.b32.xlu1 %v496_v1, %s3755_s30  ;;  %v493_v5 = vld [vmem:[%s466_s29 + $0x8] sm:$0xff]  ;;  %v621_v9 = vperm.slane %v615_v8, 4  ;;  %v620_v10 = vperm.slane %v615_v8, 3  ;;  %v619_v11 = vperm.slane %v615_v8, 2  ;;  %v618_v13 = vperm.slane %v615_v8, 1 }
  0x10   : > { %518 = vrot.lane.b32.xlu0 %v494_v2, %s3755_s30  ;;  %v495_v7 = vld [vmem:[%s466_s29 + $0x18] sm:$0xff]  ;;  %v492_v14 = vld [vmem:[%s466_s29] sm:$0xff]  ;;  %v497_v15 = vld [vmem:[%s466_s29 + $0x28] sm:$0xff]  ;;  %v623_v16 = vperm.slane %v615_v8, 6  ;;  %v624_v17 = vperm.slane %v615_v8, 7  ;;  %v622_v18 = vperm.slane %v615_v8, 5 }
  0x11   : > { %v3442_v20 = vld [vmem:[%s4817_s4 + $0x2] ss:$8 sm:$0xf0]  ;;  %v617_v24 = vperm.slane %v615_v8, 0  ;;  %vm1345_vm5 = vcmask 261120   ;;  %vm698_vm6 = vcmask 1039360  }
  0x12   : > { %v1045_v21 = vor.u32 %v3442_v20, %v3441_v19  ;;  %v501_v29 = vld [vmem:[%s473_s13] sm:$0xff]  ;;  %vm715_vm7 = vcmask 64512   ;;  %vm1892_vm8 = vcmask 277504   ;;  %vm1128_vm9 = vcmask 1031168   ;;  %s3545_s16 = sshll.u32 %s4827_s22, 5 }
  0x13   : > { %v3452_v31 = vld [vmem:[%s4817_s4 + $0x3] ss:$8 sm:$0xf]  ;;  %v3463_v41 = vld [vmem:[%s4817_s4 + $0x4] ss:$8 sm:$0xf]  ;;  %s491_s24 = scalar_lea.vmem %s4825_s12, %s3545_s16 }
  0x14   : > { %v1049_v22 = vperm.slane %v1045_v21, 2  ;;  %v1050_v23 = vperm.slane %v1045_v21, 3  ;;  %v1048_v25 = vperm.slane %v1045_v21, 1  ;;  %v1053_v26 = vperm.slane %v1045_v21, 6 }
  0x15   : > { %v1051_v27 = vperm.slane %v1045_v21, 4  ;;  %v1054_v28 = vperm.slane %v1045_v21, 7  ;;  %v1047_v30 = vperm.slane %v1045_v21, 0  ;;  %v3453_v32 = vld [vmem:[%s4817_s4 + $0x3] ss:$8 sm:$0xf0] }
  0x16   : > { %v1319_v33 = vor.u32 %v3453_v32, %v3452_v31  ;;  %v1052_v36 = vperm.slane %v1045_v21, 5  ;;  %v3464_v42 = vld [vmem:[%s4817_s4 + $0x4] ss:$8 sm:$0xf0]  ;;  %vm1402_vm10 = vcmask 785408   ;;  %vm2166_vm11 = vcmask 523264  }
  0x17   : > { %528 = vrot.lane.b32.xlu2 %v499_v4, %s3755_s30  ;;  %516 = vrot.lane.b32.xlu1 %v493_v5, %s3755_s30  ;;  %v1593_v43 = vor.u32 %v3464_v42, %v3463_v41  ;;  %v3474_v54 = vld [vmem:[%s4817_s4 + $0x5] ss:$8 sm:$0xf]  ;;  %vm1675_vm12 = vcmask 777216   ;;  %vm2439_vm13 = vcmask 531456   ;;  %vm1949_vm14 = vcmask 769024  }
  0x18   : > { %520 = vrot.lane.b32.xlu0 %v495_v7, %s3755_s30  ;;  %v1324_v34 = vperm.slane %v1319_v33, 3  ;;  %v1325_v35 = vperm.slane %v1319_v33, 4  ;;  %v1323_v38 = vperm.slane %v1319_v33, 2  ;;  %v1322_v39 = vperm.slane %v1319_v33, 1 }
  0x19   : > { %v1326_v40 = vperm.slane %v1319_v33, 5  ;;  %v1328_v44 = vperm.slane %v1319_v33, 7  ;;  %v1597_v45 = vperm.slane %v1593_v43, 2  ;;  %v1327_v46 = vperm.slane %v1319_v33, 6 }
  0x1a   : > { %v1599_v47 = vperm.slane %v1593_v43, 4  ;;  %v1596_v48 = vperm.slane %v1593_v43, 1  ;;  %v1321_v49 = vperm.slane %v1319_v33, 0  ;;  %v1598_v51 = vperm.slane %v1593_v43, 3 }
  0x1b   : > { %v1602_v52 = vperm.slane %v1593_v43, 7  ;;  %v1595_v53 = vperm.slane %v1593_v43, 0  ;;  %v3475_v55 = vld [vmem:[%s4817_s4 + $0x5] ss:$8 sm:$0xf0]  ;;  %v1601_v61 = vperm.slane %v1593_v43, 6 }
  0x1c   : > { %v3905_v56 = vor.u32 %v3475_v55, %v3474_v54  ;;  %v1600_v63 = vperm.slane %v1593_v43, 5  ;;  %vm2713_vm15 = vcmask 539648   ;;  %vm2496_vm0 = vcmask 515072  }
  0x1e   : > { %v1871_v59 = vperm.slane %v3905_v56, 3  ;;  %v1872_v60 = vperm.slane %v3905_v56, 4  ;;  %v1870_v3 = vperm.slane %v3905_v56, 2 }
  0x1f   : > { %633 = vrot.lane.b32.xlu2 %v621_v9, %s3756_s17  ;;  %631 = vrot.lane.b32.xlu1 %v620_v10, %s3756_s17 }
  0x20   : > { %629 = vrot.lane.b32.xlu0 %v619_v11, %s3756_s17 }
  0x27   : > { %627 = vrot.lane.b32.xlu1 %v618_v13, %s3756_s17  ;;  %514 = vrot.lane.b32.xlu2 %v492_v14, %s3755_s30 }
  0x28   : > { %524 = vrot.lane.b32.xlu0 %v497_v15, %s3755_s30 }
  0x2f   : > { %639 = vrot.lane.b32.xlu1 %v624_v17, %s3756_s17  ;;  %635 = vrot.lane.b32.xlu2 %v622_v18, %s3756_s17 }
  0x30   : > { %637 = vrot.lane.b32.xlu0 %v623_v16, %s3756_s17 }
  0x37   : > { %1059 = vrot.lane.b32.xlu1 %v1049_v22, %s3758_s25  ;;  %1061 = vrot.lane.b32.xlu2 %v1050_v23, %s3758_s25 }
  0x38   : > { %625 = vrot.lane.b32.xlu0 %v617_v24, %s3756_s17  ;;  %s3766_s17 = smov 95  }
  0x3f   : > { %1057 = vrot.lane.b32.xlu1 %v1048_v25, %s3758_s25  ;;  %1067 = vrot.lane.b32.xlu2 %v1053_v26, %s3758_s25 }
  0x40   : > { %1063 = vrot.lane.b32.xlu0 %v1051_v27, %s3758_s25 }
  0x47   : > { %599 = vperm.xlu1 %3573, %v501_v29   ;;  %1055 = vrot.lane.b32.xlu2 %v1047_v30, %s3758_s25 }
  0x48   : > { %1069 = vrot.lane.b32.xlu0 %v1054_v28, %s3758_s25 }
  0x4f   : > { %1335 = vrot.lane.b32.xlu1 %v1324_v34, %s3759_s18  ;;  %1337 = vrot.lane.b32.xlu2 %v1325_v35, %s3759_s18 }
  0x50   : > { %1065 = vrot.lane.b32.xlu0 %v1052_v36, %s3758_s25 }
  0x57   : > { %1331 = vrot.lane.b32.xlu1 %v1322_v39, %s3759_s18  ;;  %1339 = vrot.lane.b32.xlu2 %v1326_v40, %s3759_s18 }
  0x58   : > { %1333 = vrot.lane.b32.xlu0 %v1323_v38, %s3759_s18 }
  0x5f   : > { %1343 = vrot.lane.b32.xlu1 %v1328_v44, %s3759_s18  ;;  %1607 = vrot.lane.b32.xlu2 %v1597_v45, %s3755_s30 }
  0x60   : > { %1341 = vrot.lane.b32.xlu0 %v1327_v46, %s3759_s18 }
  0x67   : > { %1611 = vrot.lane.b32.xlu1 %v1599_v47, %s3755_s30  ;;  %1605 = vrot.lane.b32.xlu2 %v1596_v48, %s3755_s30  ;;  %v3978_v48 = vld [vmem:[%s469_s26] ss:$0 sm:$0xff]  ;;  %s3768_s26 = smov 94  }
  0x68   : > { %1329 = vrot.lane.b32.xlu0 %v1321_v49, %s3759_s18  ;;  %s3767_s18 = smov 65  }
  0x69   : > { %v527_v50 = vpop.permute.xlu2 %526 }
  0x6f   : > { %1617 = vrot.lane.b32.xlu1 %v1602_v52, %s3755_s30  ;;  %1603 = vrot.lane.b32.xlu2 %v1595_v53, %s3755_s30  ;;  %v3443_v52 = vld [vmem:[%s4816_s3 + $0x10] sm:$0xff]  ;;  %v3454_v53 = vld [vmem:[%s4816_s3 + $0x18] sm:$0xff] }
  0x70   : > { %1609 = vrot.lane.b32.xlu0 %v1598_v51, %s3755_s30  ;;  %v592_v51 = vld [vmem:[%s4816_s3] sm:$0xff] }
  0x71   : > { %v529_v57 = vpop.permute.xlu2 %528 }
  0x72   : > { %v3909_v58 = vsel %vm502_vm1, %v527_v50, %v529_v57  ;;  %555 = vst.msk [vmem:[#allocation2 + $0x40] sm:$0xff] %vm502_vm1, %v529_v57  ;;  %v3465_v57 = vld [vmem:[%s4816_s3 + $0x20] sm:$0xff] }
  0x73   : > { %554 = vst [vmem:[#allocation2 + $0x38] sm:$0xff] %v3909_v58 }
  0x77   : > { %1882 = vrot.lane.b32.xlu1 %v1871_v59, %s3761_s14  ;;  %1884 = vrot.lane.b32.xlu2 %v1872_v60, %s3761_s14  ;;  %v3476_v59 = vld [vmem:[%s4816_s3 + $0x28] sm:$0xff]  ;;  %v3487_v60 = vld [vmem:[%s4816_s3 + $0x30] sm:$0xff] }
  0x78   : > { %1615 = vrot.lane.b32.xlu0 %v1601_v61, %s3755_s30  ;;  %v3498_v61 = vld [vmem:[%s4816_s3 + $0x38] sm:$0xff] }
  0x79   : > { %v634_v62 = vpop.permute.xlu2 %633  ;;  %v3951_v24 = vld [vmem:[#allocation2 + $0x40] sm:$0xff] }
  0x80   : > { %1613 = vrot.lane.b32.xlu0 %v1600_v63, %s3755_s30  ;;  %s3762_s30 = smov 127  }
  0x81   : > { %v523_v0 = vpop.permute.xlu1 %522  ;;  %v515_v1 = vpop.permute.xlu2 %514 }
  0x82   : > { %v519_v2 = vpop.permute.xlu0 %518  ;;  %547 = vst.msk [vmem:[#allocation2] sm:$0xff] %vm546_vm2, %v515_v1 }
  0x88   : > { %1880 = vrot.lane.b32.xlu0 %v1870_v3, %s3761_s14 }
  0x89   : > { %v517_v4 = vpop.permute.xlu1 %516  ;;  %v636_v10 = vpop.permute.xlu2 %635  ;;  %v3961_v36 = vld [vmem:[#allocation2] sm:$0xff] }
  0x8a   : > { %v521_v5 = vpop.permute.xlu0 %520  ;;  %v3922_v6 = vsel %vm502_vm1, %v515_v1, %v517_v4  ;;  %v3931_v9 = vsel %vm502_vm1, %v517_v4, %v519_v2  ;;  %v646_v39 = vsel %vm641_vm3, %v634_v62, %v636_v10  ;;  %v1099_v1 = vmul.f32 %v3978_v48, %v3443_v52 }
  0x8b   : > { %v3925_v7 = vsel %vm502_vm1, %v519_v2, %v521_v5  ;;  %v3928_v8 = vsel %vm502_vm1, %v521_v5, %v523_v0  ;;  %548 = vst [vmem:[#allocation2 + $0x8] sm:$0xff] %v3922_v6  ;;  %v1373_v2 = vmul.f32 %v3978_v48, %v3454_v53  ;;  %v1646_v4 = vmul.f32 %v3978_v48, %v3465_v57 }
  0x8c   : > { %550 = vst [vmem:[#allocation2 + $0x18] sm:$0xff] %v3925_v7  ;;  %v1920_v5 = vmul.f32 %v3978_v48, %v3476_v59  ;;  %v1875_v53 = vperm.slane %v3905_v56, 7 }
  0x8d   : > { %551 = vst [vmem:[#allocation2 + $0x20] sm:$0xff] %v3928_v8 }
  0x8e   : > { %549 = vst [vmem:[#allocation2 + $0x10] sm:$0xff] %v3931_v9 }
  0x91   : > { %v632_v11 = vpop.permute.xlu1 %631  ;;  %v1062_v19 = vpop.permute.xlu2 %1061 }
  0x92   : > { %v630_v12 = vpop.permute.xlu0 %629  ;;  %v645_v13 = vsel %vm641_vm3, %v632_v11, %v634_v62  ;;  %v3509_v62 = vld [vmem:[%s4816_s3 + $0x40] sm:$0xff] }
  0x93   : > { %v644_v14 = vsel %vm641_vm3, %v630_v12, %v632_v11  ;;  %v662_v15 = vmul.f32 %v645_v13, %v3928_v8  ;;  %v2467_v13 = vmul.f32 %v3978_v48, %v3498_v61 }
  0x94   : > { %v661_v16 = vmul.f32 %v644_v14, %v3925_v7  ;;  %v2741_v14 = vmul.f32 %v3978_v48, %v3509_v62 }
  0x96   : > { %v3574_v17 = vpack.i.bf16 %v662_v15, %v661_v16 }
  0x98   : > { %3575 = vrot.lane.b32.xlu2 %v3574_v17, %s3762_s30 }
  0x99   : > { %v628_v18 = vpop.permute.xlu1 %627  ;;  %v3957_v31 = vpop.permute.xlu2 %1067 }
  0x9a   : > { %v525_v20 = vpop.permute.xlu0 %524  ;;  %v643_v23 = vsel %vm641_vm3, %v628_v18, %v630_v12  ;;  %v2194_v12 = vmul.f32 %v3978_v48, %v3487_v60 }
  0x9b   : > { %v3943_v21 = vsel %vm502_vm1, %v523_v0, %v525_v20  ;;  %v3946_v22 = vsel %vm502_vm1, %v525_v20, %v527_v50  ;;  %v660_v30 = vmul.f32 %v643_v23, %v3931_v9  ;;  %v596_v0 = vmul.f32 %v3978_v48, %v592_v51 }
  0x9c   : > { %552 = vst [vmem:[#allocation2 + $0x28] sm:$0xff] %v3943_v21  ;;  %v663_v45 = vmul.f32 %v646_v39, %v3943_v21 }
  0x9d   : > { %553 = vst [vmem:[#allocation2 + $0x30] sm:$0xff] %v3946_v22 }
  0xa1   : > { %v640_v25 = vpop.permute.xlu1 %639  ;;  %v1056_v43 = vpop.permute.xlu2 %1055 }
  0xa2   : > { %v638_v26 = vpop.permute.xlu0 %637  ;;  %v666_v27 = vmul.f32 %v640_v25, %v3951_v24  ;;  %v1088_v15 = vmul.f32 %v1056_v43, %v3961_v36 }
  0xa3   : > { %v647_v28 = vsel %vm641_vm3, %v636_v10, %v638_v26  ;;  %v648_v29 = vsel %vm641_vm3, %v638_v26, %v640_v25 }
  0xa4   : > { %v664_v32 = vmul.f32 %v647_v28, %v3946_v22  ;;  %v665_v33 = vmul.f32 %v648_v29, %v3909_v58 }
  0xa6   : > { %v3584_v34 = vpack.i.bf16 %v664_v32, %v666_v27  ;;  %v3579_v35 = vpack.i.bf16 %v665_v33, %v660_v30 }
  0xa8   : > { %3580 = vrot.lane.b32.xlu1 %v3579_v35, %s3762_s30  ;;  %3585 = vrot.lane.b32.xlu0 %v3584_v34, %s3762_s30 }
  0xa9   : > { %v1060_v37 = vpop.permute.xlu1 %1059  ;;  %v4016_v10 = vpop.permute.xlu2 %1337 }
  0xaa   : > { %v626_v38 = vpop.permute.xlu0 %625  ;;  %v1074_v46 = vsel %vm1071_vm4, %v1060_v37, %v1062_v19 }
  0xab   : > { %v642_v40 = vsel %vm641_vm3, %v626_v38, %v628_v18  ;;  %v658_v41 = vmul.f32 %v626_v38, %v3961_v36  ;;  %v1091_v54 = vmul.f32 %v1074_v46, %v3925_v7 }
  0xac   : > { %v659_v42 = vmul.f32 %v642_v40, %v3922_v6 }
  0xae   : > { %v3589_v44 = vpack.i.bf16 %v658_v41, %v659_v42 }
  0xb0   : > { %3590 = vrot.lane.b32.xlu2 %v3589_v44, %s3762_s30  ;;  %690 = vrot.lane.b32.xlu1 %v663_v45, %s3762_s30  ;;  %s3769_s30 = smov 66  }
  0xb1   : > { %v1058_v47 = vpop.permute.xlu1 %1057  ;;  %v4057_v38 = vpop.permute.xlu2 %1339 }
  0xb2   : > { %v3980_v49 = vpop.permute.xlu0 %1063  ;;  %v1072_v3 = vsel %vm1071_vm4, %v1056_v43, %v1058_v47  ;;  %v1073_v11 = vsel %vm1071_vm4, %v1058_v47, %v1060_v37  ;;  %v1869_v43 = vperm.slane %v3905_v56, 1 }
  0xb3   : > { %v1075_v50 = vsel %vm1071_vm4, %v1062_v19, %v3980_v49  ;;  %v1089_v17 = vmul.f32 %v1072_v3, %v3922_v6  ;;  %v1090_v25 = vmul.f32 %v1073_v11, %v3931_v9  ;;  %v3486_v3 = vld [vmem:[%s4817_s4 + $0x6] ss:$8 sm:$0xf0] }
  0xb4   : > { %v1092_v55 = vmul.f32 %v1075_v50, %v3928_v8 }
  0xb5   : > { %v3609_v35 = vpack.i.bf16 %v1088_v15, %v1089_v17 }
  0xb6   : > { %v3594_v63 = vpack.i.bf16 %v1092_v55, %v1091_v54  ;;  %v1874_v54 = vperm.slane %v3905_v56, 6 }
  0xb8   : > { %3595 = vrot.lane.b32.xlu2 %v3594_v63, %s3763_s19 }
  0xb9   : > { %v4024_v16 = vpop.permute.xlu1 %599 }
  0xba   : > { %v1070_v18 = vpop.permute.xlu0 %1069  ;;  %v4028_v19 = vmul.f32 %v4024_v16, %v596_v0  ;;  %v4031_v20 = vmul.f32 %v1099_v1, %v4024_v16  ;;  %v4034_v23 = vmul.f32 %v1373_v2, %v4024_v16  ;;  %v4040_v27 = vmul.f32 %v1646_v4, %v4024_v16  ;;  %v3485_v2 = vld [vmem:[%s4817_s4 + $0x6] ss:$8 sm:$0xf] }
  0xbb   : > { %v1078_v26 = vsel %vm1071_vm4, %v3957_v31, %v1070_v18  ;;  %v4043_v28 = vmul.f32 %v1920_v5, %v4024_v16  ;;  %v4047_v30 = vmul.f32 %v2194_v12, %v4024_v16  ;;  %v4050_v32 = vmul.f32 %v2467_v13, %v4024_v16 }
  0xbc   : > { %v1095_v29 = vmul.f32 %v1078_v26, %v3909_v58  ;;  %v4053_v33 = vmul.f32 %v2741_v14, %v4024_v16  ;;  %v1096_v41 = vmul.f32 %v1070_v18, %v3951_v24  ;;  %v1873_v0 = vperm.slane %v3905_v56, 5 }
  0xbd   : > { %v1868_v1 = vperm.slane %v3905_v56, 0  ;;  %v4094_v11 = vor.u32 %v3486_v3, %v3485_v2  ;;  %v3496_v3 = vld [vmem:[%s4817_s4 + $0x7] ss:$8 sm:$0xf] }
  0xbe   : > { %v3599_v34 = vpack.i.bf16 %v1095_v29, %v1090_v25 }
  0xbf   : > { %v2144_v13 = vperm.slane %v4094_v11, 2  ;;  %v2145_v14 = vperm.slane %v4094_v11, 3  ;;  %v2146_v29 = vperm.slane %v4094_v11, 4 }
  0xc0   : > { %3600 = vrot.lane.b32.xlu1 %v3599_v34, %s3763_s19  ;;  %3610 = vrot.lane.b32.xlu2 %v3609_v35, %s3763_s19  ;;  %v2143_v35 = vperm.slane %v4094_v11, 1 }
  0xc1   : > { %v1336_v37 = vpop.permute.xlu1 %1335 }
  0xc2   : > { %v1066_v39 = vpop.permute.xlu0 %1065  ;;  %v1349_v45 = vsel %vm1345_vm5, %v1336_v37, %v4016_v10 }
  0xc3   : > { %v1077_v40 = vsel %vm1071_vm4, %v1066_v39, %v3957_v31  ;;  %v4069_v31 = vpop.permute.xlu2 %1607  ;;  %v1366_v51 = vmul.f32 %v1349_v45, %v3928_v8  ;;  %v1076_v12 = vsel %vm1071_vm4, %v3980_v49, %v1066_v39  ;;  %v2149_v45 = vperm.slane %v4094_v11, 7 }
  0xc4   : > { %v1094_v42 = vmul.f32 %v1077_v40, %v3946_v22  ;;  %v1093_v15 = vmul.f32 %v1076_v12, %v3943_v21  ;;  %v1350_v12 = vsel %vm1345_vm5, %v4016_v10, %v4057_v38 }
  0xc6   : > { %v3604_v44 = vpack.i.bf16 %v1094_v42, %v1096_v41 }
  0xc8   : > { %1878 = vrot.lane.b32.xlu1 %v1869_v43, %s3761_s14  ;;  %3605 = vrot.lane.b32.xlu0 %v3604_v44, %s3763_s19  ;;  %v2148_v43 = vperm.slane %v4094_v11, 6 }
  0xc9   : > { %v1332_v46 = vpop.permute.xlu1 %1331 }
  0xca   : > { %v1334_v47 = vpop.permute.xlu0 %1333 }
  0xcb   : > { %v1348_v50 = vsel %vm1345_vm5, %v1334_v47, %v1336_v37  ;;  %v1347_v57 = vsel %vm1345_vm5, %v1332_v46, %v1334_v47  ;;  %v4090_v4 = vpop.permute.xlu2 %1605 }
  0xcc   : > { %v1365_v52 = vmul.f32 %v1348_v50, %v3925_v7  ;;  %v1364_v62 = vmul.f32 %v1347_v57, %v3931_v9 }
  0xce   : > { %v3614_v55 = vpack.i.bf16 %v1366_v51, %v1365_v52 }
  0xd0   : > { %1890 = vrot.lane.b32.xlu1 %v1875_v53, %s3761_s14  ;;  %1888 = vrot.lane.b32.xlu0 %v1874_v54, %s3761_s14 }
  0xd1   : > { %3615 = vrot.lane.b32.xlu2 %v3614_v55, %s3764_s20  ;;  %v1344_v59 = vpop.permute.xlu1 %1343  ;;  %v1620_v55 = vsel %vm502_vm1, %v4090_v4, %v4069_v31 }
  0xd2   : > { %v1342_v60 = vpop.permute.xlu0 %1341  ;;  %v1370_v25 = vmul.f32 %v1344_v59, %v3951_v24 }
  0xd3   : > { %v1352_v61 = vsel %vm1345_vm5, %v1342_v60, %v1344_v59  ;;  %v1351_v17 = vsel %vm1345_vm5, %v4057_v38, %v1342_v60  ;;  %v4104_v18 = vpop.permute.xlu2 %1603 }
  0xd4   : > { %v1369_v63 = vmul.f32 %v1352_v61, %v3909_v58  ;;  %v1368_v49 = vmul.f32 %v1351_v17, %v3946_v22  ;;  %v1367_v17 = vmul.f32 %v1350_v12, %v3943_v21 }
  0xd6   : > { %v3619_v5 = vpack.i.bf16 %v1369_v63, %v1364_v62  ;;  %v3624_v37 = vpack.i.bf16 %v1368_v49, %v1370_v25 }
  0xd8   : > { %3620 = vrot.lane.b32.xlu1 %v3619_v5, %s3764_s20  ;;  %1886 = vrot.lane.b32.xlu0 %v1873_v0, %s3761_s14  ;;  %v3497_v5 = vld [vmem:[%s4817_s4 + $0x7] ss:$8 sm:$0xf0] }
  0xd9   : > { %1876 = vrot.lane.b32.xlu2 %v1868_v1, %s3761_s14  ;;  %v4112_v34 = vpop.permute.xlu1 %1611  ;;  %s4729_s14 = scalar_lea.vmem %s4824_s11, %s3544_s23 }
  0xda   : > { %v1330_v56 = vpop.permute.xlu0 %1329 }
  0xdb   : > { %v1346_v39 = vsel %vm1345_vm5, %v1330_v56, %v1332_v46  ;;  %v4118_v40 = vpop.permute.xlu2 %1884  ;;  %v1362_v41 = vmul.f32 %v1330_v56, %v3961_v36  ;;  %v3424_v46 = vld [vmem:[%s4816_s3 + $0x8] sm:$0xff]  ;;  %v4168_v56 = vor.u32 %v3497_v5, %v3496_v3 }
  0xdc   : > { %v1363_v42 = vmul.f32 %v1346_v39, %v3922_v6  ;;  %v669_v54 = vmul.f32 %v3978_v48, %v3424_v46  ;;  %v2147_v48 = vperm.slane %v4094_v11, 5 }
  0xdd   : > { %v2419_v10 = vperm.slane %v4168_v56, 4  ;;  %v2418_v38 = vperm.slane %v4168_v56, 3 }
  0xde   : > { %v3629_v47 = vpack.i.bf16 %v1362_v41, %v1363_v42  ;;  %v4149_v0 = vmul.f32 %v669_v54, %v4024_v16 }
  0xe0   : > { %2154 = vrot.lane.b32.xlu1 %v2144_v13, %s3765_s28  ;;  %1120 = vrot.lane.b32.xlu0 %v1093_v15, %s3763_s19  ;;  %v2142_v13 = vperm.slane %v4094_v11, 0  ;;  %v2417_v15 = vperm.slane %v4168_v56, 2  ;;  %s4797_s19 = scalar_lea.vmem %s4823_s10, %s3545_s16 }
  0xe1   : > { %2156 = vrot.lane.b32.xlu2 %v2145_v14, %s3765_s28  ;;  %v1618_v52 = vpop.permute.xlu1 %1617 }
  0xe2   : > { %v1610_v26 = vpop.permute.xlu0 %1609  ;;  %v1643_v11 = vmul.f32 %v1618_v52, %v3951_v24 }
  0xe3   : > { %v1621_v50 = vsel %vm502_vm1, %v4069_v31, %v1610_v26  ;;  %v1622_v51 = vsel %vm502_vm1, %v1610_v26, %v4112_v34  ;;  %v1637_v31 = vmul.f32 %v1620_v55, %v3931_v9  ;;  %v1619_v26 = vsel %vm502_vm1, %v4104_v18, %v4090_v4 }
  0xe4   : > { %v1638_v57 = vmul.f32 %v1621_v50, %v3925_v7  ;;  %v1639_v59 = vmul.f32 %v1622_v51, %v3928_v8  ;;  %v2422_v55 = vperm.slane %v4168_v56, 7 }
  0xe6   : > { %v3634_v2 = vpack.i.bf16 %v1639_v59, %v1638_v57  ;;  %v2420_v57 = vperm.slane %v4168_v56, 5 }
  0xe8   : > { %2158 = vrot.lane.b32.xlu0 %v2146_v29, %s3765_s28  ;;  %3625 = vrot.lane.b32.xlu1 %v3624_v37, %s3764_s20  ;;  %v1636_v37 = vmul.f32 %v1619_v26, %v3922_v6 }
  0xe9   : > { %2152 = vrot.lane.b32.xlu2 %v2143_v35, %s3765_s28  ;;  %v1635_v35 = vmul.f32 %v4104_v18, %v3961_v36 }
  0xea   : > { %v1616_v44 = vpop.permute.xlu0 %1615 }
  0xeb   : > { %v1625_v53 = vsel %vm502_vm1, %v1616_v44, %v1618_v52  ;;  %v3649_v46 = vpack.i.bf16 %v1635_v35, %v1636_v37  ;;  %v564_v52 = vld [vmem:[%s4817_s4] ss:$8 sm:$0xf] }
  0xec   : > { %v1642_v61 = vmul.f32 %v1625_v53, %v3909_v58  ;;  %v565_v53 = vld [vmem:[%s4817_s4] ss:$8 sm:$0xf0] }
  0xee   : > { %v3639_v16 = vpack.i.bf16 %v1642_v61, %v1637_v31  ;;  %v4217_v61 = vor.u32 %v565_v53, %v564_v52 }
  0xf0   : > { %3630 = vrot.lane.b32.xlu0 %v3629_v47, %s3764_s20  ;;  %2162 = vrot.lane.b32.xlu1 %v2148_v43, %s3765_s28  ;;  %v1883_v47 = vpop.permute.xlu1 %1882  ;;  %v569_v26 = vperm.slane %v4217_v61, 1 }
  0xf1   : > { %2164 = vrot.lane.b32.xlu2 %v2149_v45, %s3765_s28  ;;  %v2421_v45 = vperm.slane %v4168_v56, 6  ;;  %v1896_v50 = vsel %vm1892_vm8, %v1883_v47, %v4118_v40 }
  0xf2   : > { %v4142_v60 = vpop.permute.xlu2 %3575  ;;  %v1614_v14 = vpop.permute.xlu0 %1613  ;;  %v1913_v54 = vmul.f32 %v1896_v50, %v3928_v8 }
  0xf3   : > { %v3578_v62 = vunpack.i.h.bf16 %v4142_v60  ;;  %v3577_v63 = vunpack.i.l.bf16 %v4142_v60  ;;  %v1624_v49 = vsel %vm502_vm1, %v1614_v14, %v1616_v44  ;;  %v2416_v44 = vperm.slane %v4168_v56, 1 }
  0xf4   : > { %v1641_v25 = vmul.f32 %v1624_v49, %v3946_v22 }
  0xf5   : > { %v702_v1 = vsel %vm698_vm6, %v3577_v63, %v3578_v62 }
  0xf6   : > { %794 = vmatpush.msra.mxu3 %v702_v1  ;;  %v3644_v29 = vpack.i.bf16 %v1641_v25, %v1643_v11  ;;  %v2415_v11 = vperm.slane %v4168_v56, 0  ;;  %v568_v56 = vperm.slane %v4217_v61, 0 }
  0xf7   : > { %3428 = vmatmul.msk.f32.vlgmr.msra.gmra.mxu3 %vm715_vm7, %v4149_v0 }
  0xf8   : > { %2160 = vrot.lane.b32.xlu1 %v2147_v48, %s3765_s28  ;;  %3635 = vrot.lane.b32.xlu0 %v3634_v2, %s3766_s17  ;;  %v571_v2 = vperm.slane %v4217_v61, 3  ;;  %v584_v50 = vmul.f32 %v3961_v36, %v568_v56 }
  0xf9   : > { %3640 = vrot.lane.b32.xlu2 %v3639_v16, %s3766_s17 }
  0xfa   : > { %v4193_v43 = vpop.permute.xlu0 %1880 }
  0xfb   : > { %v1895_v18 = vsel %vm1892_vm8, %v4193_v43, %v1883_v47  ;;  %v585_v47 = vmul.f32 %v569_v26, %v3922_v6 }
  0xfc   : > { %v1912_v51 = vmul.f32 %v1895_v18, %v3925_v7  ;;  %v574_v18 = vperm.slane %v4217_v61, 6 }
  0xfe   : > { %v3654_v59 = vpack.i.bf16 %v1913_v54, %v1912_v51  ;;  %v590_v54 = vmul.f32 %v574_v18, %v3946_v22 }
 0x100   : > { %1394 = vrot.lane.b32.xlu1 %v1367_v17, %s3764_s20  ;;  %2150 = vrot.lane.b32.xlu0 %v2142_v13, %s3765_s28  ;;  %v570_v13 = vperm.slane %v4217_v61, 2  ;;  %v1623_v17 = vsel %vm502_vm1, %v4112_v34, %v1614_v14  ;;  %v587_v34 = vmul.f32 %v571_v2, %v3925_v7  ;;  %v3508_v14 = vld [vmem:[%s4817_s4 + $0x40] ss:$8 sm:$0xf0]  ;;  %vm2770_vm1 = vcmask 506880   ;;  %s476_s20 = scalar_lea.vmem %s4820_s7, %s4827_s22 }
 0x101   : > { %2427 = vrot.lane.b32.xlu2 %v2417_v15, %s3767_s18  ;;  %v575_v15 = vperm.slane %v4217_v61, 7 }
 0x102   : > { %v586_v35 = vmul.f32 %v570_v13, %v3931_v9 }
 0x103   : > { %v591_v37 = vmul.f32 %v575_v15, %v3909_v58 }
 0x108   : > { %2431 = vrot.lane.b32.xlu1 %v2419_v10, %s3767_s18  ;;  %2429 = vrot.lane.b32.xlu0 %v2418_v38, %s3767_s18 }
 0x109   : > { %3645 = vrot.lane.b32.xlu2 %v3644_v29, %s3766_s17  ;;  %v1640_v29 = vmul.f32 %v1623_v17, %v3943_v21 }
 0x10a   : > { %v3591_v39 = vpop.permute.xlu2 %3590 }
 0x10b   : > { %v3593_v41 = vunpack.i.h.bf16 %v3591_v39  ;;  %v3592_v42 = vunpack.i.l.bf16 %v3591_v39  ;;  %v572_v39 = vperm.slane %v4217_v61, 4 }
 0x10d   : > { %v699_v4 = vsel %vm698_vm6, %v3593_v41, %v3592_v42  ;;  %v588_v60 = vmul.f32 %v572_v39, %v3928_v8 }
 0x10e   : > { %734 = vmatpush.msra.mxu0 %v699_v4 }
 0x10f   : > { %3425 = vmatmul.msk.f32.vlgmr.msra.gmra.mxu0 %vm715_vm7, %v4149_v0 }
 0x110   : > { %2425 = vrot.lane.b32.xlu0 %v2416_v44, %s3767_s18  ;;  %3650 = vrot.lane.b32.xlu1 %v3649_v46, %s3766_s17 }
 0x111   : > { %2435 = vrot.lane.b32.xlu2 %v2421_v45, %s3767_s18 }
 0x112   : > { %v4221_v48 = vpop.permute.xlu2 %3595 }
 0x113   : > { %v3598_v51 = vunpack.i.h.bf16 %v4221_v48  ;;  %v3597_v52 = vunpack.i.l.bf16 %v4221_v48 }
 0x118   : > { %2437 = vrot.lane.b32.xlu0 %v2422_v55, %s3767_s18  ;;  %3655 = vrot.lane.b32.xlu1 %v3654_v59, %s3768_s26 }
 0x119   : > { %2433 = vrot.lane.b32.xlu2 %v2420_v57, %s3767_s18 }
 0x11a   : > { %v3581_v31 = vpop.permute.xlu1 %3580  ;;  %v3586_v1 = vpop.permute.xlu0 %3585 }
 0x11b   : > { %v3583_v3 = vunpack.i.h.bf16 %v3581_v31  ;;  %v3582_v5 = vunpack.i.l.bf16 %v3581_v31  ;;  %v3588_v16 = vunpack.i.h.bf16 %v3586_v1  ;;  %v3587_v12 = vunpack.i.l.bf16 %v3586_v1  ;;  %v3611_v4 = vpop.permute.xlu2 %3610 }
 0x11c   : > { %v3613_v57 = vunpack.i.h.bf16 %v3611_v4  ;;  %v3612_v59 = vunpack.i.l.bf16 %v3611_v4 }
 0x11d   : > { %v700_v49 = vsel %vm698_vm6, %v3592_v42, %v3582_v5  ;;  %v701_v25 = vsel %vm698_vm6, %v3582_v5, %v3577_v63  ;;  %v706_v10 = vsel %vm698_vm6, %v3583_v3, %v3587_v12  ;;  %v705_v38 = vsel %vm698_vm6, %v3588_v16, %v3583_v3  ;;  %v3507_v63 = vld [vmem:[%s4817_s4 + $0x40] ss:$8 sm:$0xf] }
 0x11e   : > { %754 = vmatpush.msra.mxu1 %v700_v49  ;;  %774 = vmatpush.msra.mxu2 %v701_v25  ;;  %v573_v42 = vperm.slane %v4217_v61, 5  ;;  %v4258_v44 = vor.u32 %v3508_v14, %v3507_v63  ;;  %v1132_v61 = vsel %vm1128_vm9, %v3597_v52, %v3598_v51 }
 0x11f   : > { %874 = vmatpush.msrb.mxu3 %v706_v10  ;;  %3426 = vmatmul.msk.f32.vlgmr.msra.gmra.mxu1 %vm715_vm7, %v4149_v0 }
 0x120   : > { %3427 = vmatmul.msk.f32.vlgmr.msra.gmra.mxu2 %vm715_vm7, %v4149_v0  ;;  %3432 = vmatmul.msk.f32.vlgmr.msrb.gmra.mxu3 %vm715_vm7, %v4149_v0  ;;  %v589_v53 = vmul.f32 %v573_v42, %v3943_v21  ;;  %v2693_v55 = vperm.slane %v4258_v44, 4  ;;  %v2690_v1 = vperm.slane %v4258_v44, 1  ;;  %v2696_v13 = vperm.slane %v4258_v44, 7 }
 0x121   : > { %854 = vmatpush.msrb.mxu2 %v705_v38  ;;  %957 = vmatpush.msra.mxu3 %v587_v34 }
 0x122   : > { %1667 = vrot.lane.b32.xlu2 %v1640_v29, %s3766_s17  ;;  %2423 = vrot.lane.b32.xlu1 %v2415_v11, %s3767_s18  ;;  %v691_v41 = vpop.permute.xlu1 %690 }
 0x123   : > { %937 = vmatpush.msra.mxu2 %v586_v35  ;;  %1037 = vmatpush.msrb.mxu3 %v591_v37  ;;  %v703_v45 = vsel %vm698_vm6, %v3578_v62, %v691_v41  ;;  %v704_v46 = vsel %vm698_vm6, %v691_v41, %v3588_v16  ;;  %v2692_v62 = vperm.slane %v4258_v44, 3 }
 0x124   : > { %814 = vmatpush.msrb.mxu0 %v703_v45  ;;  %834 = vmatpush.msrb.mxu1 %v704_v46 }
 0x125   : > { %3429 = vmatmul.msk.f32.vlgmr.msrb.gmra.mxu0 %vm715_vm7, %v4149_v0 }
 0x126   : > { %917 = vmatpush.msra.mxu1 %v585_v47  ;;  %897 = vmatpush.msra.mxu0 %v584_v50 }
 0x127   : > { %3430 = vmatmul.msk.f32.vlgmr.msrb.gmra.mxu1 %vm715_vm7, %v4149_v0 }
 0x128   : > { %977 = vmatpush.msrb.mxu0 %v588_v60  ;;  %3431 = vmatmul.msk.f32.vlgmr.msrb.gmra.mxu2 %vm715_vm7, %v4149_v0  ;;  %v1129_v0 = vsel %vm1128_vm9, %v3613_v57, %v3612_v59 }
 0x129   : > { %3436 = vmatmul.msk.f32.vlgmr.msra.gmra.mxu3 %vm715_vm7, %v4028_v19  ;;  %997 = vmatpush.msrb.mxu1 %v589_v53 }
 0x12a   : > { %1017 = vmatpush.msrb.mxu2 %v590_v54  ;;  %1223 = vmatpush.msra.mxu3 %v1132_v61 }
 0x12b   : > { %2703 = vrot.lane.b32.xlu1 %v2692_v62, %s3769_s30  ;;  %v4286_v31 = vpop.permute.xlu2 %3615  ;;  %2705 = vrot.lane.b32.xlu2 %v2693_v55, %s3769_s30  ;;  %v2691_v62 = vperm.slane %v4258_v44, 2 }
 0x12c   : > { %v3618_v15 = vunpack.i.h.bf16 %v4286_v31  ;;  %v3617_v17 = vunpack.i.l.bf16 %v4286_v31 }
 0x12d   : > { %3433 = vmatmul.msk.f32.vlgmr.msra.gmra.mxu0 %vm715_vm7, %v4028_v19 }
 0x12e   : > { %1163 = vmatpush.msra.mxu0 %v1129_v0  ;;  %v1406_v56 = vsel %vm1402_vm10, %v3617_v17, %v3618_v15 }
 0x12f   : > { %3434 = vmatmul.msk.f32.vlgmr.msra.gmra.mxu1 %vm715_vm7, %v4028_v19 }
 0x130   : > { %3435 = vmatmul.msk.f32.vlgmr.msra.gmra.mxu2 %vm715_vm7, %v4028_v19 }
 0x131   : > { %3440 = vmatmul.msk.f32.vlgmr.msrb.gmra.mxu3 %vm715_vm7, %v4028_v19 }
 0x132   : > { %v3601_v2 = vpop.permute.xlu1 %3600 }
 0x133   : > { %2699 = vrot.lane.b32.xlu1 %v2690_v1, %s3769_s30  ;;  %v3602_v3 = vunpack.i.l.bf16 %v3601_v2  ;;  %v1877_v5 = vpop.permute.xlu2 %1876  ;;  %v3603_v10 = vunpack.i.h.bf16 %v3601_v2 }
 0x135   : > { %3437 = vmatmul.msk.f32.vlgmr.msrb.gmra.mxu0 %vm715_vm7, %v4028_v19  ;;  %v1130_v16 = vsel %vm1128_vm9, %v3612_v59, %v3602_v3  ;;  %v1131_v12 = vsel %vm1128_vm9, %v3602_v3, %v3597_v52 }
 0x136   : > { %1183 = vmatpush.msra.mxu1 %v1130_v16  ;;  %1203 = vmatpush.msra.mxu2 %v1131_v12 }
 0x137   : > { %3438 = vmatmul.msk.f32.vlgmr.msrb.gmra.mxu1 %vm715_vm7, %v4028_v19 }
 0x138   : > { %3439 = vmatmul.msk.f32.vlgmr.msrb.gmra.mxu2 %vm715_vm7, %v4028_v19  ;;  %v1909_v19 = vmul.f32 %v1877_v5, %v3961_v36 }
 0x139   : > { %3447 = vmatmul.msk.f32.vlgmr.msra.gmra.mxu3 %vm715_vm7, %v4031_v20 }
 0x13a   : > { %v1879_v49 = vpop.permute.xlu1 %1878  ;;  %v3606_v25 = vpop.permute.xlu0 %3605 }
 0x13b   : > { %2711 = vrot.lane.b32.xlu1 %v2696_v13, %s3769_s30  ;;  %v1893_v38 = vsel %vm1892_vm8, %v1877_v5, %v1879_v49  ;;  %v3608_v11 = vunpack.i.h.bf16 %v3606_v25  ;;  %v3607_v26 = vunpack.i.l.bf16 %v3606_v25  ;;  %v2157_v34 = vpop.permute.xlu2 %2156  ;;  %v1894_v37 = vsel %vm1892_vm8, %v1879_v49, %v4193_v43 }
 0x13c   : > { %v1910_v63 = vmul.f32 %v1893_v38, %v3922_v6  ;;  %v1911_v45 = vmul.f32 %v1894_v37, %v3931_v9  ;;  %v2695_v38 = vperm.slane %v4258_v44, 6  ;;  %v2689_v37 = vperm.slane %v4258_v44, 0 }
 0x13d   : > { %3444 = vmatmul.msk.f32.vlgmr.msra.gmra.mxu0 %vm715_vm7, %v4031_v20  ;;  %v1135_v14 = vsel %vm1128_vm9, %v3608_v11, %v3603_v10  ;;  %v1136_v29 = vsel %vm1128_vm9, %v3603_v10, %v3607_v26 }
 0x13e   : > { %1283 = vmatpush.msrb.mxu2 %v1135_v14  ;;  %1303 = vmatpush.msrb.mxu3 %v1136_v29  ;;  %v3669_v35 = vpack.i.bf16 %v1909_v19, %v1910_v63 }
 0x13f   : > { %3445 = vmatmul.msk.f32.vlgmr.msra.gmra.mxu1 %vm715_vm7, %v4031_v20 }
 0x140   : > { %1497 = vmatpush.msra.mxu3 %v1406_v56  ;;  %3446 = vmatmul.msk.f32.vlgmr.msra.gmra.mxu2 %vm715_vm7, %v4031_v20 }
 0x141   : > { %3451 = vmatmul.msk.f32.vlgmr.msrb.gmra.mxu3 %vm715_vm7, %v4031_v20  ;;  %3670 = vrot.lane.b32.xlu2 %v3669_v35, %s3768_s26 }
 0x142   : > { %v1891_v39 = vpop.permute.xlu1 %1890  ;;  %v1889_v41 = vpop.permute.xlu0 %1888 }
 0x143   : > { %v1899_v42 = vsel %vm1892_vm8, %v1889_v41, %v1891_v39  ;;  %v4334_v4 = vpop.permute.xlu2 %2152  ;;  %v1917_v1 = vmul.f32 %v1891_v39, %v3951_v24 }
 0x144   : > { %v1916_v46 = vmul.f32 %v1899_v42, %v3909_v58 }
 0x146   : > { %v3659_v47 = vpack.i.bf16 %v1916_v46, %v1911_v45  ;;  %v2694_v45 = vperm.slane %v4258_v44, 5 }
 0x148   : > { %3450 = vmatmul.msk.f32.vlgmr.msrb.gmra.mxu2 %vm715_vm7, %v4031_v20  ;;  %3660 = vrot.lane.b32.xlu0 %v3659_v47, %s3768_s26 }
 0x149   : > { %3458 = vmatmul.msk.f32.vlgmr.msra.gmra.mxu3 %vm715_vm7, %v4034_v23 }
 0x14a   : > { %v3621_v43 = vpop.permute.xlu1 %3620  ;;  %v4343_v18 = vpop.permute.xlu0 %1886 }
 0x14b   : > { %v3622_v50 = vunpack.i.l.bf16 %v3621_v43  ;;  %v4345_v52 = vpop.permute.xlu2 %2164  ;;  %v1898_v53 = vsel %vm1892_vm8, %v4343_v18, %v1889_v41  ;;  %v3623_v5 = vunpack.i.h.bf16 %v3621_v43 }
 0x14c   : > { %v1915_v57 = vmul.f32 %v1898_v53, %v3946_v22  ;;  %v1897_v53 = vsel %vm1892_vm8, %v4118_v40, %v4343_v18 }
 0x14d   : > { %v1405_v60 = vsel %vm1402_vm10, %v3622_v50, %v3617_v17 }
 0x14e   : > { %1477 = vmatpush.msra.mxu2 %v1405_v60  ;;  %v3664_v2 = vpack.i.bf16 %v1915_v57, %v1917_v1 }
 0x150   : > { %3457 = vmatmul.msk.f32.vlgmr.msra.gmra.mxu2 %vm715_vm7, %v4034_v23  ;;  %2701 = vrot.lane.b32.xlu0 %v2691_v62, %s3769_s30 }
 0x152   : > { %v2155_v54 = vpop.permute.xlu1 %2154  ;;  %v1121_v55 = vpop.permute.xlu0 %1120 }
 0x153   : > { %v1133_v59 = vsel %vm1128_vm9, %v3598_v51, %v1121_v55  ;;  %v1134_v61 = vsel %vm1128_vm9, %v1121_v55, %v3608_v11  ;;  %v4359_v0 = vpop.permute.xlu2 %3640  ;;  %v2169_v48 = vsel %vm2166_vm11, %v2155_v54, %v2157_v34  ;;  %v2168_v26 = vsel %vm2166_vm11, %v4334_v4, %v2155_v54 }
 0x154   : > { %1243 = vmatpush.msrb.mxu0 %v1133_v59  ;;  %1263 = vmatpush.msrb.mxu1 %v1134_v61  ;;  %v2185_v56 = vmul.f32 %v2168_v26, %v3931_v9  ;;  %v2191_v54 = vmul.f32 %v4345_v52, %v3951_v24  ;;  %v3643_v57 = vunpack.i.h.bf16 %v4359_v0 }
 0x155   : > { %3448 = vmatmul.msk.f32.vlgmr.msrb.gmra.mxu0 %vm715_vm7, %v4031_v20  ;;  %3449 = vmatmul.msk.f32.vlgmr.msrb.gmra.mxu1 %vm715_vm7, %v4031_v20  ;;  %v2186_v20 = vmul.f32 %v2169_v48, %v3925_v7 }
 0x158   : > { %3665 = vrot.lane.b32.xlu0 %v3664_v2, %s3768_s26  ;;  %v1914_v2 = vmul.f32 %v1897_v53, %v3943_v21  ;;  %v4520_v53 = vld [vmem:[#allocation2 + $0x8] sm:$0xff] }
 0x15a   : > { %v4368_v51 = vpop.permute.xlu0 %2158  ;;  %v4370_v3 = vpop.permute.xlu1 %3625 }
 0x15b   : > { %v2170_v16 = vsel %vm2166_vm11, %v2157_v34, %v4368_v51  ;;  %v3628_v12 = vunpack.i.h.bf16 %v4370_v3  ;;  %v3627_v13 = vunpack.i.l.bf16 %v4370_v3  ;;  %v4376_v17 = vpop.permute.xlu2 %2427 }
 0x15c   : > { %v2187_v49 = vmul.f32 %v2170_v16, %v3928_v8 }
 0x15d   : > { %v1409_v25 = vsel %vm1402_vm10, %v3628_v12, %v3623_v5  ;;  %v1410_v10 = vsel %vm1402_vm10, %v3623_v5, %v3627_v13 }
 0x15e   : > { %1557 = vmatpush.msrb.mxu2 %v1409_v25  ;;  %1577 = vmatpush.msrb.mxu3 %v1410_v10  ;;  %v3674_v11 = vpack.i.bf16 %v2187_v49, %v2186_v20 }
 0x15f   : > { %3461 = vmatmul.msk.f32.vlgmr.msrb.gmra.mxu2 %vm715_vm7, %v4034_v23  ;;  %3462 = vmatmul.msk.f32.vlgmr.msrb.gmra.mxu3 %vm715_vm7, %v4034_v23 }
 0x160   : > { %3675 = vrot.lane.b32.xlu2 %v3674_v11, %s3765_s28  ;;  %2709 = vrot.lane.b32.xlu0 %v2695_v38, %s3769_s30 }
 0x162   : > { %v3631_v34 = vpop.permute.xlu0 %3630  ;;  %v2163_v19 = vpop.permute.xlu1 %2162 }
 0x163   : > { %v3633_v63 = vunpack.i.h.bf16 %v3631_v34  ;;  %v3632_v14 = vunpack.i.l.bf16 %v3631_v34  ;;  %v2173_v29 = vsel %vm2166_vm11, %v2163_v19, %v4345_v52  ;;  %v4398_v39 = vpop.permute.xlu2 %3645 }
 0x164   : > { %v2190_v35 = vmul.f32 %v2173_v29, %v3909_v58  ;;  %v3642_v58 = vunpack.i.l.bf16 %v4359_v0  ;;  %v3648_v9 = vunpack.i.h.bf16 %v4398_v39  ;;  %v3647_v43 = vunpack.i.l.bf16 %v4398_v39 }
 0x165   : > { %v1403_v41 = vsel %vm1402_vm10, %v3633_v63, %v3632_v14  ;;  %v1404_v42 = vsel %vm1402_vm10, %v3632_v14, %v3622_v50 }
 0x166   : > { %1437 = vmatpush.msra.mxu0 %v1403_v41  ;;  %1457 = vmatpush.msra.mxu1 %v1404_v42  ;;  %v3679_v46 = vpack.i.bf16 %v2190_v35, %v2185_v56  ;;  %v1682_v18 = vsel %vm1675_vm12, %v3648_v9, %v3643_v57  ;;  %v1683_v52 = vsel %vm1675_vm12, %v3643_v57, %v3647_v43 }
 0x167   : > { %3455 = vmatmul.msk.f32.vlgmr.msra.gmra.mxu0 %vm715_vm7, %v4034_v23  ;;  %3456 = vmatmul.msk.f32.vlgmr.msra.gmra.mxu1 %vm715_vm7, %v4034_v23 }
 0x168   : > { %2697 = vrot.lane.b32.xlu2 %v2689_v37, %s3769_s30  ;;  %3680 = vrot.lane.b32.xlu1 %v3679_v46, %s3765_s28 }
 0x169   : > { %2707 = vrot.lane.b32.xlu0 %v2694_v45, %s3769_s30 }
 0x16a   : > { %v2161_v44 = vpop.permute.xlu1 %2160  ;;  %v4412_v47 = vpop.permute.xlu0 %3635 }
 0x16b   : > { %v2172_v50 = vsel %vm2166_vm11, %v2161_v44, %v2163_v19  ;;  %v3638_v60 = vunpack.i.h.bf16 %v4412_v47  ;;  %v3637_v62 = vunpack.i.l.bf16 %v4412_v47  ;;  %v2436_v40 = vpop.permute.xlu2 %2435  ;;  %v2171_v3 = vsel %vm2166_vm11, %v4368_v51, %v2161_v44  ;;  %v4500_v44 = vld [vmem:[#allocation2 + $0x38] sm:$0xff] }
 0x16c   : > { %v2189_v55 = vmul.f32 %v2172_v50, %v3946_v22  ;;  %v2188_v11 = vmul.f32 %v2171_v3, %v3943_v21 }
 0x16d   : > { %v1678_v59 = vsel %vm1675_vm12, %v3642_v58, %v3637_v62  ;;  %v1679_v61 = vsel %vm1675_vm12, %v3637_v62, %v3638_v60 }
 0x16e   : > { %1750 = vmatpush.msra.mxu2 %v1678_v59  ;;  %1770 = vmatpush.msra.mxu3 %v1679_v61  ;;  %v3684_v1 = vpack.i.bf16 %v2189_v55, %v2191_v54 }
 0x16f   : > { %3468 = vmatmul.msk.f32.vlgmr.msra.gmra.mxu2 %vm715_vm7, %v4040_v27  ;;  %3469 = vmatmul.msk.f32.vlgmr.msra.gmra.mxu3 %vm715_vm7, %v4040_v27 }
 0x170   : > { %1830 = vmatpush.msrb.mxu2 %v1682_v18  ;;  %1850 = vmatpush.msrb.mxu3 %v1683_v52 }
 0x171   : > { %1941 = vrot.lane.b32.xlu0 %v1914_v2, %s3768_s26  ;;  %3685 = vrot.lane.b32.xlu1 %v3684_v1, %s3765_s28 }
 0x172   : > { %v1395_v48 = vpop.permute.xlu1 %1394  ;;  %v2151_v5 = vpop.permute.xlu0 %2150 }
 0x173   : > { %v1407_v16 = vsel %vm1402_vm10, %v3618_v15, %v1395_v48  ;;  %v1408_v13 = vsel %vm1402_vm10, %v1395_v48, %v3628_v12  ;;  %v2167_v20 = vsel %vm2166_vm11, %v2151_v5, %v4334_v4  ;;  %v2183_v49 = vmul.f32 %v2151_v5, %v3961_v36  ;;  %v4459_v15 = vpop.permute.xlu2 %2433 }
 0x174   : > { %v2184_v25 = vmul.f32 %v2167_v20, %v3922_v6  ;;  %1517 = vmatpush.msrb.mxu0 %v1407_v16  ;;  %1537 = vmatpush.msrb.mxu1 %v1408_v13 }
 0x175   : > { %3459 = vmatmul.msk.f32.vlgmr.msrb.gmra.mxu0 %vm715_vm7, %v4034_v23  ;;  %3460 = vmatmul.msk.f32.vlgmr.msrb.gmra.mxu1 %vm715_vm7, %v4034_v23 }
 0x176   : > { %v3689_v31 = vpack.i.bf16 %v2183_v49, %v2184_v25 }
 0x177   : > { %3472 = vmatmul.msk.f32.vlgmr.msrb.gmra.mxu2 %vm715_vm7, %v4040_v27  ;;  %3473 = vmatmul.msk.f32.vlgmr.msrb.gmra.mxu3 %vm715_vm7, %v4040_v27 }
 0x178   : > { %3690 = vrot.lane.b32.xlu2 %v3689_v31, %s3765_s28 }
 0x17a   : > { %v4461_v6 = vpop.permute.xlu1 %2431  ;;  %v2430_v4 = vpop.permute.xlu0 %2429 }
 0x17b   : > { %v2442_v23 = vsel %vm2439_vm13, %v4376_v17, %v2430_v4  ;;  %v2443_v12 = vsel %vm2439_vm13, %v2430_v4, %v4461_v6 }
 0x17c   : > { %v2459_v10 = vmul.f32 %v2442_v23, %v3925_v7  ;;  %v2460_v38 = vmul.f32 %v2443_v12, %v3928_v8  ;;  %v1668_v14 = vpop.permute.xlu2 %1667  ;;  %v2445_v8 = vsel %vm2439_vm13, %v4459_v15, %v2436_v40 }
 0x17d   : > { %v1680_v21 = vsel %vm1675_vm12, %v3638_v60, %v1668_v14  ;;  %v1681_v56 = vsel %vm1675_vm12, %v1668_v14, %v3648_v9  ;;  %v2462_v35 = vmul.f32 %v2445_v8, %v3946_v22 }
 0x17e   : > { %v3694_v26 = vpack.i.bf16 %v2460_v38, %v2459_v10 }
 0x180   : > { %2215 = vrot.lane.b32.xlu2 %v2188_v11, %s3765_s28  ;;  %3695 = vrot.lane.b32.xlu0 %v3694_v26, %s3770_s15  ;;  %s3771_s28 = smov 62  }
 0x182   : > { %v2426_v34 = vpop.permute.xlu0 %2425  ;;  %v3651_v51 = vpop.permute.xlu1 %3650 }
 0x183   : > { %v3653_v19 = vunpack.i.h.bf16 %v3651_v51  ;;  %v3652_v63 = vunpack.i.l.bf16 %v3651_v51  ;;  %v2441_v0 = vsel %vm2439_vm13, %v2426_v34, %v4376_v17 }
 0x185   : > { %v1676_v29 = vsel %vm1675_vm12, %v3653_v19, %v3652_v63  ;;  %v1677_v7 = vsel %vm1675_vm12, %v3652_v63, %v3642_v58  ;;  %v4497_v58 = vld [vmem:[#allocation2 + $0x10] sm:$0xff]  ;;  %v4516_v43 = vpop.permute.xlu2 %2705 }
 0x186   : > { %1710 = vmatpush.msra.mxu0 %v1676_v29  ;;  %1730 = vmatpush.msra.mxu1 %v1677_v7  ;;  %v2458_v9 = vmul.f32 %v4497_v58, %v2441_v0 }
 0x187   : > { %3466 = vmatmul.msk.f32.vlgmr.msra.gmra.mxu0 %vm715_vm7, %v4040_v27  ;;  %3467 = vmatmul.msk.f32.vlgmr.msra.gmra.mxu1 %vm715_vm7, %v4040_v27 }
 0x188   : > { %1790 = vmatpush.msrb.mxu0 %v1680_v21  ;;  %1810 = vmatpush.msrb.mxu1 %v1681_v56 }
 0x18a   : > { %v2438_v37 = vpop.permute.xlu0 %2437  ;;  %v4491_v41 = vpop.permute.xlu1 %3655 }
 0x18b   : > { %v2446_v39 = vsel %vm2439_vm13, %v2436_v40, %v2438_v37  ;;  %v2464_v42 = vmul.f32 %v2438_v37, %v3951_v24  ;;  %v3658_v45 = vunpack.i.h.bf16 %v4491_v41  ;;  %v3657_v46 = vunpack.i.l.bf16 %v4491_v41 }
 0x18c   : > { %v2463_v22 = vmul.f32 %v4500_v44, %v2446_v39  ;;  %v736_v57 = vpop.f32.mrf.mxu0  ;;  %v2444_v40 = vsel %vm2439_vm13, %v4461_v6, %v4459_v15 }
 0x18d   : > { %v3704_v17 = vpack.i.bf16 %v2462_v35, %v2464_v42  ;;  %v1953_v47 = vsel %vm1949_vm14, %v3657_v46, %v3658_v45 }
 0x18e   : > { %2044 = vmatpush.msra.mxu3 %v1953_v47  ;;  %v3699_v24 = vpack.i.bf16 %v2463_v22, %v2458_v9 }
 0x18f   : > { %3705 = vrot.lane.b32.xlu0 %v3704_v17, %s3770_s15  ;;  %3470 = vmatmul.msk.f32.vlgmr.msrb.gmra.mxu0 %vm715_vm7, %v4040_v27 }
 0x190   : > { %3471 = vmatmul.msk.f32.vlgmr.msrb.gmra.mxu1 %vm715_vm7, %v4040_v27  ;;  %3480 = vmatmul.msk.f32.vlgmr.msra.gmra.mxu3 %vm715_vm7, %v4043_v28  ;;  %v796_v27 = vpop.f32.mrf.mxu3 }
 0x191   : > { %3700 = vrot.lane.b32.xlu1 %v3699_v24, %s3770_s15 }
 0x194   : > { %v2424_v50 = vpop.permute.xlu1 %2423 }
 0x195   : > { %v2440_v60 = vsel %vm2439_vm13, %v2424_v50, %v2426_v34  ;;  %v2456_v62 = vmul.f32 %v2424_v50, %v3961_v36  ;;  %v4528_v36 = vld [vmem:[#allocation2 + $0x28] sm:$0xff]  ;;  %v3742_v50 = vld [vmem:[#allocation2 + $0x20] sm:$0xff] }
 0x196   : > { %v2457_v54 = vmul.f32 %v4520_v53, %v2440_v60  ;;  %v2461_v52 = vmul.f32 %v4528_v36, %v2444_v40 }
 0x198   : > { %v3709_v55 = vpack.i.bf16 %v2456_v62, %v2457_v54  ;;  %v3743_v62 = vld [vmem:[#allocation2 + $0x18] sm:$0xff] }
 0x19a   : > { %3710 = vrot.lane.b32.xlu1 %v3709_v55, %s3770_s15 }
 0x19b   : > { %v3671_v59 = vpop.permute.xlu2 %3670 }
 0x19c   : > { %v3673_v61 = vunpack.i.h.bf16 %v3671_v59  ;;  %v3672_v1 = vunpack.i.l.bf16 %v3671_v59  ;;  %v756_v2 = vpop.f32.mrf.mxu1 }
 0x19d   : > { %v2704_v35 = vpop.permute.xlu1 %2703 }
 0x19e   : > { %v1950_v18 = vsel %vm1949_vm14, %v3673_v61, %v3672_v1  ;;  %v2717_v42 = vsel %vm2713_vm15, %v2704_v35, %v4516_v43 }
 0x19f   : > { %1984 = vmatpush.msra.mxu0 %v1950_v18 }
 0x1a0   : > { %3477 = vmatmul.msk.f32.vlgmr.msra.gmra.mxu0 %vm715_vm7, %v4043_v28 }
 0x1a2   : > { %2488 = vrot.lane.b32.xlu1 %v2461_v52, %s3770_s15  ;;  %v816_v48 = vpop.f32.mrf.mxu0 }
 0x1a3   : > { %v776_v5 = vpop.f32.mrf.mxu2  ;;  %v876_v16 = vpop.f32.mrf.mxu3 }
 0x1a4   : > { %v836_v13 = vpop.f32.mrf.mxu1 }
 0x1aa   : > { %v899_v20 = vpop.f32.mrf.mxu0 }
 0x1ab   : > { %v856_v49 = vpop.f32.mrf.mxu2  ;;  %v900_v25 = vadd.f32 %v899_v20, %v736_v57 }
 0x1ac   : > { %v959_v31 = vpop.f32.mrf.mxu3  ;;  %v919_v6 = vpop.f32.mrf.mxu1 }
 0x1ad   : > { %v960_v15 = vadd.f32 %v959_v31, %v796_v27  ;;  %v920_v4 = vadd.f32 %v919_v6, %v756_v2  ;;  %v2700_v27 = vpop.permute.xlu1 %2699 }
 0x1b2   : > { %v979_v3 = vpop.f32.mrf.mxu0 }
 0x1b3   : > { %v939_v23 = vpop.f32.mrf.mxu2  ;;  %v4534_v12 = vadd.f32 %v979_v3, %v816_v48 }
 0x1b4   : > { %v1039_v10 = vpop.f32.mrf.mxu3  ;;  %v940_v38 = vadd.f32 %v939_v23, %v776_v5  ;;  %v999_v26 = vpop.f32.mrf.mxu1 }
 0x1b5   : > { %v1040_v11 = vadd.f32 %v1039_v10, %v876_v16  ;;  %v1000_v34 = vadd.f32 %v999_v26, %v836_v13  ;;  %v2712_v31 = vpop.permute.xlu1 %2711 }
 0x1ba   : > { %v1165_v51 = vpop.f32.mrf.mxu0  ;;  %v3661_v19 = vpop.permute.xlu0 %3660 }
 0x1bb   : > { %v1019_v63 = vpop.f32.mrf.mxu2  ;;  %v4536_v14 = vadd.f32 %v1165_v51, %v900_v25  ;;  %v3662_v29 = vunpack.i.l.bf16 %v3661_v19  ;;  %v4551_v60 = vpop.permute.xlu2 %3675  ;;  %v3663_v40 = vunpack.i.h.bf16 %v3661_v19 }
 0x1bc   : > { %v1020_v7 = vadd.f32 %v1019_v63, %v856_v49  ;;  %v1225_v8 = vpop.f32.mrf.mxu3  ;;  %v1185_v21 = vpop.f32.mrf.mxu1  ;;  %v3678_v59 = vunpack.i.h.bf16 %v4551_v60  ;;  %v3677_v61 = vunpack.i.l.bf16 %v4551_v60 }
 0x1bd   : > { %v1311_v56 = vadd.f32 %v1225_v8, %v960_v15  ;;  %v4538_v0 = vadd.f32 %v1185_v21, %v920_v4  ;;  %v1951_v37 = vsel %vm1949_vm14, %v3672_v1, %v3662_v29  ;;  %v1952_v39 = vsel %vm1949_vm14, %v3662_v29, %v3657_v46  ;;  %v3744_v8 = vld [vmem:[#allocation2] sm:$0xff] }
 0x1be   : > { %2004 = vmatpush.msra.mxu1 %v1951_v37  ;;  %2024 = vmatpush.msra.mxu2 %v1952_v39  ;;  %v2734_v46 = vmul.f32 %v3742_v50, %v2717_v42  ;;  %v2226_v25 = vsel %vm2166_vm11, %v3677_v61, %v3678_v59  ;;  %v3745_v37 = vld [vmem:[#allocation2 + $0x40] sm:$0xff] }
 0x1bf   : > { %3478 = vmatmul.msk.f32.vlgmr.msra.gmra.mxu1 %vm715_vm7, %v4043_v28  ;;  %3479 = vmatmul.msk.f32.vlgmr.msra.gmra.mxu2 %vm715_vm7, %v4043_v28  ;;  %v2738_v39 = vmul.f32 %v3745_v37, %v2712_v31 }
 0x1c2   : > { %v2702_v9 = vpop.permute.xlu0 %2701 }
 0x1c3   : > { %v1205_v22 = vpop.f32.mrf.mxu2  ;;  %v2716_v17 = vsel %vm2713_vm15, %v2702_v9, %v2704_v35  ;;  %v2698_v49 = vpop.permute.xlu2 %2697  ;;  %v2715_v15 = vsel %vm2713_vm15, %v2700_v27, %v2702_v9  ;;  %v3746_v9 = vld [vmem:[#allocation2 + $0x30] sm:$0xff] }
 0x1c4   : > { %v1310_v47 = vadd.f32 %v1205_v22, %v940_v38  ;;  %v1305_v24 = vpop.f32.mrf.mxu3  ;;  %v2733_v54 = vmul.f32 %v3743_v62, %v2716_v17  ;;  %v2732_v26 = vmul.f32 %v4497_v58, %v2715_v15 }
 0x1c5   : > { %v4553_v55 = vadd.f32 %v1305_v24, %v1040_v11 }
 0x1c6   : > { %v3714_v57 = vpack.i.bf16 %v2734_v46, %v2733_v54 }
 0x1c8   : > { %3715 = vrot.lane.b32.xlu2 %v3714_v57, %s3771_s28 }
 0x1ca   : > { %v4558_v1 = vpop.permute.xlu0 %3665 }
 0x1cb   : > { %v1285_v2 = vpop.f32.mrf.mxu2  ;;  %v3668_v18 = vunpack.i.h.bf16 %v4558_v1  ;;  %v3667_v52 = vunpack.i.l.bf16 %v4558_v1 }
 0x1cc   : > { %v1314_v48 = vadd.f32 %v1285_v2, %v1020_v7  ;;  %v1499_v5 = vpop.f32.mrf.mxu3  ;;  %v2714_v7 = vsel %vm2713_vm15, %v2698_v49, %v2700_v27 }
 0x1cd   : > { %v4562_v16 = vadd.f32 %v1499_v5, %v1311_v56  ;;  %v1956_v13 = vsel %vm1949_vm14, %v3668_v18, %v3663_v40  ;;  %v1957_v20 = vsel %vm1949_vm14, %v3663_v40, %v3667_v52  ;;  %v2731_v21 = vmul.f32 %v4520_v53, %v2714_v7 }
 0x1ce   : > { %2104 = vmatpush.msrb.mxu2 %v1956_v13  ;;  %2124 = vmatpush.msrb.mxu3 %v1957_v20 }
 0x1cf   : > { %3483 = vmatmul.msk.f32.vlgmr.msrb.gmra.mxu2 %vm715_vm7, %v4043_v28  ;;  %3484 = vmatmul.msk.f32.vlgmr.msrb.gmra.mxu3 %vm715_vm7, %v4043_v28 }
 0x1d0   : > { %2317 = vmatpush.msra.mxu3 %v2226_v25 }
 0x1d2   : > { %v1245_v6 = vpop.f32.mrf.mxu0  ;;  %v2710_v4 = vpop.permute.xlu0 %2709 }
 0x1d3   : > { %v4577_v3 = vadd.f32 %v1245_v6, %v4534_v12  ;;  %v1265_v23 = vpop.f32.mrf.mxu1  ;;  %v2720_v10 = vsel %vm2713_vm15, %v2710_v4, %v2712_v31  ;;  %v1479_v11 = vpop.f32.mrf.mxu2 }
 0x1d4   : > { %v4580_v38 = vadd.f32 %v1265_v23, %v1000_v34  ;;  %v2737_v51 = vmul.f32 %v4500_v44, %v2720_v10  ;;  %v4584_v19 = vadd.f32 %v1479_v11, %v1310_v47  ;;  %v3691_v63 = vpop.permute.xlu2 %3690  ;;  %v2730_v34 = vmul.f32 %v3744_v8, %v2698_v49 }
 0x1d5   : > { %v3693_v24 = vunpack.i.h.bf16 %v3691_v63  ;;  %v3692_v50 = vunpack.i.l.bf16 %v3691_v63 }
 0x1d6   : > { %v3719_v29 = vpack.i.bf16 %v2737_v51, %v2732_v26  ;;  %v3729_v47 = vpack.i.bf16 %v2730_v34, %v2731_v21 }
 0x1d7   : > { %3491 = vmatmul.msk.f32.vlgmr.msra.gmra.mxu3 %vm715_vm7, %v4047_v30  ;;  %v2223_v2 = vsel %vm2166_vm11, %v3693_v24, %v3692_v50 }
 0x1d8   : > { %3720 = vrot.lane.b32.xlu0 %v3719_v29, %s3771_s28 }
 0x1da   : > { %v3681_v12 = vpop.permute.xlu1 %3680 }
 0x1db   : > { %v2708_v56 = vpop.permute.xlu0 %2707  ;;  %v3682_v58 = vunpack.i.l.bf16 %v3681_v12  ;;  %v3683_v62 = vunpack.i.h.bf16 %v3681_v12 }
 0x1dc   : > { %v2718_v44 = vsel %vm2713_vm15, %v4516_v43, %v2708_v56  ;;  %v2719_v35 = vsel %vm2713_vm15, %v2708_v56, %v2710_v4  ;;  %v2216_v53 = vpop.permute.xlu2 %2215 }
 0x1dd   : > { %v2735_v42 = vmul.f32 %v4528_v36, %v2718_v44  ;;  %v2736_v22 = vmul.f32 %v3746_v9, %v2719_v35  ;;  %v2225_v17 = vsel %vm2166_vm11, %v3682_v58, %v3677_v61  ;;  %v2224_v41 = vsel %vm2166_vm11, %v3692_v50, %v3682_v58 }
 0x1de   : > { %2297 = vmatpush.msra.mxu2 %v2225_v17 }
 0x1df   : > { %2762 = vrot.lane.b32.xlu1 %v2735_v42, %s3771_s28  ;;  %3490 = vmatmul.msk.f32.vlgmr.msra.gmra.mxu2 %vm715_vm7, %v4047_v30  ;;  %v3724_v43 = vpack.i.bf16 %v2736_v22, %v2738_v39  ;;  %v2984_v22 = vld [vmem:[%s4819_s6] sm:$0xff] }
 0x1e0   : > { %3730 = vrot.lane.b32.xlu0 %v3729_v47, %s3771_s28 }
 0x1e1   : > { %3725 = vrot.lane.b32.xlu2 %v3724_v43, %s3771_s28 }
 0x1e2   : > { %v1559_v36 = vpop.f32.mrf.mxu2  ;;  %v1579_v46 = vpop.f32.mrf.mxu3 }
 0x1e3   : > { %v1942_v54 = vpop.permute.xlu0 %1941  ;;  %v3686_v57 = vpop.permute.xlu1 %3685  ;;  %v4601_v27 = vadd.f32 %v1559_v36, %v1314_v48  ;;  %v1589_v61 = vadd.f32 %v1579_v46, %v4553_v55 }
 0x1e4   : > { %v1954_v40 = vsel %vm1949_vm14, %v3658_v45, %v1942_v54  ;;  %v1955_v52 = vsel %vm1949_vm14, %v1942_v54, %v3668_v18  ;;  %v3688_v5 = vunpack.i.h.bf16 %v3686_v57  ;;  %v3687_v13 = vunpack.i.l.bf16 %v3686_v57  ;;  %v1439_v20 = vpop.f32.mrf.mxu0  ;;  %v1459_v49 = vpop.f32.mrf.mxu1 }
 0x1e5   : > { %v4612_v25 = vadd.f32 %v1439_v20, %v4536_v14  ;;  %v4615_v48 = vadd.f32 %v1459_v49, %v4538_v0  ;;  %2064 = vmatpush.msrb.mxu0 %v1954_v40  ;;  %2084 = vmatpush.msrb.mxu1 %v1955_v52  ;;  %v2227_v0 = vsel %vm2166_vm11, %v3678_v59, %v2216_v53 }
 0x1e6   : > { %3481 = vmatmul.msk.f32.vlgmr.msrb.gmra.mxu0 %vm715_vm7, %v4043_v28  ;;  %3482 = vmatmul.msk.f32.vlgmr.msrb.gmra.mxu1 %vm715_vm7, %v4043_v28  ;;  %v2228_v45 = vsel %vm2166_vm11, %v2216_v53, %v3688_v5  ;;  %v2229_v55 = vsel %vm2166_vm11, %v3688_v5, %v3683_v62  ;;  %v2230_v14 = vsel %vm2166_vm11, %v3683_v62, %v3687_v13 }
 0x1e7   : > { %2257 = vmatpush.msra.mxu0 %v2223_v2  ;;  %2277 = vmatpush.msra.mxu1 %v2224_v41 }
 0x1e8   : > { %2377 = vmatpush.msrb.mxu2 %v2229_v55  ;;  %2397 = vmatpush.msrb.mxu3 %v2230_v14 }
 0x1e9   : > { %2337 = vmatpush.msrb.mxu0 %v2227_v0  ;;  %2357 = vmatpush.msrb.mxu1 %v2228_v45 }
 0x1ea   : > { %3494 = vmatmul.msk.f32.vlgmr.msrb.gmra.mxu2 %vm715_vm7, %v4047_v30  ;;  %3495 = vmatmul.msk.f32.vlgmr.msrb.gmra.mxu3 %vm715_vm7, %v4047_v30 }
 0x1eb   : > { %2987 = vperm.xlu2 %3734, %v2984_v22   ;;  %v3737_v22 = vld [vmem:[%s476_s20] ss:$0 sm:$0xff] }
 0x1ee   : > { %3488 = vmatmul.msk.f32.vlgmr.msra.gmra.mxu0 %vm715_vm7, %v4047_v30  ;;  %3489 = vmatmul.msk.f32.vlgmr.msra.gmra.mxu1 %vm715_vm7, %v4047_v30 }
 0x1f2   : > { %v3696_v28 = vpop.permute.xlu0 %3695  ;;  %v1519_v60 = vpop.f32.mrf.mxu0 }
 0x1f3   : > { %v3698_v59 = vunpack.i.h.bf16 %v3696_v28  ;;  %v3697_v1 = vunpack.i.l.bf16 %v3696_v28  ;;  %v4637_v18 = vadd.f32 %v1519_v60, %v4577_v3  ;;  %v1539_v31 = vpop.f32.mrf.mxu1  ;;  %v4642_v6 = vpop.f32.mrf.mxu3 }
 0x1f4   : > { %v4640_v15 = vadd.f32 %v1539_v31, %v4580_v38  ;;  %v1752_v45 = vpop.f32.mrf.mxu2 }
 0x1f5   : > { %v2500_v4 = vsel %vm2496_vm0, %v3697_v1, %v3698_v59 }
 0x1f6   : > { %3492 = vmatmul.msk.f32.vlgmr.msrb.gmra.mxu0 %vm715_vm7, %v4047_v30  ;;  %3493 = vmatmul.msk.f32.vlgmr.msrb.gmra.mxu1 %vm715_vm7, %v4047_v30 }
 0x1f7   : > { %2591 = vmatpush.msra.mxu3 %v2500_v4 }
 0x1f8   : > { %3502 = vmatmul.msk.f32.vlgmr.msra.gmra.mxu3 %vm715_vm7, %v4050_v32 }
 0x1fb   : > { %v1852_v3 = vpop.f32.mrf.mxu3 }
 0x1fc   : > { %v1862_v23 = vadd.f32 %v1852_v3, %v1589_v61  ;;  %v1832_v28 = vpop.f32.mrf.mxu2 }
 0x201   : > { %v3706_v10 = vpop.permute.xlu0 %3705 }
 0x202   : > { %v3708_v11 = vunpack.i.h.bf16 %v3706_v10  ;;  %v3707_v38 = vunpack.i.l.bf16 %v3706_v10  ;;  %v1858_v10 = vadd.f32 %v4642_v6, %v4562_v16 }
 0x203   : > { %v3701_v26 = vpop.permute.xlu1 %3700 }
 0x204   : > { %v3703_v51 = vunpack.i.h.bf16 %v3701_v26  ;;  %v3702_v63 = vunpack.i.l.bf16 %v3701_v26  ;;  %v1712_v55 = vpop.f32.mrf.mxu0  ;;  %v1732_v14 = vpop.f32.mrf.mxu1 }
 0x206   : > { %v2499_v29 = vsel %vm2496_vm0, %v3702_v63, %v3697_v1  ;;  %v2504_v7 = vsel %vm2496_vm0, %v3703_v51, %v3707_v38  ;;  %v2503_v12 = vsel %vm2496_vm0, %v3708_v11, %v3703_v51  ;;  %v4718_v51 = vld [vmem:[%s4818_s5] sm:$0xff] }
 0x207   : > { %2571 = vmatpush.msra.mxu2 %v2499_v29  ;;  %2671 = vmatpush.msrb.mxu3 %v2504_v7  ;;  %v2963_v7 = vperm.slane %v4718_v51, 3 }
 0x208   : > { %3501 = vmatmul.msk.f32.vlgmr.msra.gmra.mxu2 %vm715_vm7, %v4050_v32  ;;  %3506 = vmatmul.msk.f32.vlgmr.msrb.gmra.mxu3 %vm715_vm7, %v4050_v32 }
 0x209   : > { %2651 = vmatpush.msrb.mxu2 %v2503_v12 }
 0x20c   : > { %v3711_v30 = vpop.permute.xlu1 %3710  ;;  %v1792_v60 = vpop.f32.mrf.mxu0 }
 0x20d   : > { %v3713_v8 = vunpack.i.h.bf16 %v3711_v30  ;;  %v3712_v34 = vunpack.i.l.bf16 %v3711_v30 }
 0x20f   : > { %v2497_v21 = vsel %vm2496_vm0, %v3713_v8, %v3712_v34  ;;  %v2498_v56 = vsel %vm2496_vm0, %v3712_v34, %v3702_v63 }
 0x210   : > { %2531 = vmatpush.msra.mxu0 %v2497_v21  ;;  %2551 = vmatpush.msra.mxu1 %v2498_v56 }
 0x211   : > { %3499 = vmatmul.msk.f32.vlgmr.msra.gmra.mxu0 %vm715_vm7, %v4050_v32  ;;  %3500 = vmatmul.msk.f32.vlgmr.msra.gmra.mxu1 %vm715_vm7, %v4050_v32 }
 0x212   : > { %3505 = vmatmul.msk.f32.vlgmr.msrb.gmra.mxu2 %vm715_vm7, %v4050_v32 }
 0x213   : > { %v2046_v24 = vpop.f32.mrf.mxu3 }
 0x214   : > { %v2489_v58 = vpop.permute.xlu1 %2488 }
 0x215   : > { %v2501_v44 = vsel %vm2496_vm0, %v3698_v59, %v2489_v58  ;;  %v2502_v35 = vsel %vm2496_vm0, %v2489_v58, %v3708_v11  ;;  %v4705_v59 = vpop.f32.mrf.mxu1  ;;  %v2132_v11 = vadd.f32 %v2046_v24, %v1858_v10 }
 0x216   : > { %2611 = vmatpush.msrb.mxu0 %v2501_v44  ;;  %2631 = vmatpush.msrb.mxu1 %v2502_v35 }
 0x219   : > { %3503 = vmatmul.msk.f32.vlgmr.msrb.gmra.mxu0 %vm715_vm7, %v4050_v32  ;;  %3504 = vmatmul.msk.f32.vlgmr.msrb.gmra.mxu1 %vm715_vm7, %v4050_v32 }
 0x21d   : > { %v1986_v4 = vpop.f32.mrf.mxu0 }
 0x222   : > { %v3716_v37 = vpop.permute.xlu2 %3715 }
 0x223   : > { %v3718_v39 = vunpack.i.h.bf16 %v3716_v37  ;;  %v3717_v42 = vunpack.i.l.bf16 %v3716_v37 }
 0x225   : > { %v2774_v9 = vsel %vm2770_vm1, %v3717_v42, %v3718_v39 }
 0x226   : > { %2865 = vmatpush.msra.mxu3 %v2774_v9 }
 0x227   : > { %3513 = vmatmul.msk.f32.vlgmr.msra.gmra.mxu3 %vm715_vm7, %v4053_v33 }
 0x23b   : > { %v3726_v17 = vpop.permute.xlu2 %3725 }
 0x23c   : > { %v3728_v50 = vunpack.i.h.bf16 %v3726_v17  ;;  %v3727_v32 = vunpack.i.l.bf16 %v3726_v17  ;;  %v2006_v3 = vpop.f32.mrf.mxu1  ;;  %v3054_v17 = vld [vmem:[%s4821_s8] sm:$0x7] }
 0x23d   : > { %v4740_v24 = vmul.f32 %v3737_v22, %v3054_v17 }
 0x242   : > { %v2026_v31 = vpop.f32.mrf.mxu2 }
 0x245   : > { %v4721_v16 = vpop.permute.xlu2 %2987 }
 0x24a   : > { %v3721_v47 = vpop.permute.xlu0 %3720 }
 0x24b   : > { %v3723_v43 = vunpack.i.h.bf16 %v3721_v47  ;;  %v3722_v53 = vunpack.i.l.bf16 %v3721_v47 }
 0x24d   : > { %v2773_v36 = vsel %vm2770_vm1, %v3722_v53, %v3717_v42  ;;  %v2778_v46 = vsel %vm2770_vm1, %v3723_v43, %v3727_v32  ;;  %v2777_v62 = vsel %vm2770_vm1, %v3728_v50, %v3723_v43 }
 0x24e   : > { %2845 = vmatpush.msra.mxu2 %v2773_v36  ;;  %2945 = vmatpush.msrb.mxu3 %v2778_v46  ;;  %v1855_v36 = vadd.f32 %v1712_v55, %v4612_v25  ;;  %v1856_v46 = vadd.f32 %v1732_v14, %v4615_v48  ;;  %v2962_v25 = vperm.slane %v4718_v51, 2  ;;  %v2967_v48 = vperm.slane %v4718_v51, 7 }
 0x24f   : > { %3512 = vmatmul.msk.f32.vlgmr.msra.gmra.mxu2 %vm715_vm7, %v4053_v33  ;;  %3517 = vmatmul.msk.f32.vlgmr.msrb.gmra.mxu3 %vm715_vm7, %v4053_v33  ;;  %v1859_v55 = vadd.f32 %v1792_v60, %v4637_v18 }
 0x250   : > { %2925 = vmatpush.msrb.mxu2 %v2777_v62 }
 0x251   : > { %v2763_v40 = vpop.permute.xlu1 %2762 }
 0x252   : > { %v3731_v54 = vpop.permute.xlu0 %3730  ;;  %v2126_v2 = vpop.f32.mrf.mxu3  ;;  %v2775_v20 = vsel %vm2770_vm1, %v3718_v39, %v2763_v40  ;;  %v2776_v49 = vsel %vm2770_vm1, %v2763_v40, %v3728_v50  ;;  %v2130_v40 = vadd.f32 %v2006_v3, %v1856_v46 }
 0x253   : > { %v3733_v57 = vunpack.i.h.bf16 %v3731_v54  ;;  %v3732_v61 = vunpack.i.l.bf16 %v3731_v54  ;;  %v4685_v52 = vadd.f32 %v2126_v2, %v1862_v23  ;;  %v4709_v38 = vpop.f32.mrf.mxu2  ;;  %v2129_v2 = vadd.f32 %v1986_v4, %v1855_v36 }
 0x255   : > { %v2771_v5 = vsel %vm2770_vm1, %v3733_v57, %v3732_v61  ;;  %v2772_v13 = vsel %vm2770_vm1, %v3732_v61, %v3722_v53  ;;  %v1857_v53 = vadd.f32 %v1752_v45, %v4584_v19  ;;  %v3064_v61 = vld [vmem:[%s4822_s9] sm:$0x7]  ;;  %v1861_v45 = vadd.f32 %v1832_v28, %v4601_v27 }
 0x256   : > { %2805 = vmatpush.msra.mxu0 %v2771_v5  ;;  %2825 = vmatpush.msra.mxu1 %v2772_v13 }
 0x257   : > { %3510 = vmatmul.msk.f32.vlgmr.msra.gmra.mxu0 %vm715_vm7, %v4053_v33  ;;  %3511 = vmatmul.msk.f32.vlgmr.msra.gmra.mxu1 %vm715_vm7, %v4053_v33  ;;  %v2131_v57 = vadd.f32 %v2026_v31, %v1857_v53 }
 0x258   : > { %2885 = vmatpush.msrb.mxu0 %v2775_v20  ;;  %2905 = vmatpush.msrb.mxu1 %v2776_v49 }
 0x259   : > { %3516 = vmatmul.msk.f32.vlgmr.msrb.gmra.mxu2 %vm715_vm7, %v4053_v33  ;;  %3067 = vperm.xlu0 %3735, %v3064_v61  }
 0x25a   : > { %v2319_v41 = vpop.f32.mrf.mxu3 }
 0x25b   : > { %v2405_v63 = vadd.f32 %v2319_v41, %v2132_v11  ;;  %v2135_v11 = vadd.f32 %v4709_v38, %v1861_v45 }
 0x25f   : > { %3514 = vmatmul.msk.f32.vlgmr.msrb.gmra.mxu0 %vm715_vm7, %v4053_v33  ;;  %3515 = vmatmul.msk.f32.vlgmr.msrb.gmra.mxu1 %vm715_vm7, %v4053_v33 }
 0x262   : > { %v2299_v8 = vpop.f32.mrf.mxu2 }
 0x263   : > { %v4711_v33 = vpop.f32.mrf.mxu0  ;;  %v4713_v26 = vpop.f32.mrf.mxu1  ;;  %v2404_v5 = vadd.f32 %v2299_v8, %v2131_v57 }
 0x26b   : > { %v2259_v21 = vpop.f32.mrf.mxu0  ;;  %v2279_v56 = vpop.f32.mrf.mxu1 }
 0x26c   : > { %v2402_v20 = vadd.f32 %v2259_v21, %v2129_v2  ;;  %v2403_v49 = vadd.f32 %v2279_v56, %v2130_v40 }
 0x26d   : > { %v2399_v0 = vpop.f32.mrf.mxu3  ;;  %v2379_v39 = vpop.f32.mrf.mxu2 }
 0x26e   : > { %v2409_v13 = vadd.f32 %v2399_v0, %v4685_v52  ;;  %v2960_v52 = vperm.slane %v4718_v51, 0  ;;  %v2961_v0 = vperm.slane %v4718_v51, 1 }
 0x273   : > { %v2339_v42 = vpop.f32.mrf.mxu0  ;;  %v2359_v9 = vpop.f32.mrf.mxu1 }
 0x27b   : > { %v2593_v1 = vpop.f32.mrf.mxu3 }
 0x27c   : > { %v2679_v29 = vadd.f32 %v2593_v1, %v2405_v63  ;;  %v2133_v63 = vadd.f32 %v4711_v33, %v1859_v55 }
 0x28b   : > { %v2673_v23 = vpop.f32.mrf.mxu3  ;;  %v2573_v47 = vpop.f32.mrf.mxu2 }
 0x28c   : > { %v2678_v19 = vadd.f32 %v2573_v47, %v2404_v5  ;;  %v2683_v41 = vadd.f32 %v2673_v23, %v2409_v13  ;;  %v1860_v23 = vadd.f32 %v4705_v59, %v4640_v15 }
 0x28e   : > { %v2533_v50 = vpop.f32.mrf.mxu0  ;;  %v2553_v32 = vpop.f32.mrf.mxu1 }
 0x28f   : > { %v2676_v14 = vadd.f32 %v2533_v50, %v2402_v20  ;;  %v2677_v1 = vadd.f32 %v2553_v32, %v2403_v49 }
 0x295   : > { %v2653_v43 = vpop.f32.mrf.mxu2 }
 0x296   : > { %v2613_v62 = vpop.f32.mrf.mxu0  ;;  %v2633_v54 = vpop.f32.mrf.mxu1 }
 0x2aa   : > { %v2867_v12 = vpop.f32.mrf.mxu3 }
 0x2ab   : > { %v2953_v30 = vadd.f32 %v2867_v12, %v2679_v29  ;;  %v2134_v12 = vadd.f32 %v4713_v26, %v1860_v23 }
 0x2ad   : > { %v2979_v6 = vadd.f32 %v2963_v7, %v2953_v30  ;;  %v2408_v30 = vadd.f32 %v2379_v39, %v2135_v11  ;;  %v2407_v59 = vadd.f32 %v2359_v9, %v2134_v12  ;;  %v2964_v39 = vperm.slane %v4718_v51, 4 }
 0x2af   : > { %v2993_v34 = vadd.f32 %v4721_v16, %v2979_v6  ;;  %v2406_v6 = vadd.f32 %v2339_v42, %v2133_v63  ;;  %v2682_v38 = vadd.f32 %v2653_v43, %v2408_v30  ;;  %v2965_v42 = vperm.slane %v4718_v51, 5 }
 0x2b1   : > { %vm3001_vm2 = vcmp.ge.f32.partialorder %v2993_v34, 0.0  ;;  %v3009_v58 = vmul.f32 0.2, %v2993_v34  ;;  %v2680_v56 = vadd.f32 %v2613_v62, %v2406_v6 }
 0x2b3   : > { %v3017_v44 = vsel %vm3001_vm2, %v2993_v34, %v3009_v58 }
 0x2b4   : > { %v3025_v35 = vmul.f32 1.4142135, %v3017_v44  ;;  %v2681_v44 = vadd.f32 %v2633_v54, %v2407_v59 }
 0x2b6   : > { %v3521_v37 = vclamps-f32 %v3025_v35, 256.0 }
 0x2b8   : > { %3049 = vst [vmem:[%s4729_s14 + $0x18] sm:$0xff] %v3521_v37  ;;  %3148 = vmatpush.msra.mxu3 %v3521_v37  ;;  %v2966_v37 = vperm.slane %v4718_v51, 6 }
 0x2b9   : > { %3529 = vmatmul.msk.f32.vlgmr.msra.gmra.mxu3 %vm715_vm7, %v4740_v24 }
 0x2d2   : > { %v2847_v31 = vpop.f32.mrf.mxu2  ;;  %v2947_v4 = vpop.f32.mrf.mxu3 }
 0x2d3   : > { %v2952_v3 = vadd.f32 %v2847_v31, %v2678_v19  ;;  %v2957_v10 = vadd.f32 %v2947_v4, %v2683_v41 }
 0x2d4   : > { %v2807_v27 = vpop.f32.mrf.mxu0  ;;  %v2827_v28 = vpop.f32.mrf.mxu1 }
 0x2d5   : > { %v2978_v18 = vadd.f32 %v2962_v25, %v2952_v3  ;;  %v2983_v60 = vadd.f32 %v2967_v48, %v2957_v10  ;;  %v2950_v29 = vadd.f32 %v2807_v27, %v2676_v14  ;;  %v2951_v7 = vadd.f32 %v2827_v28, %v2677_v1  ;;  %v3068_v27 = vpop.permute.xlu0 %3067 }
 0x2d7   : > { %v2992_v8 = vadd.f32 %v4721_v16, %v2978_v18  ;;  %v2997_v34 = vadd.f32 %v4721_v16, %v2983_v60  ;;  %v2976_v21 = vadd.f32 %v2960_v52, %v2950_v29  ;;  %v2977_v15 = vadd.f32 %v2961_v0, %v2951_v7 }
 0x2d9   : > { %vm3000_vm3 = vcmp.ge.f32.partialorder %v2992_v8, 0.0  ;;  %v3008_v33 = vmul.f32 0.2, %v2992_v8  ;;  %vm3005_vm4 = vcmp.ge.f32.partialorder %v2997_v34, 0.0  ;;  %v3013_v58 = vmul.f32 0.2, %v2997_v34 }
 0x2da   : > { %v2990_v35 = vadd.f32 %v4721_v16, %v2976_v21  ;;  %v2991_v26 = vadd.f32 %v4721_v16, %v2977_v15  ;;  %v3060_v15 = vld [vmem:[%s4797_s19] sm:$0x77] }
 0x2db   : > { %v3016_v22 = vsel %vm3000_vm3, %v2992_v8, %v3008_v33  ;;  %v3021_v17 = vsel %vm3005_vm4, %v2997_v34, %v3013_v58 }
 0x2dc   : > { %vm2998_vm5 = vcmp.ge.f32.partialorder %v2990_v35, 0.0  ;;  %v3006_v9 = vmul.f32 0.2, %v2990_v35  ;;  %vm2999_vm6 = vcmp.ge.f32.partialorder %v2991_v26, 0.0  ;;  %v3007_v47 = vmul.f32 0.2, %v2991_v26  ;;  %v2927_v50 = vpop.f32.mrf.mxu2  ;;  %v2887_v32 = vpop.f32.mrf.mxu0 }
 0x2dd   : > { %v2956_v43 = vadd.f32 %v2927_v50, %v2682_v38  ;;  %v2954_v53 = vadd.f32 %v2887_v32, %v2680_v56  ;;  %v2907_v36 = vpop.f32.mrf.mxu1  ;;  %v3024_v46 = vmul.f32 1.4142135, %v3016_v22  ;;  %v3029_v62 = vmul.f32 1.4142135, %v3021_v17  ;;  %v3061_v56 = vld [vmem:[%s4797_s19 + $0x8] sm:$0x77] }
 0x2de   : > { %v2955_v54 = vadd.f32 %v2907_v36, %v2681_v44  ;;  %v3014_v57 = vsel %vm2998_vm5, %v2990_v35, %v3006_v9  ;;  %v3015_v61 = vsel %vm2999_vm6, %v2991_v26, %v3007_v47 }
 0x2df   : > { %v2982_v2 = vadd.f32 %v2966_v37, %v2956_v43  ;;  %v2980_v51 = vadd.f32 %v2964_v39, %v2954_v53  ;;  %v3520_v40 = vclamps-f32 %v3024_v46, 256.0  ;;  %v3525_v5 = vclamps-f32 %v3029_v62, 256.0  ;;  %v3062_v53 = vld [vmem:[%s4797_s19 + $0x10] sm:$0x77]  ;;  %v3063_v62 = vld [vmem:[%s4797_s19 + $0x18] sm:$0x77] }
 0x2e0   : > { %v2981_v13 = vadd.f32 %v2965_v42, %v2955_v54  ;;  %v3022_v20 = vmul.f32 1.4142135, %v3014_v57  ;;  %v3023_v49 = vmul.f32 1.4142135, %v3015_v61 }
 0x2e1   : > { %v2996_v19 = vadd.f32 %v4721_v16, %v2982_v2  ;;  %v2994_v41 = vadd.f32 %v4721_v16, %v2980_v51  ;;  %3048 = vst [vmem:[%s4729_s14 + $0x10] sm:$0xff] %v3520_v40  ;;  %3128 = vmatpush.msra.mxu2 %v3520_v40  ;;  %3228 = vmatpush.msrb.mxu3 %v3525_v5 }
 0x2e2   : > { %v2995_v25 = vadd.f32 %v4721_v16, %v2981_v13  ;;  %3053 = vst [vmem:[%s4729_s14 + $0x38] sm:$0xff] %v3525_v5  ;;  %v3518_v48 = vclamps-f32 %v3022_v20, 256.0  ;;  %v3519_v45 = vclamps-f32 %v3023_v49, 256.0  ;;  %3528 = vmatmul.msk.f32.vlgmr.msra.gmra.mxu2 %vm715_vm7, %v4740_v24  ;;  %3533 = vmatmul.msk.f32.vlgmr.msrb.gmra.mxu3 %vm715_vm7, %v4740_v24 }
 0x2e3   : > { %vm3004_vm8 = vcmp.ge.f32.partialorder %v2996_v19, 0.0  ;;  %v3012_v55 = vmul.f32 0.2, %v2996_v19  ;;  %vm3002_vm9 = vcmp.ge.f32.partialorder %v2994_v41, 0.0  ;;  %v3010_v14 = vmul.f32 0.2, %v2994_v41 }
 0x2e4   : > { %vm3003_vm10 = vcmp.ge.f32.partialorder %v2995_v25, 0.0  ;;  %v3011_v1 = vmul.f32 0.2, %v2995_v25  ;;  %3046 = vst [vmem:[%s4729_s14] sm:$0xff] %v3518_v48  ;;  %3088 = vmatpush.msra.mxu0 %v3518_v48  ;;  %3108 = vmatpush.msra.mxu1 %v3519_v45 }
 0x2e5   : > { %3047 = vst [vmem:[%s4729_s14 + $0x8] sm:$0xff] %v3519_v45  ;;  %v3020_v16 = vsel %vm3004_vm8, %v2996_v19, %v3012_v55  ;;  %3527 = vmatmul.msk.f32.vlgmr.msra.gmra.mxu1 %vm715_vm7, %v4740_v24  ;;  %v3018_v31 = vsel %vm3002_vm9, %v2994_v41, %v3010_v14  ;;  %3526 = vmatmul.msk.f32.vlgmr.msra.gmra.mxu0 %vm715_vm7, %v4740_v24 }
 0x2e6   : > { %v3028_v4 = vmul.f32 1.4142135, %v3020_v16  ;;  %v3026_v3 = vmul.f32 1.4142135, %v3018_v31  ;;  %v3019_v10 = vsel %vm3003_vm10, %v2995_v25, %v3011_v1 }
 0x2e7   : > { %v3027_v52 = vmul.f32 1.4142135, %v3019_v10 }
 0x2e8   : > { %v3524_v0 = vclamps-f32 %v3028_v4, 256.0  ;;  %v3522_v23 = vclamps-f32 %v3026_v3, 256.0 }
 0x2e9   : > { %v3523_v11 = vclamps-f32 %v3027_v52, 256.0 }
 0x2ea   : > { %3052 = vst [vmem:[%s4729_s14 + $0x30] sm:$0xff] %v3524_v0  ;;  %3208 = vmatpush.msrb.mxu2 %v3524_v0  ;;  %3168 = vmatpush.msrb.mxu0 %v3522_v23 }
 0x2eb   : > { %3050 = vst [vmem:[%s4729_s14 + $0x20] sm:$0xff] %v3522_v23  ;;  %3188 = vmatpush.msrb.mxu1 %v3523_v11  ;;  %3532 = vmatmul.msk.f32.vlgmr.msrb.gmra.mxu2 %vm715_vm7, %v4740_v24 }
 0x2ec   : > { %3051 = vst [vmem:[%s4729_s14 + $0x28] sm:$0xff] %v3523_v11 }
 0x2ed   : > { %3531 = vmatmul.msk.f32.vlgmr.msrb.gmra.mxu1 %vm715_vm7, %v4740_v24  ;;  %3530 = vmatmul.msk.f32.vlgmr.msrb.gmra.mxu0 %vm715_vm7, %v4740_v24  ;;  %vm3261_vm7 = vcmask 1043456  }
 0x33c   : > { %v3150_v63 = vpop.f32.mrf.mxu3 }
 0x33d   : > { %v3151_v28 = vadd.f32 %v3150_v63, %v3068_v27 }
 0x33f   : > { %v3537_v29 = vclamps-f32 %v3151_v28, 256.0 }
 0x341   : > { %v3258_v21 = vrot.slane %v3537_v29, 4 }
 0x362   : > { %v3110_v18 = vpop.f32.mrf.mxu1  ;;  %v3090_v60 = vpop.f32.mrf.mxu0 }
 0x363   : > { %v3091_v7 = vadd.f32 %v3090_v60, %v3068_v27  ;;  %v3111_v12 = vadd.f32 %v3110_v18, %v3068_v27 }
 0x365   : > { %v3534_v30 = vclamps-f32 %v3091_v7, 256.0  ;;  %v3535_v6 = vclamps-f32 %v3111_v12, 256.0  ;;  %v3130_v8 = vpop.f32.mrf.mxu2  ;;  %v3230_v24 = vpop.f32.mrf.mxu3 }
 0x366   : > { %v3131_v34 = vadd.f32 %v3130_v8, %v3068_v27  ;;  %v3231_v38 = vadd.f32 %v3230_v24, %v3068_v27 }
 0x367   : > { %v3257_v59 = vrot.slane %v3535_v6, 4 }
 0x368   : > { %v3536_v33 = vclamps-f32 %v3131_v34, 256.0  ;;  %v3541_v22 = vclamps-f32 %v3231_v38, 256.0 }
 0x369   : > { %v3262_v58 = vsel %vm3261_vm7, %v3534_v30, %v3257_v59 }
 0x36a   : > { %v3270_v44 = vadd.f32 %v3262_v58, %v3060_v15  ;;  %v3263_v35 = vsel %vm3261_vm7, %v3536_v33, %v3258_v21  ;;  %v3190_v26 = vpop.f32.mrf.mxu1  ;;  %v3170_v37 = vpop.f32.mrf.mxu0  ;;  %v3260_v43 = vrot.slane %v3541_v22, 4 }
 0x36b   : > { %v3271_v39 = vadd.f32 %v3263_v35, %v3061_v56  ;;  %v3191_v42 = vadd.f32 %v3190_v26, %v3068_v27  ;;  %v3171_v17 = vadd.f32 %v3170_v37, %v3068_v27 }
 0x36c   : > { %3274 = vst [vmem:[%s491_s24] sm:$0x77] %v3270_v44 }
 0x36d   : > { %3275 = vst [vmem:[%s491_s24 + $0x8] sm:$0x77] %v3271_v39  ;;  %v3539_v9 = vclamps-f32 %v3191_v42, 256.0  ;;  %v3538_v47 = vclamps-f32 %v3171_v17, 256.0 }
 0x36e   : > { %v3210_v50 = vpop.f32.mrf.mxu2 }
 0x36f   : > { %v3259_v32 = vrot.slane %v3539_v9, 4  ;;  %v3211_v36 = vadd.f32 %v3210_v50, %v3068_v27 }
 0x371   : > { %v3264_v46 = vsel %vm3261_vm7, %v3538_v47, %v3259_v32  ;;  %v3540_v54 = vclamps-f32 %v3211_v36, 256.0 }
 0x372   : > { %v3272_v57 = vadd.f32 %v3264_v46, %v3062_v53 }
 0x373   : > { %v3265_v61 = vsel %vm3261_vm7, %v3540_v54, %v3260_v43 }
 0x374   : > { %3276 = vst [vmem:[%s491_s24 + $0x10] sm:$0x77] %v3272_v57  ;;  %v3273_v2 = vadd.f32 %v3265_v61, %v3063_v62 }
 0x376   : > { %3277 = vst [vmem:[%s491_s24 + $0x18] sm:$0x77] %v3273_v2 }
 0x377 PF: > { %s23_s21 = sadd.s32 1, %s3753_s21  }
 0x378   : > { %p20_p4 = scmp.ge.s32.totalorder %s23_s21, 4  }
 0x37a   :  { %22 = sbr.rel (!%p20_p4) target bundleno = 1 (0x1), region = 134 }

</bundles_post_ra>
